<compile_context>
chip_gen: v7x
topology: tpu7x:2x2x1
jax: 0.10.0
libtpu: 0.0.40
codegen_flags: <defaults>
</compile_context>

<pallas_src>
import jax
import jax.numpy as jnp
from jax import lax
from jax.experimental import pallas as pl
from jax.experimental.pallas import tpu as pltpu


def _downconv_kernel(x_ref, w_ref, b_ref, o_ref, xpad_scr, col_scr, acc_scr):
    # x_ref:    (1, H, W, Cin)      bf16  NHWC activation (one image, unpadded)
    # w_ref:    (9*Cin, Cout8)      bf16  im2col weights, BN scale folded in
    # b_ref:    (1, Cout8)          f32   BN shift + conv bias (sublane-padded)
    # o_ref:    (1, Ho*Wo, Cout8)   bf16  pooled output
    # xpad_scr: (H+2, W+2, Cin)     bf16  zero-padded activation (VMEM)
    # col_scr:  (RB*W, 9*Cin)       bf16  im2col tile for one row block (VMEM)
    # acc_scr:  (RB*W, Cout8)       f32   conv accumulator for one row block (VMEM)
    H, W, Cin = x_ref.shape[1], x_ref.shape[2], x_ref.shape[3]
    C = o_ref.shape[2]                       # Cout padded to a multiple of 8
    RBW = col_scr.shape[0]                   # RB * W
    RB = RBW // W                            # image rows per block (even)
    Wo = W // 2
    HBo = RB // 2                            # pooled rows produced per block
    nblk = H // RB

    # Build the zero-padded halo once per image, entirely in VMEM
    # (no wrapper-side jnp.pad pass over HBM).
    xpad_scr[...] = jnp.zeros_like(xpad_scr)
    xpad_scr[1:H + 1, 1:W + 1, :] = x_ref[0]

    # Loop-invariant constants (hoisted out of the row-block loop).
    w_mat = w_ref[...]                       # (9*Cin, C) bf16
    shift = b_ref[...]                       # (1, C) f32

    def block(hb, carry):
        r0 = pl.multiple_of(hb * RB, RB)

        # im2col for this row block: one (RB*W, 9*Cin) VMEM tile, so the 3x3
        # conv becomes a single K=9*Cin MXU matmul instead of 9 K=Cin ones.
        for kh in range(3):
            for kw in range(3):
                tap = kh * 3 + kw
                slab = xpad_scr[pl.ds(r0 + kh, RB), kw:kw + W, :]   # (RB, W, Cin)
                col_scr[:, tap * Cin:(tap + 1) * Cin] = slab.reshape(RBW, Cin)

        # Fused conv matmul, f32 accumulation written straight to VMEM scratch
        # (bounds vreg pressure; no accumulate chain through the vreg file).
        acc_scr[...] = jnp.dot(col_scr[...], w_mat,
                               preferred_element_type=jnp.float32)

        # 2x2 / stride-2 max pool on the RAW accumulator using sublane-strided
        # loads (even/odd W columns), then an H-pair max via a leading-dim-only
        # reshape (last two dims untouched -> no relayout).
        ew = acc_scr[pl.ds(0, RBW // 2, stride=2), :]   # (RB*Wo, C), w even
        ow = acc_scr[pl.ds(1, RBW // 2, stride=2), :]   # (RB*Wo, C), w odd
        yw = jnp.maximum(ew, ow).reshape(HBo, 2, Wo, C)
        yh = jnp.maximum(yw[:, 0], yw[:, 1])            # (HBo, Wo, C)

        # Per-channel BN shift (+conv bias) and ReLU on the 4x smaller pooled
        # tile.  NOTE: this reorder is only valid because the shift is a
        # per-channel constant and ReLU is monotone.
        yb = jnp.maximum(yh + shift, 0.0)

        off = pl.multiple_of(hb * (HBo * Wo), HBo * Wo)
        o_ref[0, pl.ds(off, HBo * Wo), :] = (
            yb.reshape(HBo * Wo, C).astype(o_ref.dtype))
        return carry

    lax.fori_loop(0, nblk, block, 0, unroll=True)


def downconv_pallas(x_nchw, conv_w, conv_b, gamma, beta, run_mean, run_var, eps=1e-5):
    N, Cin, H, W = x_nchw.shape
    Cout = conv_w.shape[0]
    assert H % 2 == 0 and W % 2 == 0
    Ho, Wo = H // 2, W // 2
    Cout8 = ((Cout + 7) // 8) * 8            # sublane padding only (not 128 lanes)

    # even row-block size for the in-kernel M tiling
    RB = next(r for r in (8, 4, 2) if H % r == 0)

    # Activation glue: single NCHW->NHWC pass fused with the bf16 cast.  The
    # conv halo is built in-kernel, so there is no jnp.pad pass.  In a real
    # NHWC pipeline this transpose would not exist.
    x = jnp.transpose(x_nchw, (0, 2, 3, 1)).astype(jnp.bfloat16)

    # Fold BatchNorm (eval) into the constants:
    #   (conv(x)+b - mean)*s + beta  ==  conv_{w*s}(x) + ((b-mean)*s + beta)
    scale = gamma / jnp.sqrt(run_var + eps)                               # (Cout,)
    shift = (conv_b - run_mean) * scale + beta                            # (Cout,)
    w2 = jnp.transpose(conv_w, (2, 3, 1, 0)).reshape(9 * Cin, Cout)       # (kh*3+kw)*Cin+c
    w2 = w2 * scale[None, :]
    w2 = jnp.pad(w2, ((0, 0), (0, Cout8 - Cout))).astype(jnp.bfloat16)
    shift_p = jnp.pad(shift, (0, Cout8 - Cout)).reshape(1, Cout8).astype(jnp.float32)

    out = pl.pallas_call(
        _downconv_kernel,
        out_shape=jax.ShapeDtypeStruct((N, Ho * Wo, Cout8), jnp.bfloat16),
        grid_spec=pltpu.PrefetchScalarGridSpec(
            num_scalar_prefetch=0,
            grid=(N,),
            in_specs=[
                pl.BlockSpec((1, H, W, Cin), lambda n: (n, 0, 0, 0)),
                pl.BlockSpec((9 * Cin, Cout8), lambda n: (0, 0)),
                pl.BlockSpec((1, Cout8), lambda n: (0, 0)),
            ],
            out_specs=pl.BlockSpec((1, Ho * Wo, Cout8), lambda n: (n, 0, 0)),
            scratch_shapes=[
                pltpu.VMEM((H + 2, W + 2, Cin), jnp.bfloat16),   # padded activation
                pltpu.VMEM((RB * W, 9 * Cin), jnp.bfloat16),     # im2col tile
                pltpu.VMEM((RB * W, Cout8), jnp.float32),        # conv accumulator
            ],
        ),
        compiler_params=pltpu.CompilerParams(dimension_semantics=("parallel",)),
    )(x, w2, shift_p)

    # (N, Ho*Wo, Cout8) bf16 -> drop sublane channel padding -> NCHW.
    # This final transpose touches only the tiny pooled bf16 tensor.
    out = out.reshape(N, Ho, Wo, Cout8)[..., :Cout]
    return out.transpose(0, 3, 1, 2)


def downconv_reference(x, conv_w, conv_b, gamma, beta, run_mean, run_var, eps=1e-5):
    """Plain-JAX reference matching PyTorch Conv2d+BN(eval)+ReLU+MaxPool2d(2,2)."""
    y = lax.conv_general_dilated(x, conv_w, window_strides=(1, 1),
                                 padding=((1, 1), (1, 1)),
                                 dimension_numbers=("NCHW", "OIHW", "NCHW"))
    y = y + conv_b[None, :, None, None]
    s = gamma / jnp.sqrt(run_var + eps)
    y = (y - run_mean[None, :, None, None]) * s[None, :, None, None] + beta[None, :, None, None]
    y = jnp.maximum(y, 0.0)
    y = lax.reduce_window(y, -jnp.inf, lax.max, (1, 1, 2, 2), (1, 1, 2, 2), "VALID")
    return y


if __name__ == "__main__":
    # Small shapes consistent with the module: N=2, Cin=4, Cout=8, H=W=16.
    N, Cin, Cout, H, W = 2, 4, 8, 16, 16
    key = jax.random.PRNGKey(0)
    kx, kw, kb, kg, kbe, km, kv = jax.random.split(key, 7)

    x = jax.random.normal(kx, (N, Cin, H, W), jnp.float32)
    conv_w = jax.random.normal(kw, (Cout, Cin, 3, 3), jnp.float32) * 0.2
    conv_b = jax.random.normal(kb, (Cout,), jnp.float32) * 0.1
    gamma = 1.0 + 0.1 * jax.random.normal(kg, (Cout,), jnp.float32)
    beta = 0.1 * jax.random.normal(kbe, (Cout,), jnp.float32)
    run_mean = 0.1 * jax.random.normal(km, (Cout,), jnp.float32)
    run_var = jnp.abs(jax.random.normal(kv, (Cout,), jnp.float32)) + 0.5

    out = downconv_pallas(x, conv_w, conv_b, gamma, beta, run_mean, run_var)
    out = jax.block_until_ready(out)

    ref = downconv_reference(x, conv_w, conv_b, gamma, beta, run_mean, run_var)
    assert out.shape == (N, Cout, H // 2, W // 2), out.shape
    # bf16 activations/weights/output vs f32 reference -> loosened tolerance.
    err = float(jnp.max(jnp.abs(out.astype(jnp.float32) - ref)))
    assert jnp.allclose(out.astype(jnp.float32), ref, rtol=5e-2, atol=8e-2), err

    print("KERNEL_OK")
</pallas_src>

<mosaic_0001>
module attributes {stable_mosaic.version = 11 : i64} {
  func.func @_downconv_kernel(%arg0: i32, %arg1: memref<1x16x16x4xbf16, #tpu.memory_space<vmem>>, %arg2: memref<36x8xbf16, #tpu.memory_space<vmem>>, %arg3: memref<1x8xf32, #tpu.memory_space<vmem>>, %arg4: memref<1x64x8xbf16, #tpu.memory_space<vmem>>, %arg5: memref<18x18x4xbf16, #tpu.memory_space<vmem>>, %arg6: memref<128x36xbf16, #tpu.memory_space<vmem>>, %arg7: memref<128x8xf32, #tpu.memory_space<vmem>>) attributes {dimension_semantics = [#tpu.dimension_semantics<parallel>], iteration_bounds = array<i64: 2>, scalar_prefetch = 0 : i64, scratch_operands = 3 : i64, tpu.core_type = #tpu.core_type<tc>, window_params = [{transform_indices = @transform_0, window_bounds = array<i64: 1, 16, 16, 4>}, {pipeline_mode = #tpu.pipeline_mode<synchronous>, transform_indices = @transform_1, window_bounds = array<i64: 36, 8>}, {pipeline_mode = #tpu.pipeline_mode<synchronous>, transform_indices = @transform_2, window_bounds = array<i64: 1, 8>}, {transform_indices = @transform_3, window_bounds = array<i64: 1, 64, 8>}]} {
    %cst = arith.constant 0.000000e+00 : bf16
    %0 = vector.broadcast %cst : bf16 to vector<18x18x4xbf16>
    %c0 = arith.constant 0 : index
    %c0_0 = arith.constant 0 : index
    %c0_1 = arith.constant 0 : index
    %1 = vector.load %arg5[%c0, %c0_0, %c0_1] : memref<18x18x4xbf16, #tpu.memory_space<vmem>>, vector<18x18x4xbf16>
    tpu.vector_store %arg5[%c0, %c0_0, %c0_1], %0 {strides = array<i32>} : memref<18x18x4xbf16, #tpu.memory_space<vmem>>, vector<18x18x4xbf16>,
    %c0_2 = arith.constant 0 : index
    %c0_3 = arith.constant 0 : index
    %c0_4 = arith.constant 0 : index
    %c0_5 = arith.constant 0 : index
    %2 = vector.load %arg1[%c0_2, %c0_3, %c0_4, %c0_5] : memref<1x16x16x4xbf16, #tpu.memory_space<vmem>>, vector<1x16x16x4xbf16>
    %3 = vector.shape_cast %2 : vector<1x16x16x4xbf16> to vector<16x16x4xbf16>
    %c1 = arith.constant 1 : index
    %c1_6 = arith.constant 1 : index
    %c0_7 = arith.constant 0 : index
    %4 = vector.load %arg5[%c1, %c1_6, %c0_7] : memref<18x18x4xbf16, #tpu.memory_space<vmem>>, vector<16x16x4xbf16>
    tpu.vector_store %arg5[%c1, %c1_6, %c0_7], %3 {strides = array<i32>} : memref<18x18x4xbf16, #tpu.memory_space<vmem>>, vector<16x16x4xbf16>,
    %c0_8 = arith.constant 0 : index
    %c0_9 = arith.constant 0 : index
    %5 = vector.load %arg2[%c0_8, %c0_9] : memref<36x8xbf16, #tpu.memory_space<vmem>>, vector<36x8xbf16>
    %c0_10 = arith.constant 0 : index
    %c0_11 = arith.constant 0 : index
    %6 = vector.load %arg3[%c0_10, %c0_11] : memref<1x8xf32, #tpu.memory_space<vmem>>, vector<1x8xf32>
    %c0_i32 = arith.constant 0 : i32
    %c8_i32 = arith.constant 8 : i32
    %7 = arith.muli %c0_i32, %c8_i32 : i32
    %8 = tpu.assume_multiple %7, 8 : i32
    %c0_i32_12 = arith.constant 0 : i32
    %9 = arith.addi %8, %c0_i32_12 : i32
    %10 = arith.index_cast %9 : i32 to index
    %c0_13 = arith.constant 0 : index
    %c0_14 = arith.constant 0 : index
    %11 = vector.load %arg5[%10, %c0_13, %c0_14] : memref<18x18x4xbf16, #tpu.memory_space<vmem>>, vector<8x16x4xbf16>
    %12 = vector.shape_cast %11 : vector<8x16x4xbf16> to vector<128x4xbf16>
    %c0_15 = arith.constant 0 : index
    %c0_16 = arith.constant 0 : index
    %13 = vector.load %arg6[%c0_15, %c0_16] : memref<128x36xbf16, #tpu.memory_space<vmem>>, vector<128x4xbf16>
    tpu.vector_store %arg6[%c0_15, %c0_16], %12 {strides = array<i32>} : memref<128x36xbf16, #tpu.memory_space<vmem>>, vector<128x4xbf16>,
    %c0_i32_17 = arith.constant 0 : i32
    %14 = arith.addi %8, %c0_i32_17 : i32
    %15 = arith.index_cast %14 : i32 to index
    %c1_18 = arith.constant 1 : index
    %c0_19 = arith.constant 0 : index
    %16 = vector.load %arg5[%15, %c1_18, %c0_19] : memref<18x18x4xbf16, #tpu.memory_space<vmem>>, vector<8x16x4xbf16>
    %17 = vector.shape_cast %16 : vector<8x16x4xbf16> to vector<128x4xbf16>
    %c0_20 = arith.constant 0 : index
    %c4 = arith.constant 4 : index
    %18 = vector.load %arg6[%c0_20, %c4] : memref<128x36xbf16, #tpu.memory_space<vmem>>, vector<128x4xbf16>
    tpu.vector_store %arg6[%c0_20, %c4], %17 {strides = array<i32>} : memref<128x36xbf16, #tpu.memory_space<vmem>>, vector<128x4xbf16>,
    %c0_i32_21 = arith.constant 0 : i32
    %19 = arith.addi %8, %c0_i32_21 : i32
    %20 = arith.index_cast %19 : i32 to index
    %c2 = arith.constant 2 : index
    %c0_22 = arith.constant 0 : index
    %21 = vector.load %arg5[%20, %c2, %c0_22] : memref<18x18x4xbf16, #tpu.memory_space<vmem>>, vector<8x16x4xbf16>
    %22 = vector.shape_cast %21 : vector<8x16x4xbf16> to vector<128x4xbf16>
    %c0_23 = arith.constant 0 : index
    %c8 = arith.constant 8 : index
    %23 = vector.load %arg6[%c0_23, %c8] : memref<128x36xbf16, #tpu.memory_space<vmem>>, vector<128x4xbf16>
    tpu.vector_store %arg6[%c0_23, %c8], %22 {strides = array<i32>} : memref<128x36xbf16, #tpu.memory_space<vmem>>, vector<128x4xbf16>,
    %c1_i32 = arith.constant 1 : i32
    %24 = arith.addi %8, %c1_i32 : i32
    %25 = arith.index_cast %24 : i32 to index
    %c0_24 = arith.constant 0 : index
    %c0_25 = arith.constant 0 : index
    %26 = vector.load %arg5[%25, %c0_24, %c0_25] : memref<18x18x4xbf16, #tpu.memory_space<vmem>>, vector<8x16x4xbf16>
    %27 = vector.shape_cast %26 : vector<8x16x4xbf16> to vector<128x4xbf16>
    %c0_26 = arith.constant 0 : index
    %c12 = arith.constant 12 : index
    %28 = vector.load %arg6[%c0_26, %c12] : memref<128x36xbf16, #tpu.memory_space<vmem>>, vector<128x4xbf16>
    tpu.vector_store %arg6[%c0_26, %c12], %27 {strides = array<i32>} : memref<128x36xbf16, #tpu.memory_space<vmem>>, vector<128x4xbf16>,
    %c1_i32_27 = arith.constant 1 : i32
    %29 = arith.addi %8, %c1_i32_27 : i32
    %30 = arith.index_cast %29 : i32 to index
    %c1_28 = arith.constant 1 : index
    %c0_29 = arith.constant 0 : index
    %31 = vector.load %arg5[%30, %c1_28, %c0_29] : memref<18x18x4xbf16, #tpu.memory_space<vmem>>, vector<8x16x4xbf16>
    %32 = vector.shape_cast %31 : vector<8x16x4xbf16> to vector<128x4xbf16>
    %c0_30 = arith.constant 0 : index
    %c16 = arith.constant 16 : index
    %33 = vector.load %arg6[%c0_30, %c16] : memref<128x36xbf16, #tpu.memory_space<vmem>>, vector<128x4xbf16>
    tpu.vector_store %arg6[%c0_30, %c16], %32 {strides = array<i32>} : memref<128x36xbf16, #tpu.memory_space<vmem>>, vector<128x4xbf16>,
    %c1_i32_31 = arith.constant 1 : i32
    %34 = arith.addi %8, %c1_i32_31 : i32
    %35 = arith.index_cast %34 : i32 to index
    %c2_32 = arith.constant 2 : index
    %c0_33 = arith.constant 0 : index
    %36 = vector.load %arg5[%35, %c2_32, %c0_33] : memref<18x18x4xbf16, #tpu.memory_space<vmem>>, vector<8x16x4xbf16>
    %37 = vector.shape_cast %36 : vector<8x16x4xbf16> to vector<128x4xbf16>
    %c0_34 = arith.constant 0 : index
    %c20 = arith.constant 20 : index
    %38 = vector.load %arg6[%c0_34, %c20] : memref<128x36xbf16, #tpu.memory_space<vmem>>, vector<128x4xbf16>
    tpu.vector_store %arg6[%c0_34, %c20], %37 {strides = array<i32>} : memref<128x36xbf16, #tpu.memory_space<vmem>>, vector<128x4xbf16>,
    %c2_i32 = arith.constant 2 : i32
    %39 = arith.addi %8, %c2_i32 : i32
    %40 = arith.index_cast %39 : i32 to index
    %c0_35 = arith.constant 0 : index
    %c0_36 = arith.constant 0 : index
    %41 = vector.load %arg5[%40, %c0_35, %c0_36] : memref<18x18x4xbf16, #tpu.memory_space<vmem>>, vector<8x16x4xbf16>
    %42 = vector.shape_cast %41 : vector<8x16x4xbf16> to vector<128x4xbf16>
    %c0_37 = arith.constant 0 : index
    %c24 = arith.constant 24 : index
    %43 = vector.load %arg6[%c0_37, %c24] : memref<128x36xbf16, #tpu.memory_space<vmem>>, vector<128x4xbf16>
    tpu.vector_store %arg6[%c0_37, %c24], %42 {strides = array<i32>} : memref<128x36xbf16, #tpu.memory_space<vmem>>, vector<128x4xbf16>,
    %c2_i32_38 = arith.constant 2 : i32
    %44 = arith.addi %8, %c2_i32_38 : i32
    %45 = arith.index_cast %44 : i32 to index
    %c1_39 = arith.constant 1 : index
    %c0_40 = arith.constant 0 : index
    %46 = vector.load %arg5[%45, %c1_39, %c0_40] : memref<18x18x4xbf16, #tpu.memory_space<vmem>>, vector<8x16x4xbf16>
    %47 = vector.shape_cast %46 : vector<8x16x4xbf16> to vector<128x4xbf16>
    %c0_41 = arith.constant 0 : index
    %c28 = arith.constant 28 : index
    %48 = vector.load %arg6[%c0_41, %c28] : memref<128x36xbf16, #tpu.memory_space<vmem>>, vector<128x4xbf16>
    tpu.vector_store %arg6[%c0_41, %c28], %47 {strides = array<i32>} : memref<128x36xbf16, #tpu.memory_space<vmem>>, vector<128x4xbf16>,
    %c2_i32_42 = arith.constant 2 : i32
    %49 = arith.addi %8, %c2_i32_42 : i32
    %50 = arith.index_cast %49 : i32 to index
    %c2_43 = arith.constant 2 : index
    %c0_44 = arith.constant 0 : index
    %51 = vector.load %arg5[%50, %c2_43, %c0_44] : memref<18x18x4xbf16, #tpu.memory_space<vmem>>, vector<8x16x4xbf16>
    %52 = vector.shape_cast %51 : vector<8x16x4xbf16> to vector<128x4xbf16>
    %c0_45 = arith.constant 0 : index
    %c32 = arith.constant 32 : index
    %53 = vector.load %arg6[%c0_45, %c32] : memref<128x36xbf16, #tpu.memory_space<vmem>>, vector<128x4xbf16>
    tpu.vector_store %arg6[%c0_45, %c32], %52 {strides = array<i32>} : memref<128x36xbf16, #tpu.memory_space<vmem>>, vector<128x4xbf16>,
    %c0_46 = arith.constant 0 : index
    %c0_47 = arith.constant 0 : index
    %54 = vector.load %arg6[%c0_46, %c0_47] : memref<128x36xbf16, #tpu.memory_space<vmem>>, vector<128x36xbf16>
    %cst_48 = arith.constant dense<0.000000e+00> : vector<128x8xf32>
    %55 = tpu.matmul %54, %5, %cst_48 {dimension_numbers = #tpu.dot_dimension_numbers<[1], [0], [0], [1], [0, 0, 1, 1], [], []>} : vector<128x36xbf16>, vector<36x8xbf16>, vector<128x8xf32> -> vector<128x8xf32>
    %c0_49 = arith.constant 0 : index
    %c0_50 = arith.constant 0 : index
    %56 = vector.load %arg7[%c0_49, %c0_50] : memref<128x8xf32, #tpu.memory_space<vmem>>, vector<128x8xf32>
    tpu.vector_store %arg7[%c0_49, %c0_50], %55 {strides = array<i32>} : memref<128x8xf32, #tpu.memory_space<vmem>>, vector<128x8xf32>,
    %c0_51 = arith.constant 0 : index
    %c0_52 = arith.constant 0 : index
    %57 = tpu.strided_load %arg7[%c0_51, %c0_52] {strides = array<i32: 2, 1>} : memref<128x8xf32, #tpu.memory_space<vmem>>, vector<64x8xf32>
    %c1_53 = arith.constant 1 : index
    %c0_54 = arith.constant 0 : index
    %58 = tpu.strided_load %arg7[%c1_53, %c0_54] {strides = array<i32: 2, 1>} : memref<128x8xf32, #tpu.memory_space<vmem>>, vector<64x8xf32>
    %59 = arith.maximumf %57, %58 : vector<64x8xf32>
    %60 = vector.shape_cast %59 : vector<64x8xf32> to vector<4x2x8x8xf32>
    %61 = vector.extract_strided_slice %60 {offsets = [0, 0, 0, 0], sizes = [4, 1, 8, 8], strides = [1, 1, 1, 1]} : vector<4x2x8x8xf32> to vector<4x1x8x8xf32>
    %62 = vector.shape_cast %61 : vector<4x1x8x8xf32> to vector<4x8x8xf32>
    %63 = vector.extract_strided_slice %60 {offsets = [0, 1, 0, 0], sizes = [4, 1, 8, 8], strides = [1, 1, 1, 1]} : vector<4x2x8x8xf32> to vector<4x1x8x8xf32>
    %64 = vector.shape_cast %63 : vector<4x1x8x8xf32> to vector<4x8x8xf32>
    %65 = arith.maximumf %62, %64 : vector<4x8x8xf32>
    %66 = vector.shape_cast %6 : vector<1x8xf32> to vector<1x1x8xf32>
    %67 = vector.broadcast %66 : vector<1x1x8xf32> to vector<4x8x8xf32>
    %68 = arith.addf %65, %67 : vector<4x8x8xf32>
    %cst_55 = arith.constant 0.000000e+00 : f32
    %69 = vector.broadcast %cst_55 : f32 to vector<4x8x8xf32>
    %70 = arith.maximumf %68, %69 : vector<4x8x8xf32>
    %c32_i32 = arith.constant 32 : i32
    %71 = arith.muli %c0_i32, %c32_i32 : i32
    %72 = tpu.assume_multiple %71, 32 : i32
    %73 = vector.shape_cast %70 : vector<4x8x8xf32> to vector<32x8xf32>
    %74 = arith.truncf %73 : vector<32x8xf32> to vector<32x8xbf16>
    %c0_56 = arith.constant 0 : index
    %75 = arith.index_cast %72 : i32 to index
    %c0_57 = arith.constant 0 : index
    %76 = vector.load %arg4[%c0_56, %75, %c0_57] : memref<1x64x8xbf16, #tpu.memory_space<vmem>>, vector<1x32x8xbf16>
    %77 = vector.shape_cast %76 : vector<1x32x8xbf16> to vector<32x8xbf16>
    %78 = vector.shape_cast %74 : vector<32x8xbf16> to vector<1x32x8xbf16>
    tpu.vector_store %arg4[%c0_56, %75, %c0_57], %78 {strides = array<i32>} : memref<1x64x8xbf16, #tpu.memory_space<vmem>>, vector<1x32x8xbf16>,
    %c1_i32_58 = arith.constant 1 : i32
    %c8_i32_59 = arith.constant 8 : i32
    %79 = arith.muli %c1_i32_58, %c8_i32_59 : i32
    %80 = tpu.assume_multiple %79, 8 : i32
    %c0_i32_60 = arith.constant 0 : i32
    %81 = arith.addi %80, %c0_i32_60 : i32
    %82 = arith.index_cast %81 : i32 to index
    %c0_61 = arith.constant 0 : index
    %c0_62 = arith.constant 0 : index
    %83 = vector.load %arg5[%82, %c0_61, %c0_62] : memref<18x18x4xbf16, #tpu.memory_space<vmem>>, vector<8x16x4xbf16>
    %84 = vector.shape_cast %83 : vector<8x16x4xbf16> to vector<128x4xbf16>
    %c0_63 = arith.constant 0 : index
    %c0_64 = arith.constant 0 : index
    %85 = vector.load %arg6[%c0_63, %c0_64] : memref<128x36xbf16, #tpu.memory_space<vmem>>, vector<128x4xbf16>
    tpu.vector_store %arg6[%c0_63, %c0_64], %84 {strides = array<i32>} : memref<128x36xbf16, #tpu.memory_space<vmem>>, vector<128x4xbf16>,
    %c0_i32_65 = arith.constant 0 : i32
    %86 = arith.addi %80, %c0_i32_65 : i32
    %87 = arith.index_cast %86 : i32 to index
    %c1_66 = arith.constant 1 : index
    %c0_67 = arith.constant 0 : index
    %88 = vector.load %arg5[%87, %c1_66, %c0_67] : memref<18x18x4xbf16, #tpu.memory_space<vmem>>, vector<8x16x4xbf16>
    %89 = vector.shape_cast %88 : vector<8x16x4xbf16> to vector<128x4xbf16>
    %c0_68 = arith.constant 0 : index
    %c4_69 = arith.constant 4 : index
    %90 = vector.load %arg6[%c0_68, %c4_69] : memref<128x36xbf16, #tpu.memory_space<vmem>>, vector<128x4xbf16>
    tpu.vector_store %arg6[%c0_68, %c4_69], %89 {strides = array<i32>} : memref<128x36xbf16, #tpu.memory_space<vmem>>, vector<128x4xbf16>,
    %c0_i32_70 = arith.constant 0 : i32
    %91 = arith.addi %80, %c0_i32_70 : i32
    %92 = arith.index_cast %91 : i32 to index
    %c2_71 = arith.constant 2 : index
    %c0_72 = arith.constant 0 : index
    %93 = vector.load %arg5[%92, %c2_71, %c0_72] : memref<18x18x4xbf16, #tpu.memory_space<vmem>>, vector<8x16x4xbf16>
    %94 = vector.shape_cast %93 : vector<8x16x4xbf16> to vector<128x4xbf16>
    %c0_73 = arith.constant 0 : index
    %c8_74 = arith.constant 8 : index
    %95 = vector.load %arg6[%c0_73, %c8_74] : memref<128x36xbf16, #tpu.memory_space<vmem>>, vector<128x4xbf16>
    tpu.vector_store %arg6[%c0_73, %c8_74], %94 {strides = array<i32>} : memref<128x36xbf16, #tpu.memory_space<vmem>>, vector<128x4xbf16>,
    %c1_i32_75 = arith.constant 1 : i32
    %96 = arith.addi %80, %c1_i32_75 : i32
    %97 = arith.index_cast %96 : i32 to index
    %c0_76 = arith.constant 0 : index
    %c0_77 = arith.constant 0 : index
    %98 = vector.load %arg5[%97, %c0_76, %c0_77] : memref<18x18x4xbf16, #tpu.memory_space<vmem>>, vector<8x16x4xbf16>
    %99 = vector.shape_cast %98 : vector<8x16x4xbf16> to vector<128x4xbf16>
    %c0_78 = arith.constant 0 : index
    %c12_79 = arith.constant 12 : index
    %100 = vector.load %arg6[%c0_78, %c12_79] : memref<128x36xbf16, #tpu.memory_space<vmem>>, vector<128x4xbf16>
    tpu.vector_store %arg6[%c0_78, %c12_79], %99 {strides = array<i32>} : memref<128x36xbf16, #tpu.memory_space<vmem>>, vector<128x4xbf16>,
    %c1_i32_80 = arith.constant 1 : i32
    %101 = arith.addi %80, %c1_i32_80 : i32
    %102 = arith.index_cast %101 : i32 to index
    %c1_81 = arith.constant 1 : index
    %c0_82 = arith.constant 0 : index
    %103 = vector.load %arg5[%102, %c1_81, %c0_82] : memref<18x18x4xbf16, #tpu.memory_space<vmem>>, vector<8x16x4xbf16>
    %104 = vector.shape_cast %103 : vector<8x16x4xbf16> to vector<128x4xbf16>
    %c0_83 = arith.constant 0 : index
    %c16_84 = arith.constant 16 : index
    %105 = vector.load %arg6[%c0_83, %c16_84] : memref<128x36xbf16, #tpu.memory_space<vmem>>, vector<128x4xbf16>
    tpu.vector_store %arg6[%c0_83, %c16_84], %104 {strides = array<i32>} : memref<128x36xbf16, #tpu.memory_space<vmem>>, vector<128x4xbf16>,
    %c1_i32_85 = arith.constant 1 : i32
    %106 = arith.addi %80, %c1_i32_85 : i32
    %107 = arith.index_cast %106 : i32 to index
    %c2_86 = arith.constant 2 : index
    %c0_87 = arith.constant 0 : index
    %108 = vector.load %arg5[%107, %c2_86, %c0_87] : memref<18x18x4xbf16, #tpu.memory_space<vmem>>, vector<8x16x4xbf16>
    %109 = vector.shape_cast %108 : vector<8x16x4xbf16> to vector<128x4xbf16>
    %c0_88 = arith.constant 0 : index
    %c20_89 = arith.constant 20 : index
    %110 = vector.load %arg6[%c0_88, %c20_89] : memref<128x36xbf16, #tpu.memory_space<vmem>>, vector<128x4xbf16>
    tpu.vector_store %arg6[%c0_88, %c20_89], %109 {strides = array<i32>} : memref<128x36xbf16, #tpu.memory_space<vmem>>, vector<128x4xbf16>,
    %c2_i32_90 = arith.constant 2 : i32
    %111 = arith.addi %80, %c2_i32_90 : i32
    %112 = arith.index_cast %111 : i32 to index
    %c0_91 = arith.constant 0 : index
    %c0_92 = arith.constant 0 : index
    %113 = vector.load %arg5[%112, %c0_91, %c0_92] : memref<18x18x4xbf16, #tpu.memory_space<vmem>>, vector<8x16x4xbf16>
    %114 = vector.shape_cast %113 : vector<8x16x4xbf16> to vector<128x4xbf16>
    %c0_93 = arith.constant 0 : index
    %c24_94 = arith.constant 24 : index
    %115 = vector.load %arg6[%c0_93, %c24_94] : memref<128x36xbf16, #tpu.memory_space<vmem>>, vector<128x4xbf16>
    tpu.vector_store %arg6[%c0_93, %c24_94], %114 {strides = array<i32>} : memref<128x36xbf16, #tpu.memory_space<vmem>>, vector<128x4xbf16>,
    %c2_i32_95 = arith.constant 2 : i32
    %116 = arith.addi %80, %c2_i32_95 : i32
    %117 = arith.index_cast %116 : i32 to index
    %c1_96 = arith.constant 1 : index
    %c0_97 = arith.constant 0 : index
    %118 = vector.load %arg5[%117, %c1_96, %c0_97] : memref<18x18x4xbf16, #tpu.memory_space<vmem>>, vector<8x16x4xbf16>
    %119 = vector.shape_cast %118 : vector<8x16x4xbf16> to vector<128x4xbf16>
    %c0_98 = arith.constant 0 : index
    %c28_99 = arith.constant 28 : index
    %120 = vector.load %arg6[%c0_98, %c28_99] : memref<128x36xbf16, #tpu.memory_space<vmem>>, vector<128x4xbf16>
    tpu.vector_store %arg6[%c0_98, %c28_99], %119 {strides = array<i32>} : memref<128x36xbf16, #tpu.memory_space<vmem>>, vector<128x4xbf16>,
    %c2_i32_100 = arith.constant 2 : i32
    %121 = arith.addi %80, %c2_i32_100 : i32
    %122 = arith.index_cast %121 : i32 to index
    %c2_101 = arith.constant 2 : index
    %c0_102 = arith.constant 0 : index
    %123 = vector.load %arg5[%122, %c2_101, %c0_102] : memref<18x18x4xbf16, #tpu.memory_space<vmem>>, vector<8x16x4xbf16>
    %124 = vector.shape_cast %123 : vector<8x16x4xbf16> to vector<128x4xbf16>
    %c0_103 = arith.constant 0 : index
    %c32_104 = arith.constant 32 : index
    %125 = vector.load %arg6[%c0_103, %c32_104] : memref<128x36xbf16, #tpu.memory_space<vmem>>, vector<128x4xbf16>
    tpu.vector_store %arg6[%c0_103, %c32_104], %124 {strides = array<i32>} : memref<128x36xbf16, #tpu.memory_space<vmem>>, vector<128x4xbf16>,
    %c0_105 = arith.constant 0 : index
    %c0_106 = arith.constant 0 : index
    %126 = vector.load %arg6[%c0_105, %c0_106] : memref<128x36xbf16, #tpu.memory_space<vmem>>, vector<128x36xbf16>
    %cst_107 = arith.constant dense<0.000000e+00> : vector<128x8xf32>
    %127 = tpu.matmul %126, %5, %cst_107 {dimension_numbers = #tpu.dot_dimension_numbers<[1], [0], [0], [1], [0, 0, 1, 1], [], []>} : vector<128x36xbf16>, vector<36x8xbf16>, vector<128x8xf32> -> vector<128x8xf32>
    %c0_108 = arith.constant 0 : index
    %c0_109 = arith.constant 0 : index
    %128 = vector.load %arg7[%c0_108, %c0_109] : memref<128x8xf32, #tpu.memory_space<vmem>>, vector<128x8xf32>
    tpu.vector_store %arg7[%c0_108, %c0_109], %127 {strides = array<i32>} : memref<128x8xf32, #tpu.memory_space<vmem>>, vector<128x8xf32>,
    %c0_110 = arith.constant 0 : index
    %c0_111 = arith.constant 0 : index
    %129 = tpu.strided_load %arg7[%c0_110, %c0_111] {strides = array<i32: 2, 1>} : memref<128x8xf32, #tpu.memory_space<vmem>>, vector<64x8xf32>
    %c1_112 = arith.constant 1 : index
    %c0_113 = arith.constant 0 : index
    %130 = tpu.strided_load %arg7[%c1_112, %c0_113] {strides = array<i32: 2, 1>} : memref<128x8xf32, #tpu.memory_space<vmem>>, vector<64x8xf32>
    %131 = arith.maximumf %129, %130 : vector<64x8xf32>
    %132 = vector.shape_cast %131 : vector<64x8xf32> to vector<4x2x8x8xf32>
    %133 = vector.extract_strided_slice %132 {offsets = [0, 0, 0, 0], sizes = [4, 1, 8, 8], strides = [1, 1, 1, 1]} : vector<4x2x8x8xf32> to vector<4x1x8x8xf32>
    %134 = vector.shape_cast %133 : vector<4x1x8x8xf32> to vector<4x8x8xf32>
    %135 = vector.extract_strided_slice %132 {offsets = [0, 1, 0, 0], sizes = [4, 1, 8, 8], strides = [1, 1, 1, 1]} : vector<4x2x8x8xf32> to vector<4x1x8x8xf32>
    %136 = vector.shape_cast %135 : vector<4x1x8x8xf32> to vector<4x8x8xf32>
    %137 = arith.maximumf %134, %136 : vector<4x8x8xf32>
    %138 = vector.shape_cast %6 : vector<1x8xf32> to vector<1x1x8xf32>
    %139 = vector.broadcast %138 : vector<1x1x8xf32> to vector<4x8x8xf32>
    %140 = arith.addf %137, %139 : vector<4x8x8xf32>
    %cst_114 = arith.constant 0.000000e+00 : f32
    %141 = vector.broadcast %cst_114 : f32 to vector<4x8x8xf32>
    %142 = arith.maximumf %140, %141 : vector<4x8x8xf32>
    %c32_i32_115 = arith.constant 32 : i32
    %143 = arith.muli %c1_i32_58, %c32_i32_115 : i32
    %144 = tpu.assume_multiple %143, 32 : i32
    %145 = vector.shape_cast %142 : vector<4x8x8xf32> to vector<32x8xf32>
    %146 = arith.truncf %145 : vector<32x8xf32> to vector<32x8xbf16>
    %c0_116 = arith.constant 0 : index
    %147 = arith.index_cast %144 : i32 to index
    %c0_117 = arith.constant 0 : index
    %148 = vector.load %arg4[%c0_116, %147, %c0_117] : memref<1x64x8xbf16, #tpu.memory_space<vmem>>, vector<1x32x8xbf16>
    %149 = vector.shape_cast %148 : vector<1x32x8xbf16> to vector<32x8xbf16>
    %150 = vector.shape_cast %146 : vector<32x8xbf16> to vector<1x32x8xbf16>
    tpu.vector_store %arg4[%c0_116, %147, %c0_117], %150 {strides = array<i32>} : memref<1x64x8xbf16, #tpu.memory_space<vmem>>, vector<1x32x8xbf16>,
    %c2_i32_118 = arith.constant 2 : i32
    return
  }
  func.func @transform_0(%arg0: i32) -> (i32, i32, i32, i32) {
    %c0_i32 = arith.constant 0 : i32
    %c0_i32_0 = arith.constant 0 : i32
    %c0_i32_1 = arith.constant 0 : i32
    %c0_i32_2 = arith.constant 0 : i32
    return %arg0, %c0_i32, %c0_i32_0, %c0_i32_1 : i32, i32, i32, i32
  }
  func.func @transform_1(%arg0: i32) -> (i32, i32) {
    %c0_i32 = arith.constant 0 : i32
    %c0_i32_0 = arith.constant 0 : i32
    %c0_i32_1 = arith.constant 0 : i32
    return %c0_i32, %c0_i32_0 : i32, i32
  }
  func.func @transform_2(%arg0: i32) -> (i32, i32) {
    %c0_i32 = arith.constant 0 : i32
    %c0_i32_0 = arith.constant 0 : i32
    %c0_i32_1 = arith.constant 0 : i32
    return %c0_i32, %c0_i32_0 : i32, i32
  }
  func.func @transform_3(%arg0: i32) -> (i32, i32, i32) {
    %c0_i32 = arith.constant 0 : i32
    %c0_i32_0 = arith.constant 0 : i32
    %c0_i32_1 = arith.constant 0 : i32
    return %arg0, %c0_i32, %c0_i32_0 : i32, i32, i32
  }
}

</mosaic_0001>

<bundles_post_ra>
// kernel: tpu_custom_call.1
= control target key start
LH: loop header
LB: loop body
LE: loop exit
PB: predicated region body
PF: predicated region fallthrough
CT: control target
= control target key end

     0   :  { %s4756_s12 = smov 0   ;;  %s6011_s0 = inlined_call_operand.vmem [shape: bf16[2,16,16,4], index: 0, kind: input, shape index: {}]   ;;  %s6012_s1 = inlined_call_operand.vmem [shape: bf16[36,8], index: 1, kind: input, shape index: {}]   ;;  %s6013_s2 = inlined_call_operand.vmem [shape: f32[1,8], index: 2, kind: input, shape index: {}]   ;;  %s6014_s3 = inlined_call_operand.vmem [shape: bf16[2,64,8], index: 3, kind: output, shape index: {}]  }
   0x1 LB: > { %s4338_s13 = sadd.s32 4294967295, %s4725_s12   ;;  %p4342_p0 = scmp.ge.s32.totalorder %s4725_s12, 1  ;;  %s4725_s12 = sphi %s4756_s12, %s13_s12  }
   0x2   : > { %p137_p1 = scmp.lt.s32.totalorder %s4725_s12, 3 }
   0x4   : > { %p138_p2 = pnand %p4342_p0, %p137_p1 }
   0x5   : > { %vm172_vm0 = vcmask (!%p138_p2), 27648   ;;  %vm175_vm1 = vcmask (!%p138_p2), 24576   ;;  %v4727_v0 = vmov (!%p138_p2), 0   ;;  %p161_p3 = scmp.lt.s32.totalorder (!%p138_p2), %s4338_s13, 1  ;;  %vm1107_vm2 = vcmask (!%p138_p2), 1042432   ;;  %s4728_s18 = smov (!%p138_p2), 8  }
   0x6   : > { %141 = sbr.rel (%p138_p2) target bundleno = 754 (0x2f2), region = 32  ;;  %173 = vst.msk [vmem:[#allocation2] sm:$0xf] (!%p138_p2), %vm172_vm0, %v4727_v0  ;;  %174 = vst.msk [vmem:[#allocation2 + $0x4] sm:$0xf] (!%p138_p2), %vm172_vm0, %v4727_v0  ;;  %vm1108_vm3 = vcmask (!%p138_p2), 1046532  }
   0x7   : > { %176 = vst.msk [vmem:[#allocation2 + $0x8] sm:$0x1] (!%p138_p2), %vm175_vm1, %v4727_v0  ;;  %179 = vst.msk [vmem:[#allocation2 + $0x14] sm:$0x1] (!%p138_p2), %vm175_vm1, %v4727_v0  ;;  %vm807_vm4 = vsmask.f32 (!%p138_p2), 3328 }
   0x8   : > { %177 = vst.msk [vmem:[#allocation2 + $0xc] sm:$0xf] (!%p138_p2), %vm172_vm0, %v4727_v0  ;;  %178 = vst.msk [vmem:[#allocation2 + $0x10] sm:$0xf] (!%p138_p2), %vm172_vm0, %v4727_v0  ;;  %vm808_vm5 = vsmask.f32 (!%p138_p2), 7440 }
   0x9   : > { %180 = vst.msk [vmem:[#allocation2 + $0x18] sm:$0xf] (!%p138_p2), %vm172_vm0, %v4727_v0  ;;  %181 = vst.msk [vmem:[#allocation2 + $0x1c] sm:$0xf] (!%p138_p2), %vm172_vm0, %v4727_v0  ;;  %vm260_vm7 = vsmask.f32 (!%p138_p2), 256 }
   0xa   : > { %182 = vst.msk [vmem:[#allocation2 + $0x20] sm:$0x1] (!%p138_p2), %vm175_vm1, %v4727_v0  ;;  %185 = vst.msk [vmem:[#allocation2 + $0x2c] sm:$0x1] (!%p138_p2), %vm175_vm1, %v4727_v0  ;;  %vm261_vm8 = vsmask.f32 (!%p138_p2), 4368 }
   0xb   : > { %183 = vst.msk [vmem:[#allocation2 + $0x24] sm:$0xf] (!%p138_p2), %vm172_vm0, %v4727_v0  ;;  %184 = vst.msk [vmem:[#allocation2 + $0x28] sm:$0xf] (!%p138_p2), %vm172_vm0, %v4727_v0  ;;  %vm585_vm9 = vsmask.f32 (!%p138_p2), 7938 }
   0xc   : > { %186 = vst.msk [vmem:[#allocation2 + $0x30] sm:$0xf] (!%p138_p2), %vm172_vm0, %v4727_v0  ;;  %187 = vst.msk [vmem:[#allocation2 + $0x34] sm:$0xf] (!%p138_p2), %vm172_vm0, %v4727_v0  ;;  %s4729_s19 = smov (!%p138_p2), 4   ;;  %s4730_s20 = smov (!%p138_p2), 12  }
   0xd   : > { %188 = vst.msk [vmem:[#allocation2 + $0x38] sm:$0x1] %vm175_vm1, %v4727_v0  ;;  %191 = vst.msk [vmem:[#allocation2 + $0x44] sm:$0x1] %vm175_vm1, %v4727_v0  ;;  %s6026_s13 = smov (!%p161_p3, %s4338_s13), 1  ;;  %s4731_s21 = smov 24  }
   0xe   : > { %189 = vst.msk [vmem:[#allocation2 + $0x3c] sm:$0xf] %vm172_vm0, %v4727_v0  ;;  %190 = vst.msk [vmem:[#allocation2 + $0x40] sm:$0xf] %vm172_vm0, %v4727_v0  ;;  %s4573_s14 = sshll.u32 %s6026_s13, 7  ;;  %s4732_s22 = smov 20  }
   0xf   : > { %192 = vst.msk [vmem:[#allocation2 + $0x48] sm:$0xf] %vm172_vm0, %v4727_v0  ;;  %193 = vst.msk [vmem:[#allocation2 + $0x4c] sm:$0xf] %vm172_vm0, %v4727_v0  ;;  %s4828_s17 = scalar_lea.vmem %s6011_s0, %s4573_s14  ;;  %v1059_v3 = vld [vmem:[#allocation2] sm:$0xe] }
  0x10   : > { %194 = vst.msk [vmem:[#allocation2 + $0x50] sm:$0x1] %vm175_vm1, %v4727_v0  ;;  %197 = vst.msk [vmem:[#allocation2 + $0x5c] sm:$0x1] %vm175_vm1, %v4727_v0  ;;  %v230_v2 = vld [vmem:[%s4828_s17 + $0x8] sm:$0xf] }
  0x11   : > { %195 = vst.msk [vmem:[#allocation2 + $0x54] sm:$0xf] %vm172_vm0, %v4727_v0  ;;  %196 = vst.msk [vmem:[#allocation2 + $0x58] sm:$0xf] %vm172_vm0, %v4727_v0  ;;  %v1060_v4 = vld [vmem:[#allocation2 + $0x4] sm:$0xf] }
  0x12   : > { %198 = vst.msk [vmem:[#allocation2 + $0x60] sm:$0xf] %vm172_vm0, %v4727_v0  ;;  %199 = vst.msk [vmem:[#allocation2 + $0x64] sm:$0xf] %vm172_vm0, %v4727_v0  ;;  %v1061_v5 = vld [vmem:[#allocation2 + $0x8] sm:$0x1] }
  0x13   : > { %200 = vst.msk [vmem:[#allocation2 + $0x68] sm:$0x1] %vm175_vm1, %v4727_v0  ;;  %203 = vst.msk [vmem:[#allocation2 + $0x74] sm:$0x1] %vm175_vm1, %v4727_v0  ;;  %v4363_v6 = vrot.slane %v1059_v3, 9  ;;  %v1112_v7 = vrot.slane %v1060_v4, 5 }
  0x14   : > { %201 = vst.msk [vmem:[#allocation2 + $0x6c] sm:$0xf] %vm172_vm0, %v4727_v0  ;;  %202 = vst.msk [vmem:[#allocation2 + $0x70] sm:$0xf] %vm172_vm0, %v4727_v0  ;;  %v1115_v8 = vrot.slane %v1061_v5, 5  ;;  %v281_v10 = vshrl.u32 %v230_v2, 16 }
  0x15   : > { %204 = vst.msk [vmem:[#allocation2 + $0x78] sm:$0xf] %vm172_vm0, %v4727_v0  ;;  %205 = vst.msk [vmem:[#allocation2 + $0x7c] sm:$0xf] %vm172_vm0, %v4727_v0  ;;  %v783_v9 = vld [vmem:[#allocation2] sm:$0xf] }
  0x16   : > { %206 = vst.msk [vmem:[#allocation2 + $0x80] sm:$0x1] %vm175_vm1, %v4727_v0  ;;  %209 = vst.msk [vmem:[#allocation2 + $0x8c] sm:$0x1] %vm175_vm1, %v4727_v0  ;;  %v784_v11 = vld [vmem:[#allocation2 + $0x4] sm:$0xf] }
  0x17   : > { %207 = vst.msk [vmem:[#allocation2 + $0x84] sm:$0xf] %vm172_vm0, %v4727_v0  ;;  %208 = vst.msk [vmem:[#allocation2 + $0x88] sm:$0xf] %vm172_vm0, %v4727_v0  ;;  %v785_v12 = vld [vmem:[#allocation2 + $0x8] sm:$0x1] }
  0x18   : > { %210 = vst.msk [vmem:[#allocation2 + $0x90] sm:$0xf] %vm172_vm0, %v4727_v0  ;;  %211 = vst.msk [vmem:[#allocation2 + $0x94] sm:$0xf] %vm172_vm0, %v4727_v0  ;;  %v811_v13 = vshrl.u32 %v783_v9, 16  ;;  %v814_v14 = vshll.u32 %v783_v9, 16 }
  0x19   : > { %212 = vst.msk [vmem:[#allocation2 + $0x98] sm:$0x1] %vm175_vm1, %v4727_v0  ;;  %215 = vst.msk [vmem:[#allocation2 + $0xa4] sm:$0x1] %vm175_vm1, %v4727_v0  ;;  %v1114_v16 = vrot.slane %v1112_v7, 4  ;;  %v820_v17 = vshll.u32 %v784_v11, 16 }
  0x1a   : > { %213 = vst.msk [vmem:[#allocation2 + $0x9c] sm:$0xf] %vm172_vm0, %v4727_v0  ;;  %214 = vst.msk [vmem:[#allocation2 + $0xa0] sm:$0xf] %vm172_vm0, %v4727_v0  ;;  %v824_v18 = vshrl.u32 %v784_v11, 16  ;;  %v813_v20 = vrot.slane %v811_v13, 4 }
  0x1b   : > { %216 = vst.msk [vmem:[#allocation2 + $0xa8] sm:$0xf] %vm172_vm0, %v4727_v0  ;;  %217 = vst.msk [vmem:[#allocation2 + $0xac] sm:$0xf] %vm172_vm0, %v4727_v0  ;;  %v231_v19 = vld [vmem:[%s4828_s17 + $0xc] sm:$0xf] }
  0x1c   : > { %218 = vst.msk [vmem:[#allocation2 + $0xb0] sm:$0x1] %vm175_vm1, %v4727_v0  ;;  %221 = vst.msk [vmem:[#allocation2 + $0xbc] sm:$0x1] %vm175_vm1, %v4727_v0  ;;  %v816_v21 = vrot.slane %v814_v14, 5  ;;  %v830_v22 = vshll.u32 %v785_v12, 16 }
  0x1d   : > { %219 = vst.msk [vmem:[#allocation2 + $0xb4] sm:$0xf] %vm172_vm0, %v4727_v0  ;;  %220 = vst.msk [vmem:[#allocation2 + $0xb8] sm:$0xf] %vm172_vm0, %v4727_v0  ;;  %v283_v23 = vrot.slane %v281_v10, 7  ;;  %v822_v26 = vrot.slane %v820_v17, 5 }
  0x1e   : > { %222 = vst.msk [vmem:[#allocation2 + $0xc0] sm:$0xf] %vm172_vm0, %v4727_v0  ;;  %223 = vst.msk [vmem:[#allocation2 + $0xc4] sm:$0xf] %vm172_vm0, %v4727_v0  ;;  %v228_v24 = vld [vmem:[%s4828_s17] sm:$0xf]  ;;  %v817_v31 = vor.u32 %v816_v21, %v813_v20 }
  0x1f   : > { %224 = vst.msk [vmem:[#allocation2 + $0xc8] sm:$0x1] %vm175_vm1, %v4727_v0  ;;  %227 = vst.msk [vmem:[#allocation2 + $0xd4] sm:$0x1] %vm175_vm1, %v4727_v0  ;;  %v826_v27 = vrot.slane %v824_v18, 4  ;;  %v284_v28 = vshll.u32 %v230_v2, 16 }
  0x20   : > { %225 = vst.msk [vmem:[#allocation2 + $0xcc] sm:$0xf] %vm172_vm0, %v4727_v0  ;;  %226 = vst.msk [vmem:[#allocation2 + $0xd0] sm:$0xf] %vm172_vm0, %v4727_v0  ;;  %v229_v29 = vld [vmem:[%s4828_s17 + $0x4] sm:$0xf] }
  0x21   : > { %vm4830_vm6 = vmor %vm1107_vm2, %vm1108_vm3  ;;  %v832_v32 = vrot.slane %v830_v22, 5  ;;  %v287_v33 = vrot.slane %v283_v23, 4  ;;  %v596_v35 = vld [vmem:[#allocation2 + $0x18] sm:$0xf]  ;;  %v827_v37 = vor.u32 %v826_v27, %v822_v26  ;;  %v286_v38 = vor.u32 %v284_v28, %v283_v23  ;;  %v232_v41 = vld [vmem:[%s4828_s17 + $0x10] sm:$0xf] }
  0x22   : > { %v1113_v15 = vsel %vm4830_vm6, %v4363_v6, %v1112_v7  ;;  %v1116_v25 = vsel %vm4830_vm6, %v1114_v16, %v1115_v8  ;;  %vm4844_vm10 = vmand %vm172_vm0, %vm585_vm9  ;;  %v289_v39 = vshrl.u32 %v231_v19, 16  ;;  %v292_v40 = vshll.u32 %v231_v19, 16  ;;  %v233_v54 = vld [vmem:[%s4828_s17 + $0x14] sm:$0xf]  ;;  %v587_v59 = vld [vmem:[#allocation2 + $0xc] sm:$0xf] }
  0x23   : > { %v4371_v30 = vcombine.low %v1113_v15, %v1116_v25  ;;  %vm4850_vm11 = vmor %vm807_vm4, %vm808_vm5  ;;  %v818_v42 = vrot.slane %v817_v31, 4  ;;  %v264_v43 = vshrl.u32 %v228_v24, 16  ;;  %v267_v44 = vshll.u32 %v228_v24, 16  ;;  %v600_v61 = vld [vmem:[#allocation2 + $0x20] sm:$0x1]  ;;  %s4733_s23 = smov 32  }
  0x24   : > { %v272_v45 = vshrl.u32 %v229_v29, 16  ;;  %v828_v46 = vrot.slane %v827_v37, 4  ;;  %v291_v47 = vrot.slane %v289_v39, 7  ;;  %v597_v48 = vsel %vm4844_vm10, %v286_v38, %v596_v35  ;;  %vm4862_vm12 = vmor %vm260_vm7, %vm261_vm8  ;;  %v593_v4 = vld [vmem:[#allocation2 + $0x14] sm:$0x1]  ;;  %s4734_s24 = smov 16  }
  0x25   : > { %1190 = vrot.lane.b32.xlu1 %v4371_v30, %s4728_s18  ;;  %v275_v49 = vshll.u32 %v229_v29, 16  ;;  %v823_v50 = vsel %vm4850_vm11, %v818_v42, %v822_v26  ;;  %598 = vst [vmem:[#allocation2 + $0x18] sm:$0xf] %v597_v48  ;;  %v266_v52 = vrot.slane %v264_v43, 7  ;;  %v298_v55 = vshrl.u32 %v232_v41, 16  ;;  %vm4871_vm13 = vmand %vm175_vm1, %vm260_vm7  ;;  %s4735_s25 = smov 28  }
  0x26   : > { %v274_v53 = vrot.slane %v272_v45, 7  ;;  %v833_v56 = vsel %vm4850_vm11, %v828_v46, %v832_v32  ;;  %v294_v57 = vor.u32 %v292_v40, %v291_v47  ;;  %v296_v58 = vrot.slane %v291_v47, 4  ;;  %v4876_v5 = vld [vmem:[%s4828_s17 + $0x18] sm:$0xf]  ;;  %v4881_v10 = vld [vmem:[%s4828_s17 + $0x1c] sm:$0xf] }
  0x27   : > { %v301_v60 = vshll.u32 %v232_v41, 16  ;;  %v4355_v62 = vcombine.low %v823_v50, %v833_v56  ;;  %v269_v0 = vor.u32 %v267_v44, %v266_v52  ;;  %v270_v2 = vrot.slane %v266_v52, 4  ;;  %v603_v14 = vld [vmem:[#allocation2 + $0x24] sm:$0xf]  ;;  %v4892_v16 = vld [vmem:[%s4828_s17 + $0x20] sm:$0xf] }
  0x28   : > { %v277_v3 = vor.u32 %v275_v49, %v274_v53  ;;  %v295_v6 = vsel %vm4862_vm12, %v287_v33, %v294_v57  ;;  %v279_v7 = vrot.slane %v274_v53, 4  ;;  %v300_v8 = vrot.slane %v298_v55, 7  ;;  %v607_v21 = vld [vmem:[#allocation2 + $0x2c] sm:$0x1]  ;;  %v5821_v63 = vld [vmem:[#allocation2 + $0xd0] sm:$0xf] }
  0x29   : > { %v306_v9 = vshrl.u32 %v233_v54, 16  ;;  %1026 = vrot.lane.b32.xlu0 %v4355_v62, %s4729_s19  ;;  %599 = vst.msk [vmem:[#allocation2 + $0x1c] sm:$0xf] %vm172_vm0, %v295_v6  ;;  %v588_v12 = vsel %vm4844_vm10, %v269_v0, %v587_v59  ;;  %v309_v13 = vshll.u32 %v233_v54, 16  ;;  %v601_v15 = vsel %vm4871_vm13, %v296_v58, %v600_v61  ;;  %s4574_s7 = sshll.u32 %s6026_s13, 5 }
  0x2a   : > { %v278_v11 = vsel %vm4862_vm12, %v270_v2, %v277_v3  ;;  %589 = vst [vmem:[#allocation2 + $0xc] sm:$0xf] %v588_v12  ;;  %v303_v17 = vor.u32 %v301_v60, %v300_v8  ;;  %v304_v18 = vrot.slane %v300_v8, 4  ;;  %v594_v20 = vsel %vm4871_vm13, %v279_v7, %v593_v4  ;;  %602 = vst [vmem:[#allocation2 + $0x20] sm:$0x1] %v601_v15  ;;  %s5948_s10 = scalar_lea.vmem %s6014_s3, %s4574_s7 }
  0x2b   : > { %590 = vst.msk [vmem:[#allocation2 + $0x10] sm:$0xf] %vm172_vm0, %v278_v11  ;;  %v308_v19 = vrot.slane %v306_v9, 7  ;;  %595 = vst [vmem:[#allocation2 + $0x14] sm:$0x1] %v594_v20  ;;  %v315_v22 = vshrl.u32 %v4876_v5, 16 }
  0x2c   : > { %v318_v23 = vshll.u32 %v4876_v5, 16  ;;  %v323_v24 = vshrl.u32 %v4881_v10, 16  ;;  %v326_v25 = vshll.u32 %v4881_v10, 16  ;;  %v604_v28 = vsel %vm4844_vm10, %v303_v17, %v603_v14  ;;  %v2116_v30 = vld [vmem:[#allocation2 + $0x18] sm:$0xe] }
  0x2d   : > { %v311_v26 = vor.u32 %v309_v13, %v308_v19  ;;  %v313_v27 = vrot.slane %v308_v19, 4  ;;  %v332_v29 = vshrl.u32 %v4892_v16, 16  ;;  %605 = vst [vmem:[#allocation2 + $0x24] sm:$0xf] %v604_v28  ;;  %v4904_v31 = vld [vmem:[#allocation2 + $0x18] sm:$0xe] }
  0x2e   : > { %v1319_v32 = vld [vmem:[#allocation2 + $0x18] sm:$0xf]  ;;  %v4427_v35 = vrot.slane %v2116_v30, 9  ;;  %v4396_v37 = vrot.slane %v4904_v31, 9  ;;  %vm774_vm14 = vcmask 31744   ;;  %vm1050_vm15 = vcmask 64544  }
  0x2f   : > { %v312_v33 = vsel %vm4862_vm12, %v304_v18, %v311_v26  ;;  %v608_v38 = vsel %vm4871_vm13, %v313_v27, %v607_v21  ;;  %v4911_v39 = vld [vmem:[#allocation2 + $0x18] sm:$0xf]  ;;  %v1365_v41 = vshrl.u32 %v1319_v32, 16  ;;  %v1368_v42 = vshll.u32 %v1319_v32, 16 }
  0x30   : > { %v4913_v40 = vld [vmem:[#allocation2 + $0x18] sm:$0xf]  ;;  %606 = vst.msk [vmem:[#allocation2 + $0x28] sm:$0xf] %vm172_vm0, %v312_v33  ;;  %609 = vst [vmem:[#allocation2 + $0x2c] sm:$0x1] %v608_v38 }
  0x31   : > { %v859_v43 = vshrl.u32 %v4911_v39, 16  ;;  %v862_v44 = vshll.u32 %v4911_v39, 16  ;;  %v4668_v45 = vld [vmem:[#allocation2 + $0x18] sm:$0xff]   ;;  %v1868_v46 = vshrl.u32 %v4913_v40, 16  ;;  %v1367_v48 = vrot.slane %v1365_v41, 4 }
  0x32   : > { %v4669_v47 = vld [vmem:[#allocation2 + $0xc] sm:$0xff]   ;;  %1285 = vrot.lane.b32.xlu1 %v4668_v45, %s4730_s20  ;;  %v4671_v49 = vld [vmem:[#allocation2 + $0x18] sm:$0xff]   ;;  %v1370_v53 = vrot.slane %v1368_v42, 5  ;;  %v1591_v54 = vld [vmem:[#allocation2 + $0x14] sm:$0x1]  ;;  %vm1214_vm1 = vcmask 97344  }
  0x33   : > { %v1589_v50 = vld [vmem:[#allocation2 + $0xc] sm:$0xe]  ;;  %v1590_v52 = vld [vmem:[#allocation2 + $0x10] sm:$0xf]  ;;  %1283 = vrot.lane.b32.xlu0 %v4669_v47, %s4730_s20  ;;  %v1642_v58 = vrot.slane %v1591_v54, 5  ;;  %vm1307_vm2 = vcmask 130144  }
  0x34   : > { %v4395_v55 = vrot.slane %v1589_v50, 9  ;;  %v1639_v56 = vrot.slane %v1590_v52, 5  ;;  %v1062_v57 = vld [vmem:[#allocation2 + $0xc] sm:$0xe]  ;;  %v1063_v59 = vld [vmem:[#allocation2 + $0x10] sm:$0xf]  ;;  %v1371_v8 = vor.u32 %v1370_v53, %v1367_v48 }
  0x35   : > { %v4364_v60 = vrot.slane %v1062_v57, 9  ;;  %v1064_v0 = vld [vmem:[#allocation2 + $0x14] sm:$0x1]  ;;  %v1119_v2 = vrot.slane %v1063_v59, 5  ;;  %v2117_v3 = vld [vmem:[#allocation2 + $0x1c] sm:$0xf] }
  0x36   : > { %v1640_v61 = vsel %vm4830_vm6, %v4395_v55, %v1639_v56  ;;  %v1641_v62 = vrot.slane %v1639_v56, 4  ;;  %v1122_v6 = vrot.slane %v1064_v0, 5  ;;  %v2118_v7 = vld [vmem:[#allocation2 + $0x20] sm:$0x1]  ;;  %v2166_v13 = vrot.slane %v2117_v3, 5 }
  0x37   : > { %v4670_v4 = vld [vmem:[#allocation2 + $0x24] sm:$0xff]   ;;  %1810 = vrot.lane.b32.xlu0 %v4671_v49, %s4731_s21  ;;  %v1120_v11 = vsel %vm4830_vm6, %v4364_v60, %v1119_v2  ;;  %v1121_v12 = vrot.slane %v1119_v2, 4  ;;  %v1593_v14 = vld [vmem:[#allocation2 + $0x1c] sm:$0xf]  ;;  %v1594_v15 = vld [vmem:[#allocation2 + $0x20] sm:$0x1] }
  0x38   : > { %v1643_v9 = vsel %vm4830_vm6, %v1641_v62, %v1642_v58  ;;  %1812 = vrot.lane.b32.xlu1 %v4670_v4, %s4731_s21  ;;  %v2169_v18 = vrot.slane %v2118_v7, 5  ;;  %v1646_v19 = vrot.slane %v1593_v14, 5  ;;  %v1649_v20 = vrot.slane %v1594_v15, 5  ;;  %v2119_v21 = vld [vmem:[#allocation2 + $0x24] sm:$0xe] }
  0x39   : > { %v4403_v17 = vcombine.low %v1640_v61, %v1643_v9  ;;  %v1123_v26 = vsel %vm4830_vm6, %v1121_v12, %v1122_v6  ;;  %v2167_v27 = vsel %vm4830_vm6, %v4427_v35, %v2166_v13  ;;  %v2168_v28 = vrot.slane %v2166_v13, 4  ;;  %v2120_v30 = vld [vmem:[#allocation2 + $0x28] sm:$0xf]  ;;  %v2121_v31 = vld [vmem:[#allocation2 + $0x2c] sm:$0x1] }
  0x3a   : > { %v4428_v32 = vrot.slane %v2119_v21, 9  ;;  %v4372_v33 = vcombine.low %v1120_v11, %v1123_v26  ;;  %v1647_v38 = vsel %vm4830_vm6, %v4396_v37, %v1646_v19  ;;  %v1648_v41 = vrot.slane %v1646_v19, 4  ;;  %v1320_v45 = vld [vmem:[#allocation2 + $0x1c] sm:$0xf]  ;;  %v1321_v47 = vld [vmem:[#allocation2 + $0x20] sm:$0x1] }
  0x3b   : > { %v2173_v42 = vrot.slane %v2120_v30, 5  ;;  %1717 = vrot.lane.b32.xlu0 %v4403_v17, %s4732_s22  ;;  %v2170_v48 = vsel %vm4830_vm6, %v2168_v28, %v2169_v18  ;;  %v2176_v49 = vrot.slane %v2121_v31, 5  ;;  %v1372_v35 = vrot.slane %v1371_v8, 4  ;;  %v1846_v52 = vld [vmem:[#allocation2 + $0x24] sm:$0xf] }
  0x3c   : > { %v1374_v50 = vshll.u32 %v1320_v45, 16  ;;  %1192 = vrot.lane.b32.xlu1 %v4372_v33, %s4728_s18  ;;  %v4435_v53 = vcombine.low %v2167_v27, %v2170_v48  ;;  %v1650_v37 = vsel %vm4830_vm6, %v1648_v41, %v1649_v20  ;;  %v1847_v56 = vld [vmem:[#allocation2 + $0x28] sm:$0xf]  ;;  %v1378_v59 = vshrl.u32 %v1320_v45, 16  ;;  %v1848_v61 = vld [vmem:[#allocation2 + $0x2c] sm:$0x1] }
  0x3d   : > { %v2174_v54 = vsel %vm4830_vm6, %v4428_v32, %v2173_v42  ;;  %v2175_v55 = vrot.slane %v2173_v42, 4  ;;  %v4404_v57 = vcombine.low %v1647_v38, %v1650_v37  ;;  %v1384_v60 = vshll.u32 %v1321_v47, 16  ;;  %v786_v4 = vld [vmem:[#allocation2 + $0xc] sm:$0xf]  ;;  %v787_v11 = vld [vmem:[#allocation2 + $0x10] sm:$0xf] }
  0x3e   : > { %v1376_v58 = vrot.slane %v1374_v50, 5  ;;  %v1892_v0 = vshrl.u32 %v1846_v52, 16  ;;  %v1895_v2 = vshll.u32 %v1846_v52, 16  ;;  %v1901_v3 = vshll.u32 %v1847_v56, 16  ;;  %v788_v27 = vld [vmem:[#allocation2 + $0x14] sm:$0x1] }
  0x3f   : > { %v2177_v62 = vsel %vm4830_vm6, %v2175_v55, %v2176_v49  ;;  %2244 = vrot.lane.b32.xlu0 %v4435_v53, %s4733_s23  ;;  %v1380_v8 = vrot.slane %v1378_v59, 4  ;;  %v1386_v9 = vrot.slane %v1384_v60, 5  ;;  %v1905_v15 = vshrl.u32 %v1847_v56, 16  ;;  %v790_v48 = vld [vmem:[#allocation2 + $0x1c] sm:$0xf] }
  0x40   : > { %v4436_v6 = vcombine.low %v2174_v54, %v2177_v62  ;;  %v1377_v7 = vsel %vm4850_vm11, %v1372_v35, %v1376_v58  ;;  %1719 = vrot.lane.b32.xlu1 %v4404_v57, %s4732_s22  ;;  %v1894_v12 = vrot.slane %v1892_v0, 4  ;;  %v1897_v13 = vrot.slane %v1895_v2, 5  ;;  %v791_v52 = vld [vmem:[#allocation2 + $0x20] sm:$0x1]  ;;  %v1318_v39 = vld [vmem:[#allocation2 + $0x14] sm:$0x1] }
  0x41   : > { %v1903_v14 = vrot.slane %v1901_v3, 5  ;;  %v1381_v17 = vor.u32 %v1380_v8, %v1376_v58  ;;  %v1911_v18 = vshll.u32 %v1848_v61, 16  ;;  %v835_v19 = vshrl.u32 %v786_v4, 16  ;;  %v1316_v61 = vld [vmem:[#allocation2 + $0xc] sm:$0xf] }
  0x42   : > { %v838_v20 = vshll.u32 %v786_v4, 16  ;;  %v1898_v21 = vor.u32 %v1897_v13, %v1894_v12  ;;  %v1907_v26 = vrot.slane %v1905_v15, 4  ;;  %v844_v28 = vshll.u32 %v787_v11, 16  ;;  %v1317_v3 = vld [vmem:[#allocation2 + $0x10] sm:$0xf] }
  0x43   : > { %v848_v30 = vshrl.u32 %v787_v11, 16  ;;  %2246 = vrot.lane.b32.xlu0 %v4436_v6, %s4733_s23  ;;  %v1382_v31 = vrot.slane %v1381_v17, 4  ;;  %v1913_v32 = vrot.slane %v1911_v18, 5  ;;  %v837_v33 = vrot.slane %v835_v19, 4 }
  0x44   : > { %v840_v38 = vrot.slane %v838_v20, 5  ;;  %v1899_v41 = vrot.slane %v1898_v21, 4  ;;  %v1908_v42 = vor.u32 %v1907_v26, %v1903_v14  ;;  %v846_v45 = vrot.slane %v844_v28, 5 }
  0x45   : > { %v850_v47 = vrot.slane %v848_v30, 4  ;;  %v1387_v49 = vsel %vm4850_vm11, %v1382_v31, %v1386_v9  ;;  %v854_v50 = vshll.u32 %v788_v27, 16  ;;  %v861_v53 = vrot.slane %v859_v43, 4 }
  0x46   : > { %v841_v35 = vor.u32 %v840_v38, %v837_v33  ;;  %v4388_v37 = vcombine.low %v1377_v7, %v1387_v49  ;;  %v1904_v54 = vsel %vm4850_vm11, %v1899_v41, %v1903_v14  ;;  %v1909_v55 = vrot.slane %v1908_v42, 4  ;;  %v793_v14 = vld [vmem:[#allocation2 + $0x28] sm:$0xf] }
  0x47   : > { %v851_v56 = vor.u32 %v850_v47, %v846_v45  ;;  %v856_v58 = vrot.slane %v854_v50, 5  ;;  %v864_v59 = vrot.slane %v862_v44, 5  ;;  %v868_v60 = vshll.u32 %v790_v48, 16  ;;  %v792_v44 = vld [vmem:[#allocation2 + $0x24] sm:$0xf] }
  0x48   : > { %v842_v57 = vrot.slane %v841_v35, 4  ;;  %1558 = vrot.lane.b32.xlu1 %v4388_v37, %s4734_s24  ;;  %v1914_v62 = vsel %vm4850_vm11, %v1909_v55, %v1913_v32  ;;  %v872_v0 = vshrl.u32 %v790_v48, 16  ;;  %v878_v2 = vshll.u32 %v791_v52, 16  ;;  %v794_v32 = vld [vmem:[#allocation2 + $0x2c] sm:$0x1] }
  0x49   : > { %v852_v43 = vrot.slane %v851_v56, 4  ;;  %v4420_v4 = vcombine.low %v1904_v54, %v1914_v62  ;;  %v865_v7 = vor.u32 %v864_v59, %v861_v53  ;;  %v870_v8 = vrot.slane %v868_v60, 5  ;;  %v1844_v54 = vld [vmem:[#allocation2 + $0x1c] sm:$0xf]  ;;  %v1845_v59 = vld [vmem:[#allocation2 + $0x20] sm:$0x1] }
  0x4a   : > { %v847_v6 = vsel %vm4850_vm11, %v842_v57, %v846_v45  ;;  %v874_v11 = vrot.slane %v872_v0, 4  ;;  %v880_v12 = vrot.slane %v878_v2, 5  ;;  %v1341_v13 = vshrl.u32 %v1316_v61, 16 }
  0x4b   : > { %v857_v9 = vsel %vm4850_vm11, %v852_v43, %v856_v58  ;;  %v866_v17 = vrot.slane %v865_v7, 4  ;;  %v1344_v18 = vshll.u32 %v1316_v61, 16  ;;  %v1350_v19 = vshll.u32 %v1317_v3, 16  ;;  %v1069_v7 = vld [vmem:[#allocation2 + $0x28] sm:$0xf] }
  0x4c   : > { %v4356_v15 = vcombine.low %v847_v6, %v857_v9  ;;  %2085 = vrot.lane.b32.xlu1 %v4420_v4, %s4735_s25  ;;  %v875_v20 = vor.u32 %v874_v11, %v870_v8  ;;  %v1343_v21 = vrot.slane %v1341_v13, 4  ;;  %v1354_v26 = vshrl.u32 %v1317_v3, 16  ;;  %v1068_v6 = vld [vmem:[#allocation2 + $0x24] sm:$0xe] }
  0x4d   : > { %v1360_v27 = vshll.u32 %v1318_v39, 16  ;;  %v871_v28 = vsel %vm4850_vm11, %v866_v17, %v870_v8  ;;  %v1346_v30 = vrot.slane %v1344_v18, 5  ;;  %v1352_v31 = vrot.slane %v1350_v19, 5  ;;  %v1065_v8 = vld [vmem:[#allocation2 + $0x18] sm:$0xe] }
  0x4e   : > { %1028 = vrot.lane.b32.xlu0 %v4356_v15, %s4729_s19  ;;  %v883_v33 = vshrl.u32 %v792_v44, 16  ;;  %v876_v38 = vrot.slane %v875_v20, 4  ;;  %v1356_v41 = vrot.slane %v1354_v26, 4  ;;  %v886_v45 = vshll.u32 %v792_v44, 16  ;;  %v1066_v17 = vld [vmem:[#allocation2 + $0x1c] sm:$0xf] }
  0x4f   : > { %v1362_v42 = vrot.slane %v1360_v27, 5  ;;  %v1347_v47 = vor.u32 %v1346_v30, %v1343_v21  ;;  %v892_v49 = vshll.u32 %v793_v14, 16  ;;  %v896_v35 = vshrl.u32 %v793_v14, 16  ;;  %v1067_v21 = vld [vmem:[#allocation2 + $0x20] sm:$0x1] }
  0x50   : > { %v885_v48 = vrot.slane %v883_v33, 4  ;;  %v881_v50 = vsel %vm4850_vm11, %v876_v38, %v880_v12  ;;  %v1357_v52 = vor.u32 %v1356_v41, %v1352_v31  ;;  %v888_v53 = vrot.slane %v886_v45, 5  ;;  %v1070_v12 = vld [vmem:[#allocation2 + $0x2c] sm:$0x1]  ;;  %v1322_v41 = vld [vmem:[#allocation2 + $0x24] sm:$0xf] }
  0x51   : > { %v902_v37 = vshll.u32 %v794_v32, 16  ;;  %v4357_v55 = vcombine.low %v871_v28, %v881_v50  ;;  %v1348_v56 = vrot.slane %v1347_v47, 4  ;;  %v894_v57 = vrot.slane %v892_v49, 5 }
  0x52   : > { %v898_v58 = vrot.slane %v896_v35, 4  ;;  %v1358_v60 = vrot.slane %v1357_v52, 4  ;;  %v889_v61 = vor.u32 %v888_v53, %v885_v48  ;;  %v1870_v43 = vrot.slane %v1868_v46, 4 }
  0x53   : > { %v904_v62 = vrot.slane %v902_v37, 5  ;;  %1030 = vrot.lane.b32.xlu1 %v4357_v55, %s4729_s19  ;;  %v1353_v0 = vsel %vm4850_vm11, %v1348_v56, %v1352_v31  ;;  %v1871_v3 = vshll.u32 %v4913_v40, 16  ;;  %v1877_v4 = vshll.u32 %v1844_v54, 16  ;;  %v610_v55 = vld [vmem:[#allocation2 + $0x30] sm:$0xf] }
  0x54   : > { %v899_v2 = vor.u32 %v898_v58, %v894_v57  ;;  %v1363_v39 = vsel %vm4850_vm11, %v1358_v60, %v1362_v42  ;;  %v890_v44 = vrot.slane %v889_v61, 4  ;;  %v1881_v9 = vshrl.u32 %v1844_v54, 16  ;;  %v614_v56 = vld [vmem:[#allocation2 + $0x38] sm:$0x1]  ;;  %v1323_v61 = vld [vmem:[#allocation2 + $0x28] sm:$0xf] }
  0x55   : > { %v1887_v11 = vshll.u32 %v1845_v59, 16  ;;  %v4387_v46 = vcombine.low %v1353_v0, %v1363_v39  ;;  %v1873_v14 = vrot.slane %v1871_v3, 5  ;;  %v1879_v15 = vrot.slane %v1877_v4, 5  ;;  %v1596_v4 = vld [vmem:[#allocation2 + $0x28] sm:$0xf] }
  0x56   : > { %v900_v13 = vrot.slane %v899_v2, 4  ;;  %v895_v18 = vsel %vm4850_vm11, %v890_v44, %v894_v57  ;;  %v1883_v40 = vrot.slane %v1881_v9, 4  ;;  %v4366_v20 = vrot.slane %v1068_v6, 9  ;;  %v1597_v6 = vld [vmem:[#allocation2 + $0x2c] sm:$0x1] }
  0x57   : > { %v1889_v19 = vrot.slane %v1887_v11, 5  ;;  %1556 = vrot.lane.b32.xlu0 %v4387_v46, %s4734_s24  ;;  %v1874_v27 = vor.u32 %v1873_v14, %v1870_v43  ;;  %v1133_v28 = vrot.slane %v1069_v7, 5  ;;  %v1136_v30 = vrot.slane %v1070_v12, 5  ;;  %v1595_v43 = vld [vmem:[#allocation2 + $0x24] sm:$0xe] }
  0x58   : > { %v905_v26 = vsel %vm4850_vm11, %v900_v13, %v904_v62  ;;  %v1884_v32 = vor.u32 %v1883_v40, %v1879_v15  ;;  %v4365_v33 = vrot.slane %v1065_v8, 9  ;;  %v1126_v38 = vrot.slane %v1066_v17, 5  ;;  %v1324_v62 = vld [vmem:[#allocation2 + $0x2c] sm:$0x1]  ;;  %v237_v13 = vld [vmem:[%s4828_s17 + $0x24] sm:$0xf] }
  0x59   : > { %v4358_v31 = vcombine.low %v895_v18, %v905_v26  ;;  %v1875_v42 = vrot.slane %v1874_v27, 4  ;;  %v1134_v45 = vsel %vm4830_vm6, %v4366_v20, %v1133_v28  ;;  %v1135_v47 = vrot.slane %v1133_v28, 4 }
  0x5a   : > { %v1129_v48 = vrot.slane %v1067_v21, 5  ;;  %v1885_v49 = vrot.slane %v1884_v32, 4  ;;  %v1127_v35 = vsel %vm4830_vm6, %v4365_v33, %v1126_v38  ;;  %v1128_v50 = vrot.slane %v1126_v38, 4  ;;  %v4673_v21 = vld [vmem:[#allocation2 + $0x24] sm:$0xff]   ;;  %v617_v33 = vld [vmem:[#allocation2 + $0x3c] sm:$0xf] }
  0x5b   : > { %1032 = vrot.lane.b32.xlu1 %v4358_v31, %s4729_s19  ;;  %v317_v52 = vrot.slane %v315_v22, 7  ;;  %v1880_v53 = vsel %vm4850_vm11, %v1875_v42, %v1879_v15  ;;  %v1137_v37 = vsel %vm4830_vm6, %v1135_v47, %v1136_v30  ;;  %v325_v54 = vrot.slane %v323_v24, 7 }
  0x5c   : > { %v1389_v57 = vshrl.u32 %v1322_v41, 16  ;;  %v1890_v58 = vsel %vm4850_vm11, %v1885_v49, %v1889_v19  ;;  %v4374_v59 = vcombine.low %v1134_v45, %v1137_v37  ;;  %v1130_v60 = vsel %vm4830_vm6, %v1128_v50, %v1129_v48 }
  0x5d   : > { %v320_v22 = vor.u32 %v318_v23, %v317_v52  ;;  %v4419_v0 = vcombine.low %v1880_v53, %v1890_v58  ;;  %v4373_v2 = vcombine.low %v1127_v35, %v1130_v60  ;;  %v321_v3 = vrot.slane %v317_v52, 4 }
  0x5e   : > { %v328_v24 = vor.u32 %v326_v25, %v325_v54  ;;  %v330_v7 = vrot.slane %v325_v54, 4  ;;  %v1391_v5 = vrot.slane %v1389_v57, 4  ;;  %v1392_v23 = vshll.u32 %v1322_v41, 16 }
  0x5f   : > { %1196 = vrot.lane.b32.xlu1 %v4374_v59, %s4728_s18  ;;  %v611_v8 = vsel %vm4844_vm10, %v320_v22, %v610_v55  ;;  %2083 = vrot.lane.b32.xlu0 %v4419_v0, %s4735_s25  ;;  %v1398_v44 = vshll.u32 %v1323_v61, 16  ;;  %v1402_v10 = vshrl.u32 %v1323_v61, 16  ;;  %v1408_v25 = vshll.u32 %v1324_v62, 16  ;;  %v621_v59 = vld [vmem:[#allocation2 + $0x44] sm:$0x1] }
  0x60   : > { %v329_v39 = vsel %vm4862_vm12, %v321_v3, %v328_v24  ;;  %612 = vst [vmem:[#allocation2 + $0x30] sm:$0xf] %v611_v8  ;;  %v615_v9 = vsel %vm4871_vm13, %v330_v7, %v614_v56  ;;  %v1394_v11 = vrot.slane %v1392_v23, 5  ;;  %v4397_v12 = vrot.slane %v1595_v43, 9 }
  0x61   : > { %613 = vst.msk [vmem:[#allocation2 + $0x34] sm:$0xf] %vm172_vm0, %v329_v39  ;;  %v1653_v46 = vrot.slane %v1596_v4, 5  ;;  %616 = vst [vmem:[#allocation2 + $0x38] sm:$0x1] %v615_v9  ;;  %v1400_v14 = vrot.slane %v1398_v44, 5 }
  0x62   : > { %v1404_v15 = vrot.slane %v1402_v10, 4  ;;  %v1410_v17 = vrot.slane %v1408_v25, 5  ;;  %v1656_v18 = vrot.slane %v1597_v6, 5  ;;  %v1395_v40 = vor.u32 %v1394_v11, %v1391_v5 }
  0x63   : > { %v1655_v19 = vrot.slane %v1653_v46, 4  ;;  %v334_v20 = vrot.slane %v332_v29, 7  ;;  %1194 = vrot.lane.b32.xlu0 %v4373_v2, %s4728_s18  ;;  %v335_v27 = vshll.u32 %v4892_v16, 16  ;;  %v340_v28 = vshrl.u32 %v237_v13, 16 }
  0x64   : > { %v1405_v26 = vor.u32 %v1404_v15, %v1400_v14  ;;  %v343_v30 = vshll.u32 %v237_v13, 16  ;;  %v1396_v31 = vrot.slane %v1395_v40, 4  ;;  %v1654_v29 = vsel %vm4830_vm6, %v4397_v12, %v1653_v46 }
  0x65   : > { %v338_v32 = vrot.slane %v334_v20, 4  ;;  %v337_v41 = vor.u32 %v335_v27, %v334_v20  ;;  %v342_v42 = vrot.slane %v340_v28, 7  ;;  %v1657_v49 = vsel %vm4830_vm6, %v1655_v19, %v1656_v18 }
  0x66   : > { %v1406_v38 = vrot.slane %v1405_v26, 4  ;;  %v1401_v47 = vsel %vm4850_vm11, %v1396_v31, %v1400_v14  ;;  %v4405_v7 = vcombine.low %v1654_v29, %v1657_v49  ;;  %vm1580_vm3 = vcmask 162944  }
  0x67   : > { %v1325_v45 = vld [vmem:[#allocation2 + $0x30] sm:$0xf]  ;;  %1287 = vrot.lane.b32.xlu0 %v4673_v21, %s4730_s20  ;;  %v345_v53 = vor.u32 %v343_v30, %v342_v42  ;;  %v618_v37 = vsel %vm4844_vm10, %v337_v41, %v617_v33  ;;  %v347_v8 = vrot.slane %v342_v42, 4  ;;  %vm1741_vm4 = vcmask 195744  }
  0x68   : > { %v1598_v48 = vld [vmem:[#allocation2 + $0x30] sm:$0xe]  ;;  %v1326_v35 = vld [vmem:[#allocation2 + $0x34] sm:$0xf]  ;;  %v1413_v50 = vshrl.u32 %v1325_v45, 16  ;;  %v1411_v52 = vsel %vm4850_vm11, %v1406_v38, %v1410_v17  ;;  %v1416_v55 = vshll.u32 %v1325_v45, 16 }
  0x69   : > { %v4672_v16 = vld [vmem:[#allocation2 + $0x30] sm:$0xff]   ;;  %v1327_v54 = vld [vmem:[#allocation2 + $0x38] sm:$0x1]  ;;  %v1422_v56 = vshll.u32 %v1326_v35, 16  ;;  %v1426_v57 = vshrl.u32 %v1326_v35, 16  ;;  %v4389_v58 = vcombine.low %v1401_v47, %v1411_v52  ;;  %v346_v43 = vsel %vm4862_vm12, %v338_v32, %v345_v53 }
  0x6a   : > { %619 = vst [vmem:[#allocation2 + $0x3c] sm:$0xf] %v618_v37  ;;  %1289 = vrot.lane.b32.xlu1 %v4672_v16, %s4730_s20  ;;  %v1415_v60 = vrot.slane %v1413_v50, 4  ;;  %v1432_v22 = vshll.u32 %v1327_v54, 16  ;;  %v1599_v61 = vld [vmem:[#allocation2 + $0x34] sm:$0xf]  ;;  %v622_v9 = vsel %vm4871_vm13, %v347_v8, %v621_v59 }
  0x6b   : > { %v1600_v62 = vld [vmem:[#allocation2 + $0x38] sm:$0x1]  ;;  %v1418_v0 = vrot.slane %v1416_v55, 5  ;;  %v1424_v2 = vrot.slane %v1422_v56, 5  ;;  %v1428_v3 = vrot.slane %v1426_v57, 4  ;;  %v4398_v24 = vrot.slane %v1598_v48, 9  ;;  %1560 = vrot.lane.b32.xlu0 %v4389_v58, %s4734_s24 }
  0x6c   : > { %620 = vst.msk [vmem:[#allocation2 + $0x40] sm:$0xf] %vm172_vm0, %v346_v43  ;;  %v1660_v4 = vrot.slane %v1599_v61, 5  ;;  %v1663_v6 = vrot.slane %v1600_v62, 5  ;;  %v1434_v39 = vrot.slane %v1432_v22, 5  ;;  %v4675_v14 = vld [vmem:[#allocation2 + $0x30] sm:$0xff]  }
  0x6d   : > { %v1419_v5 = vor.u32 %v1418_v0, %v1415_v60  ;;  %v1429_v23 = vor.u32 %v1428_v3, %v1424_v2  ;;  %v1849_v44 = vld [vmem:[#allocation2 + $0x30] sm:$0xf]  ;;  %v1850_v10 = vld [vmem:[#allocation2 + $0x34] sm:$0xf]  ;;  %623 = vst [vmem:[#allocation2 + $0x44] sm:$0x1] %v622_v9 }
  0x6e   : > { %v1662_v25 = vrot.slane %v1660_v4, 4  ;;  %v1916_v11 = vshrl.u32 %v1849_v44, 16  ;;  %v1661_v13 = vsel %vm4830_vm6, %v4398_v24, %v1660_v4  ;;  %v1919_v15 = vshll.u32 %v1849_v44, 16  ;;  %v5040_v17 = vld [vmem:[%s4828_s17 + $0x38] sm:$0xf] }
  0x6f   : > { %v1420_v12 = vrot.slane %v1419_v5, 4  ;;  %v1430_v46 = vrot.slane %v1429_v23, 4  ;;  %1721 = vrot.lane.b32.xlu0 %v4405_v7, %s4732_s22  ;;  %v1925_v19 = vshll.u32 %v1850_v10, 16  ;;  %v1929_v20 = vshrl.u32 %v1850_v10, 16  ;;  %v1851_v28 = vld [vmem:[#allocation2 + $0x38] sm:$0x1] }
  0x70   : > { %v1664_v18 = vsel %vm4830_vm6, %v1662_v25, %v1663_v6  ;;  %v1918_v30 = vrot.slane %v1916_v11, 4  ;;  %v795_v31 = vld [vmem:[#allocation2 + $0x30] sm:$0xf]  ;;  %v383_v42 = vshrl.u32 %v5040_v17, 16  ;;  %v1921_v29 = vrot.slane %v1919_v15, 5 }
  0x71   : > { %v1852_v40 = vld [vmem:[#allocation2 + $0x3c] sm:$0xf]  ;;  %v1425_v21 = vsel %vm4850_vm11, %v1420_v12, %v1424_v2  ;;  %v1435_v26 = vsel %vm4850_vm11, %v1430_v46, %v1434_v39  ;;  %v4406_v33 = vcombine.low %v1661_v13, %v1664_v18  ;;  %v1927_v16 = vrot.slane %v1925_v19, 5  ;;  %v796_v54 = vld [vmem:[#allocation2 + $0x34] sm:$0xf] }
  0x72   : > { %v1940_v27 = vshrl.u32 %v1852_v40, 16  ;;  %v4390_v32 = vcombine.low %v1425_v21, %v1435_v26  ;;  %v1943_v41 = vshll.u32 %v1852_v40, 16  ;;  %v1931_v35 = vrot.slane %v1929_v20, 4  ;;  %v797_v60 = vld [vmem:[#allocation2 + $0x38] sm:$0x1] }
  0x73   : > { %v1853_v38 = vld [vmem:[#allocation2 + $0x40] sm:$0xf]  ;;  %1814 = vrot.lane.b32.xlu0 %v4675_v14, %s4731_s21  ;;  %v1935_v50 = vshll.u32 %v1851_v28, 16  ;;  %v1922_v37 = vor.u32 %v1921_v29, %v1918_v30  ;;  %v907_v55 = vshrl.u32 %v795_v31, 16  ;;  %v910_v22 = vshll.u32 %v795_v31, 16 }
  0x74   : > { %v1942_v45 = vrot.slane %v1940_v27, 4  ;;  %v1949_v47 = vshll.u32 %v1853_v38, 16  ;;  %v1953_v48 = vshrl.u32 %v1853_v38, 16  ;;  %1562 = vrot.lane.b32.xlu1 %v4390_v32, %s4734_s24  ;;  %v1945_v49 = vrot.slane %v1943_v41, 5  ;;  %v1854_v56 = vld [vmem:[#allocation2 + $0x44] sm:$0x1] }
  0x75   : > { %v1932_v58 = vor.u32 %v1931_v35, %v1927_v16  ;;  %v1937_v59 = vrot.slane %v1935_v50, 5  ;;  %v1959_v62 = vshll.u32 %v1854_v56, 16  ;;  %v1923_v43 = vrot.slane %v1922_v37, 4  ;;  %v2122_v2 = vld [vmem:[#allocation2 + $0x30] sm:$0xe]  ;;  %v4674_v3 = vld [vmem:[#allocation2 + $0x3c] sm:$0xff]  }
  0x76   : > { %v1951_v52 = vrot.slane %v1949_v47, 5  ;;  %v1955_v53 = vrot.slane %v1953_v48, 4  ;;  %v1946_v57 = vor.u32 %v1945_v49, %v1942_v45  ;;  %v909_v0 = vrot.slane %v907_v55, 4  ;;  %v2123_v44 = vld [vmem:[#allocation2 + $0x34] sm:$0xf] }
  0x77   : > { %v1933_v4 = vrot.slane %v1932_v58, 4  ;;  %v912_v6 = vrot.slane %v910_v22, 5  ;;  %v916_v7 = vshll.u32 %v796_v54, 16  ;;  %v1961_v5 = vrot.slane %v1959_v62, 5  ;;  %v2124_v12 = vld [vmem:[#allocation2 + $0x38] sm:$0x1] }
  0x78   : > { %v1956_v61 = vor.u32 %v1955_v53, %v1951_v52  ;;  %1723 = vrot.lane.b32.xlu1 %v4406_v33, %s4732_s22  ;;  %v1947_v24 = vrot.slane %v1946_v57, 4  ;;  %v1928_v23 = vsel %vm4850_vm11, %v1923_v43, %v1927_v16  ;;  %v920_v39 = vshrl.u32 %v796_v54, 16  ;;  %v243_v46 = vld [vmem:[%s4828_s17 + $0x3c] sm:$0xf]  ;;  %v2126_v32 = vld [vmem:[#allocation2 + $0x40] sm:$0xf] }
  0x79   : > { %v1938_v25 = vsel %vm4850_vm11, %v1933_v4, %v1937_v59  ;;  %v913_v9 = vor.u32 %v912_v6, %v909_v0  ;;  %v918_v11 = vrot.slane %v916_v7, 5  ;;  %v926_v18 = vshll.u32 %v797_v60, 16  ;;  %v2125_v40 = vld [vmem:[#allocation2 + $0x3c] sm:$0xe]  ;;  %v2127_v47 = vld [vmem:[#allocation2 + $0x44] sm:$0x1] }
  0x7a   : > { %v1957_v8 = vrot.slane %v1956_v61, 4  ;;  %v1952_v10 = vsel %vm4850_vm11, %v1947_v24, %v1951_v52  ;;  %v4421_v14 = vcombine.low %v1928_v23, %v1938_v25  ;;  %v922_v15 = vrot.slane %v920_v39, 4  ;;  %v638_v35 = vld [vmem:[#allocation2 + $0x60] sm:$0xf]  ;;  %v798_v56 = vld [vmem:[#allocation2 + $0x3c] sm:$0xf] }
  0x7b   : > { %v914_v20 = vrot.slane %v913_v9, 4  ;;  %v4429_v21 = vrot.slane %v2122_v2, 9  ;;  %v2180_v26 = vrot.slane %v2123_v44, 5  ;;  %v928_v28 = vrot.slane %v926_v18, 5  ;;  %v642_v59 = vld [vmem:[#allocation2 + $0x68] sm:$0x1] }
  0x7c   : > { %v1962_v13 = vsel %vm4850_vm11, %v1957_v8, %v1961_v5  ;;  %1816 = vrot.lane.b32.xlu1 %v4674_v3, %s4731_s21  ;;  %2087 = vrot.lane.b32.xlu0 %v4421_v14, %s4735_s25  ;;  %v923_v27 = vor.u32 %v922_v15, %v918_v11  ;;  %v2183_v30 = vrot.slane %v2124_v12, 5  ;;  %v385_v31 = vrot.slane %v383_v42, 7  ;;  %v5079_v61 = vld [vmem:[%s4828_s17 + $0x40] sm:$0xf]  ;;  %v5086_v3 = vld [vmem:[%s4828_s17 + $0x44] sm:$0xf] }
  0x7d   : > { %v4422_v19 = vcombine.low %v1952_v10, %v1962_v13  ;;  %v919_v33 = vsel %vm4850_vm11, %v914_v20, %v918_v11  ;;  %v2181_v38 = vsel %vm4830_vm6, %v4429_v21, %v2180_v26  ;;  %v2182_v41 = vrot.slane %v2180_v26, 4  ;;  %v4688_v62 = vld [vmem:[%s6012_s1] sm:$0xff]   ;;  %v4692_v24 = vld [vmem:[%s6012_s1 + $0x8] sm:$0xff]   ;;  %v5094_v6 = vld [vmem:[#allocation2 + $0x34] sm:$0xf] }
  0x7e   : > { %v386_v45 = vshll.u32 %v5040_v17, 16  ;;  %v924_v48 = vrot.slane %v923_v27, 4  ;;  %v389_v29 = vrot.slane %v385_v31, 4  ;;  %v391_v49 = vshrl.u32 %v243_v46, 16  ;;  %v799_v2 = vld [vmem:[#allocation2 + $0x40] sm:$0xf]  ;;  %4605 = vmatprep.subr.bf16.mxu0 %v4688_v62  ;;  %4627 = vmatprep.subr.bf16.mxu1 %v4688_v62 }
  0x7f   : > { %v394_v16 = vshll.u32 %v243_v46, 16  ;;  %v2184_v42 = vsel %vm4830_vm6, %v2182_v41, %v2183_v30  ;;  %v4430_v52 = vrot.slane %v2125_v40, 9  ;;  %v2187_v53 = vrot.slane %v2126_v32, 5  ;;  %v800_v7 = vld [vmem:[#allocation2 + $0x44] sm:$0x1]  ;;  %4606 = vmatpush3.bf16.msra.mxu0 %v4688_v62  ;;  %4628 = vmatpush3.bf16.msra.mxu1 %v4688_v62 }
  0x80   : > { %2089 = vrot.lane.b32.xlu1 %v4422_v19, %s4735_s25  ;;  %v388_v50 = vor.u32 %v386_v45, %v385_v31  ;;  %v929_v37 = vsel %vm4850_vm11, %v924_v48, %v928_v28  ;;  %v4437_v54 = vcombine.low %v2181_v38, %v2184_v42  ;;  %v393_v17 = vrot.slane %v391_v49, 7  ;;  %v1071_v10 = vld [vmem:[#allocation2 + $0x30] sm:$0xe]  ;;  %v5100_v25 = vld [vmem:[#allocation2 + $0x38] sm:$0x1]  ;;  %4607 = vmatprep.subr.bf16.mxu0 %v4692_v24 }
  0x81   : > { %v2190_v55 = vrot.slane %v2127_v47, 5  ;;  %v4359_v57 = vcombine.low %v919_v33, %v929_v37  ;;  %v2188_v60 = vsel %vm4830_vm6, %v4430_v52, %v2187_v53  ;;  %v2189_v22 = vrot.slane %v2187_v53, 4  ;;  %4629 = vmatprep.subr.bf16.mxu1 %v4692_v24  ;;  %v645_v37 = vld [vmem:[#allocation2 + $0x6c] sm:$0xf]  ;;  %v1074_v62 = vld [vmem:[#allocation2 + $0x3c] sm:$0xe] }
  0x82   : > { %v639_v58 = vsel %vm4844_vm10, %v388_v50, %v638_v35  ;;  %2248 = vrot.lane.b32.xlu0 %v4437_v54, %s4733_s23  ;;  %v396_v43 = vor.u32 %v394_v16, %v393_v17  ;;  %v398_v0 = vrot.slane %v393_v17, 4  ;;  %v931_v8 = vshrl.u32 %v798_v56, 16 }
  0x83   : > { %640 = vst [vmem:[#allocation2 + $0x60] sm:$0xf] %v639_v58  ;;  %v2191_v4 = vsel %vm4830_vm6, %v2189_v22, %v2190_v55  ;;  %v934_v5 = vshll.u32 %v798_v56, 16  ;;  %v940_v12 = vshll.u32 %v799_v2, 16  ;;  %v1140_v46 = vrot.slane %v5094_v6, 5  ;;  %4608 = vmatpush3.bf16.msra.mxu0 %v4692_v24  ;;  %4630 = vmatpush3.bf16.msra.mxu1 %v4692_v24 }
  0x84   : > { %1034 = vrot.lane.b32.xlu1 %v4359_v57, %s4729_s19  ;;  %v397_v23 = vsel %vm4862_vm12, %v389_v29, %v396_v43  ;;  %v643_v39 = vsel %vm4871_vm13, %v398_v0, %v642_v59  ;;  %v4438_v44 = vcombine.low %v2188_v60, %v2191_v4  ;;  %v933_v9 = vrot.slane %v931_v8, 4  ;;  %v649_v58 = vld [vmem:[#allocation2 + $0x74] sm:$0x1]  ;;  %v1075_v43 = vld [vmem:[#allocation2 + $0x40] sm:$0xf] }
  0x85   : > { %641 = vst.msk [vmem:[#allocation2 + $0x64] sm:$0xf] %vm172_vm0, %v397_v23  ;;  %644 = vst [vmem:[#allocation2 + $0x68] sm:$0x1] %v643_v39  ;;  %v936_v11 = vrot.slane %v934_v5, 5  ;;  %v944_v13 = vshrl.u32 %v799_v2, 16 }
  0x86   : > { %2250 = vrot.lane.b32.xlu0 %v4438_v44, %s4733_s23  ;;  %v950_v14 = vshll.u32 %v800_v7, 16  ;;  %v400_v15 = vshrl.u32 %v5079_v61, 16  ;;  %v942_v40 = vrot.slane %v940_v12, 5  ;;  %v408_v19 = vshrl.u32 %v5086_v3, 16  ;;  %v1076_v6 = vld [vmem:[#allocation2 + $0x44] sm:$0x1] }
  0x87   : > { %v937_v18 = vor.u32 %v936_v11, %v933_v9  ;;  %v946_v20 = vrot.slane %v944_v13, 4  ;;  %v403_v26 = vshll.u32 %v5079_v61, 16  ;;  %v4367_v28 = vrot.slane %v1071_v10, 9  ;;  %v1328_v39 = vld [vmem:[#allocation2 + $0x3c] sm:$0xf] }
  0x88   : > { %v402_v21 = vrot.slane %v400_v15, 7  ;;  %v1143_v30 = vrot.slane %v5100_v25, 5  ;;  %v410_v41 = vrot.slane %v408_v19, 7  ;;  %v1142_v45 = vrot.slane %v1140_v46, 4  ;;  %v1329_v44 = vld [vmem:[#allocation2 + $0x40] sm:$0xf] }
  0x89   : > { %v938_v31 = vrot.slane %v937_v18, 4  ;;  %v947_v38 = vor.u32 %v946_v20, %v942_v40  ;;  %v952_v47 = vrot.slane %v950_v14, 5  ;;  %v411_v49 = vshll.u32 %v5086_v3, 16  ;;  %v1330_v19 = vld [vmem:[#allocation2 + $0x44] sm:$0x1] }
  0x8a   : > { %v2596_v27 = vld [vmem:[#allocation2 + $0x60] sm:$0xf]  ;;  %v406_v29 = vrot.slane %v402_v21, 4  ;;  %v405_v53 = vor.u32 %v403_v26, %v402_v21  ;;  %v415_v61 = vrot.slane %v410_v41, 4  ;;  %v5116_v3 = vsel %vm4830_vm6, %v4367_v28, %v1140_v46 }
  0x8b   : > { %v2621_v32 = vshrl.u32 %v2596_v27, 16  ;;  %v2624_v33 = vshll.u32 %v2596_v27, 16  ;;  %v5109_v48 = vld [vmem:[#allocation2 + $0x60] sm:$0xe]  ;;  %v943_v52 = vsel %vm4850_vm11, %v938_v31, %v942_v40  ;;  %v948_v56 = vrot.slane %v947_v38, 4 }
  0x8c   : > { %v2597_v16 = vld [vmem:[#allocation2 + $0x64] sm:$0xf]  ;;  %v2598_v35 = vld [vmem:[#allocation2 + $0x68] sm:$0x1]  ;;  %v413_v22 = vor.u32 %v411_v49, %v410_v41  ;;  %v1144_v8 = vsel %vm4830_vm6, %v1142_v45, %v1143_v30  ;;  %v4475_v23 = vrot.slane %v5109_v48, 9  ;;  %v646_v11 = vsel %vm4844_vm10, %v405_v53, %v645_v37 }
  0x8d   : > { %v2623_v42 = vrot.slane %v2621_v32, 4  ;;  %v2626_v50 = vrot.slane %v2624_v33, 5  ;;  %v2630_v54 = vshll.u32 %v2597_v16, 16  ;;  %v2634_v17 = vshrl.u32 %v2597_v16, 16  ;;  %v2869_v57 = vld [vmem:[#allocation2 + $0x64] sm:$0xf] }
  0x8e   : > { %v2640_v55 = vshll.u32 %v2598_v35, 16  ;;  %v2918_v60 = vrot.slane %v2869_v57, 5  ;;  %v953_v24 = vsel %vm4850_vm11, %v948_v56, %v952_v47  ;;  %v2870_v4 = vld [vmem:[#allocation2 + $0x68] sm:$0x1]  ;;  %v414_v9 = vsel %vm4862_vm12, %v406_v29, %v413_v22  ;;  %647 = vst [vmem:[#allocation2 + $0x6c] sm:$0xf] %v646_v11 }
  0x8f   : > { %v2627_v59 = vor.u32 %v2626_v50, %v2623_v42  ;;  %v2632_v0 = vrot.slane %v2630_v54, 5  ;;  %v2636_v2 = vrot.slane %v2634_v17, 4  ;;  %v4360_v5 = vcombine.low %v943_v52, %v953_v24  ;;  %648 = vst.msk [vmem:[#allocation2 + $0x70] sm:$0xf] %vm172_vm0, %v414_v9  ;;  %v238_v38 = vld [vmem:[%s4828_s17 + $0x28] sm:$0xf] }
  0x90   : > { %v2642_v25 = vrot.slane %v2640_v55, 5  ;;  %v2920_v12 = vrot.slane %v2918_v60, 4  ;;  %v2921_v46 = vrot.slane %v2870_v4, 5  ;;  %v650_v13 = vsel %vm4871_vm13, %v415_v61, %v649_v58  ;;  %v5151_v52 = vld [vmem:[%s4828_s17 + $0x2c] sm:$0xf] }
  0x91   : > { %v2628_v7 = vrot.slane %v2627_v59, 4  ;;  %v2637_v10 = vor.u32 %v2636_v2, %v2632_v0  ;;  %1036 = vrot.lane.b32.xlu0 %v4360_v5, %s4729_s19  ;;  %v1147_v14 = vrot.slane %v1075_v43, 5  ;;  %651 = vst [vmem:[#allocation2 + $0x74] sm:$0x1] %v650_v13  ;;  %v4368_v40 = vrot.slane %v1074_v62, 9 }
  0x92   : > { %v1437_v20 = vshrl.u32 %v1328_v39, 16  ;;  %v4375_v21 = vcombine.low %v5116_v3, %v1144_v8  ;;  %v1150_v27 = vrot.slane %v1076_v6, 5  ;;  %v1440_v28 = vshll.u32 %v1328_v39, 16 }
  0x93   : > { %v2633_v15 = vsel %vm4850_vm11, %v2628_v7, %v2632_v0  ;;  %v2638_v18 = vrot.slane %v2637_v10, 4  ;;  %v1149_v26 = vrot.slane %v1147_v14, 4  ;;  %v1446_v32 = vshll.u32 %v1329_v44, 16 }
  0x94   : > { %v1439_v31 = vrot.slane %v1437_v20, 4  ;;  %v1450_v33 = vshrl.u32 %v1329_v44, 16  ;;  %v2919_v45 = vsel %vm4830_vm6, %v4475_v23, %v2918_v60  ;;  %v1442_v47 = vrot.slane %v1440_v28, 5  ;;  %v4676_v20 = vld [vmem:[#allocation2 + $0x3c] sm:$0xff]   ;;  %v246_v28 = vld [vmem:[%s4828_s17 + $0x48] sm:$0xf] }
  0x95   : > { %v2643_v30 = vsel %vm4850_vm11, %v2638_v18, %v2642_v25  ;;  %v1456_v48 = vshll.u32 %v1330_v19, 16  ;;  %v2922_v29 = vsel %vm4830_vm6, %v2920_v12, %v2921_v46  ;;  %v5143_v49 = vsel %vm4830_vm6, %v4368_v40, %v1147_v14  ;;  %v2599_v54 = vld [vmem:[#allocation2 + $0x6c] sm:$0xf]  ;;  %v624_v18 = vld [vmem:[#allocation2 + $0x48] sm:$0xf] }
  0x96   : > { %v4467_v41 = vcombine.low %v2633_v15, %v2643_v30  ;;  %v1448_v16 = vrot.slane %v1446_v32, 5  ;;  %v1452_v35 = vrot.slane %v1450_v33, 4  ;;  %v5148_v42 = vsel %vm4830_vm6, %v1149_v26, %v1150_v27  ;;  %v2600_v17 = vld [vmem:[#allocation2 + $0x70] sm:$0xf]  ;;  %v2871_v0 = vld [vmem:[#allocation2 + $0x6c] sm:$0xe] }
  0x97   : > { %v1458_v50 = vrot.slane %v1456_v48, 5  ;;  %v349_v53 = vshrl.u32 %v238_v38, 16  ;;  %v352_v37 = vshll.u32 %v238_v38, 16  ;;  %v1443_v55 = vor.u32 %v1442_v47, %v1439_v31  ;;  %v2872_v7 = vld [vmem:[#allocation2 + $0x70] sm:$0xf]  ;;  %v5157_v12 = vpop.permute.xlu1 %1190 }
  0x98   : > { %2836 = vrot.lane.b32.xlu1 %v4467_v41, %s4729_s19  ;;  %v1453_v56 = vor.u32 %v1452_v35, %v1448_v16  ;;  %v2601_v57 = vld [vmem:[#allocation2 + $0x74] sm:$0x1]  ;;  %v2645_v58 = vshrl.u32 %v2599_v54, 16  ;;  %v2648_v59 = vshll.u32 %v2599_v54, 16  ;;  %v2654_v60 = vshll.u32 %v2600_v17, 16 }
  0x99   : > { %v2658_v22 = vshrl.u32 %v2600_v17, 16  ;;  %v4483_v61 = vcombine.low %v2919_v45, %v2922_v29  ;;  %v2664_v62 = vshll.u32 %v2601_v57, 16  ;;  %v4376_v43 = vcombine.low %v5143_v49, %v5148_v42  ;;  %v2873_v5 = vld [vmem:[#allocation2 + $0x74] sm:$0x1]  ;;  %v3120_v27 = vld [vmem:[#allocation2 + $0x6c] sm:$0xf] }
  0x9a   : > { %v357_v2 = vshrl.u32 %v5151_v52, 16  ;;  %v2647_v3 = vrot.slane %v2645_v58, 4  ;;  %v2650_v24 = vrot.slane %v2648_v59, 5  ;;  %v2656_v4 = vrot.slane %v2654_v60, 5  ;;  %v3121_v38 = vld [vmem:[#allocation2 + $0x70] sm:$0xf] }
  0x9b   : > { %v2660_v6 = vrot.slane %v2658_v22, 4  ;;  %v2666_v8 = vrot.slane %v2664_v62, 5  ;;  %v4476_v23 = vrot.slane %v2871_v0, 9  ;;  %v2925_v39 = vrot.slane %v2872_v7, 5  ;;  %v5177_v41 = vpop.permute.xlu0 %1026  ;;  %v247_v54 = vld [vmem:[%s4828_s17 + $0x4c] sm:$0xf] }
  0x9c   : > { %1198 = vrot.lane.b32.xlu1 %v4375_v21, %s4728_s18  ;;  %v1444_v44 = vrot.slane %v1443_v55, 4  ;;  %v2651_v10 = vor.u32 %v2650_v24, %v2647_v3  ;;  %v2928_v9 = vrot.slane %v2873_v5, 5  ;;  %v1454_v11 = vrot.slane %v1453_v56, 4  ;;  %v4677_v17 = vld [vmem:[#allocation2 + $0x6c] sm:$0xff]   ;;  %v1601_v59 = vld [vmem:[#allocation2 + $0x3c] sm:$0xe] }
  0x9d   : > { %v2661_v25 = vor.u32 %v2660_v6, %v2656_v4  ;;  %v5161_v46 = vsel %vm4830_vm6, %v4476_v23, %v2925_v39  ;;  %v2927_v13 = vrot.slane %v2925_v39, 4  ;;  %v351_v15 = vrot.slane %v349_v53, 7  ;;  %v1602_v0 = vld [vmem:[#allocation2 + $0x40] sm:$0xf]  ;;  %v1603_v6 = vld [vmem:[#allocation2 + $0x44] sm:$0x1] }
  0x9e   : > { %v1449_v14 = vsel %vm4850_vm11, %v1444_v44, %v1448_v16  ;;  %v2652_v40 = vrot.slane %v2651_v10, 4  ;;  %v1459_v21 = vsel %vm4850_vm11, %v1454_v11, %v1458_v50  ;;  %v5168_v26 = vrot.slane %v357_v2, 7  ;;  %v3122_v16 = vld [vmem:[#allocation2 + $0x74] sm:$0x1] }
  0x9f   : > { %v2662_v19 = vrot.slane %v2661_v25, 4  ;;  %v5173_v30 = vsel %vm4830_vm6, %v2927_v13, %v2928_v9  ;;  %v5175_v31 = vcombine.low %v1449_v14, %v1459_v21  ;;  %v354_v32 = vor.u32 %v352_v37, %v351_v15  ;;  %v652_v25 = vld [vmem:[#allocation2 + $0x78] sm:$0xf]  ;;  %v628_v13 = vld [vmem:[#allocation2 + $0x50] sm:$0x1] }
  0xa0   : > { %2996 = vrot.lane.b32.xlu1 %v4483_v61, %s4728_s18  ;;  %v355_v33 = vrot.slane %v351_v15, 4  ;;  %v2657_v45 = vsel %vm4850_vm11, %v2652_v40, %v2656_v4  ;;  %v4484_v48 = vcombine.low %v5161_v46, %v5173_v30  ;;  %v360_v29 = vshll.u32 %v5151_v52, 16 }
  0xa1   : > { %v2667_v47 = vsel %vm4850_vm11, %v2662_v19, %v2666_v8  ;;  %v364_v50 = vrot.slane %v5168_v26, 4  ;;  %v625_v53 = vsel %vm4844_vm10, %v354_v32, %v624_v18  ;;  %v3145_v37 = vshrl.u32 %v3120_v27, 16  ;;  %v656_v19 = vld [vmem:[#allocation2 + $0x80] sm:$0x1] }
  0xa2   : > { %v4468_v35 = vcombine.low %v2657_v45, %v2667_v47  ;;  %v362_v55 = vor.u32 %v360_v29, %v5168_v26  ;;  %626 = vst [vmem:[#allocation2 + $0x48] sm:$0xf] %v625_v53  ;;  %v3148_v56 = vshll.u32 %v3120_v27, 16  ;;  %v3154_v57 = vshll.u32 %v3121_v38, 16  ;;  %v3392_v27 = vld [vmem:[#allocation2 + $0x6c] sm:$0xe] }
  0xa3   : > { %v3158_v58 = vshrl.u32 %v3121_v38, 16  ;;  %v3147_v60 = vrot.slane %v3145_v37, 4  ;;  %v3164_v22 = vshll.u32 %v3122_v16, 16  ;;  %v417_v61 = vshrl.u32 %v246_v28, 16 }
  0xa4   : > { %1291 = vrot.lane.b32.xlu1 %v4676_v20, %s4730_s20  ;;  %v5192_v52 = vpop.permute.xlu1 %1285  ;;  %2838 = vrot.lane.b32.xlu0 %v4468_v35, %s4729_s19  ;;  %v420_v62 = vshll.u32 %v246_v28, 16  ;;  %v363_v2 = vsel %vm4862_vm12, %v355_v33, %v362_v55  ;;  %v3150_v3 = vrot.slane %v3148_v56, 5  ;;  %v3156_v24 = vrot.slane %v3154_v57, 5  ;;  %v3394_v35 = vld [vmem:[#allocation2 + $0x74] sm:$0x1] }
  0xa5   : > { %v3160_v4 = vrot.slane %v3158_v58, 4  ;;  %627 = vst.msk [vmem:[#allocation2 + $0x4c] sm:$0xf] %vm172_vm0, %v363_v2  ;;  %v3166_v7 = vrot.slane %v3164_v22, 5  ;;  %v419_v8 = vrot.slane %v417_v61, 7  ;;  %v425_v5 = vshrl.u32 %v247_v54, 16  ;;  %v5198_v39 = vpop.permute.xlu0 %1283 }
  0xa6   : > { %v428_v23 = vshll.u32 %v247_v54, 16  ;;  %v3151_v44 = vor.u32 %v3150_v3, %v3147_v60  ;;  %v4399_v9 = vrot.slane %v1601_v59, 9  ;;  %v1667_v11 = vrot.slane %v1602_v0, 5 }
  0xa7   : > { %v3161_v10 = vor.u32 %v3160_v4, %v3156_v24  ;;  %v422_v14 = vor.u32 %v420_v62, %v419_v8  ;;  %v423_v15 = vrot.slane %v419_v8, 4  ;;  %v427_v18 = vrot.slane %v425_v5, 7 }
  0xa8   : > { %3088 = vrot.lane.b32.xlu1 %v4677_v17, %s4730_s20  ;;  %1200 = vrot.lane.b32.xlu0 %v4376_v43, %s4728_s18  ;;  %v1670_v40 = vrot.slane %v1603_v6, 5  ;;  %v3152_v20 = vrot.slane %v3151_v44, 4  ;;  %v1669_v26 = vrot.slane %v1667_v11, 4  ;;  %v629_v49 = vsel %vm4871_vm13, %v364_v50, %v628_v13  ;;  %v3393_v43 = vld [vmem:[#allocation2 + $0x70] sm:$0xf] }
  0xa9   : > { %v3162_v21 = vrot.slane %v3161_v10, 4  ;;  %v430_v32 = vor.u32 %v428_v23, %v427_v18  ;;  %v432_v33 = vrot.slane %v427_v18, 4  ;;  %v653_v38 = vsel %vm4844_vm10, %v422_v14, %v652_v25  ;;  %v1331_v42 = vld [vmem:[#allocation2 + $0x48] sm:$0xf]  ;;  %630 = vst [vmem:[#allocation2 + $0x50] sm:$0x1] %v629_v49  ;;  %v5229_v55 = vpop.permute.xlu0 %1810 }
  0xaa   : > { %v5205_v28 = vpop.permute.xlu1 %1812  ;;  %v3157_v45 = vsel %vm4850_vm11, %v3152_v20, %v3156_v24  ;;  %654 = vst [vmem:[#allocation2 + $0x78] sm:$0xf] %v653_v38  ;;  %v1668_v29 = vsel %vm4830_vm6, %v4399_v9, %v1667_v11  ;;  %v1461_v16 = vshrl.u32 %v1331_v42, 16  ;;  %v1671_v53 = vsel %vm4830_vm6, %v1669_v26, %v1670_v40  ;;  %v1604_v54 = vld [vmem:[#allocation2 + $0x48] sm:$0xe] }
  0xab   : > { %v3167_v47 = vsel %vm4850_vm11, %v3162_v21, %v3166_v7  ;;  %v1464_v37 = vshll.u32 %v1331_v42, 16  ;;  %v5227_v17 = vld [vmem:[#allocation2 + $0x48] sm:$0xf]  ;;  %v657_v46 = vsel %vm4871_vm13, %v432_v33, %v656_v19  ;;  %v4507_v22 = vrot.slane %v3392_v27, 9 }
  0xac   : > { %1564 = vrot.lane.b32.xlu1 %v5175_v31, %s4734_s24  ;;  %2998 = vrot.lane.b32.xlu0 %v4484_v48, %s4728_s18  ;;  %v4499_v50 = vcombine.low %v3157_v45, %v3167_v47  ;;  %v431_v31 = vsel %vm4862_vm12, %v423_v15, %v430_v32  ;;  %v4678_v56 = vld [vmem:[#allocation2 + $0x48] sm:$0xff]   ;;  %v1463_v58 = vrot.slane %v1461_v16, 4  ;;  %658 = vst [vmem:[#allocation2 + $0x80] sm:$0x1] %v657_v46  ;;  %v3442_v62 = vrot.slane %v3393_v43, 5 }
  0xad   : > { %655 = vst.msk [vmem:[#allocation2 + $0x7c] sm:$0xf] %vm172_vm0, %v431_v31  ;;  %v1332_v57 = vld [vmem:[#allocation2 + $0x4c] sm:$0xf]  ;;  %v1466_v48 = vrot.slane %v1464_v37, 5  ;;  %v4407_v61 = vcombine.low %v1668_v29, %v1671_v53  ;;  %v3445_v0 = vrot.slane %v3394_v35, 5  ;;  %v5242_v11 = vpop.permute.xlu0 %1717 }
  0xae   : > { %v5234_v30 = vpop.permute.xlu1 %1192  ;;  %v1470_v59 = vshll.u32 %v1332_v57, 16  ;;  %v1474_v60 = vshrl.u32 %v1332_v57, 16  ;;  %v1605_v2 = vld [vmem:[#allocation2 + $0x4c] sm:$0xf]  ;;  %v4400_v3 = vrot.slane %v1604_v54, 9  ;;  %v3443_v8 = vsel %vm4830_vm6, %v4507_v22, %v3442_v62 }
  0xaf   : > { %v1467_v24 = vor.u32 %v1466_v48, %v1463_v58  ;;  %v1674_v7 = vrot.slane %v1605_v2, 5  ;;  %v3444_v5 = vrot.slane %v3442_v62, 4  ;;  %v1964_v23 = vshrl.u32 %v5227_v17, 16  ;;  %v1856_v47 = vld [vmem:[#allocation2 + $0x4c] sm:$0xf] }
  0xb0   : > { %3360 = vrot.lane.b32.xlu1 %v4499_v50, %s4734_s24  ;;  %1293 = vrot.lane.b32.xlu0 %v4678_v56, %s4730_s20  ;;  %v1472_v4 = vrot.slane %v1470_v59, 5  ;;  %v1476_v6 = vrot.slane %v1474_v60, 4  ;;  %v1333_v44 = vld [vmem:[#allocation2 + $0x50] sm:$0x1]  ;;  %v1967_v9 = vshll.u32 %v5227_v17, 16  ;;  %v4680_v17 = vld [vmem:[#allocation2 + $0x48] sm:$0xff]  }
  0xb1   : > { %v1468_v10 = vrot.slane %v1467_v24, 4  ;;  %v1480_v13 = vshll.u32 %v1333_v44, 16  ;;  %v3446_v14 = vsel %vm4830_vm6, %v3444_v5, %v3445_v0  ;;  %v3123_v15 = vld [vmem:[#allocation2 + $0x78] sm:$0xf]  ;;  %v1606_v18 = vld [vmem:[#allocation2 + $0x50] sm:$0x1]  ;;  %v5253_v33 = vsel %vm4830_vm6, %v4400_v3, %v1674_v7  ;;  %v5263_v60 = vpop.permute.xlu0 %2244 }
  0xb2   : > { %v1477_v25 = vor.u32 %v1476_v6, %v1472_v4  ;;  %v1676_v40 = vrot.slane %v1674_v7, 4  ;;  %v5247_v19 = vpop.permute.xlu1 %1719  ;;  %v4515_v27 = vcombine.low %v3443_v8, %v3446_v14  ;;  %v3169_v42 = vshrl.u32 %v3123_v15, 16  ;;  %v3395_v48 = vld [vmem:[#allocation2 + $0x78] sm:$0xe]  ;;  %v1857_v3 = vld [vmem:[#allocation2 + $0x50] sm:$0x1] }
  0xb3   : > { %v1473_v21 = vsel %vm4850_vm11, %v1468_v10, %v1472_v4  ;;  %v1482_v38 = vrot.slane %v1480_v13, 5  ;;  %v3125_v49 = vld [vmem:[#allocation2 + $0x80] sm:$0x1]  ;;  %v3172_v43 = vshll.u32 %v3123_v15, 16  ;;  %v1677_v35 = vrot.slane %v1606_v18, 5 }
  0xb4   : > { %1725 = vrot.lane.b32.xlu1 %v4407_v61, %s4732_s22  ;;  %v4679_v20 = vld [vmem:[#allocation2 + $0x78] sm:$0xff]   ;;  %v1478_v26 = vrot.slane %v1477_v25, 4  ;;  %v3188_v16 = vshll.u32 %v3125_v49, 16  ;;  %v1966_v50 = vrot.slane %v1964_v23, 4  ;;  %v3171_v53 = vrot.slane %v3169_v42, 4 }
  0xb5   : > { %v3124_v32 = vld [vmem:[#allocation2 + $0x7c] sm:$0xf]  ;;  %3090 = vrot.lane.b32.xlu0 %v4679_v20, %s4730_s20  ;;  %v3174_v37 = vrot.slane %v3172_v43, 5  ;;  %v5261_v46 = vsel %vm4830_vm6, %v1676_v40, %v1677_v35  ;;  %v3397_v62 = vld [vmem:[#allocation2 + $0x80] sm:$0x1]  ;;  %v4508_v0 = vrot.slane %v3395_v48, 9 }
  0xb6   : > { %v3178_v45 = vshll.u32 %v3124_v32, 16  ;;  %v3182_v29 = vshrl.u32 %v3124_v32, 16  ;;  %v1483_v31 = vsel %vm4850_vm11, %v1478_v26, %v1482_v38  ;;  %v3190_v58 = vrot.slane %v3188_v16, 5  ;;  %v3396_v59 = vld [vmem:[#allocation2 + $0x7c] sm:$0xf] }
  0xb7   : > { %v4392_v56 = vcombine.low %v1473_v21, %v1483_v31  ;;  %v3175_v22 = vor.u32 %v3174_v37, %v3171_v53  ;;  %v4408_v61 = vcombine.low %v5253_v33, %v5261_v46  ;;  %v3449_v2 = vrot.slane %v3396_v59, 5  ;;  %v240_v5 = vld [vmem:[%s4828_s17 + $0x30] sm:$0xf]  ;;  %v4681_v44 = vld [vmem:[#allocation2 + $0x78] sm:$0xff]   ;;  %v241_v26 = vld [vmem:[%s4828_s17 + $0x34] sm:$0xf] }
  0xb8   : > { %3520 = vrot.lane.b32.xlu1 %v4515_v27, %s4732_s22  ;;  %v3180_v54 = vrot.slane %v3178_v45, 5  ;;  %v3184_v57 = vrot.slane %v3182_v29, 4  ;;  %v3452_v6 = vrot.slane %v3397_v62, 5  ;;  %v1969_v7 = vrot.slane %v1967_v9, 5  ;;  %v3644_v32 = vld [vmem:[#allocation2 + $0x78] sm:$0xf]  ;;  %v5287_v45 = vpop.permute.xlu0 %2246 }
  0xb9   : > { %1566 = vrot.lane.b32.xlu0 %v4392_v56, %s4734_s24  ;;  %v1973_v8 = vshll.u32 %v1856_v47, 16  ;;  %v3176_v23 = vrot.slane %v3175_v22, 4  ;;  %v5274_v10 = vsel %vm4830_vm6, %v4508_v0, %v3449_v2  ;;  %v3451_v25 = vrot.slane %v3449_v2, 4  ;;  %v3645_v31 = vld [vmem:[#allocation2 + $0x7c] sm:$0xf] }
  0xba   : > { %v5267_v24 = vpop.permute.xlu1 %1558  ;;  %v3185_v4 = vor.u32 %v3184_v57, %v3180_v54  ;;  %v1977_v13 = vshrl.u32 %v1856_v47, 16  ;;  %v1970_v15 = vor.u32 %v1969_v7, %v1966_v50  ;;  %v1983_v40 = vshll.u32 %v1857_v3, 16  ;;  %v631_v50 = vld [vmem:[#allocation2 + $0x54] sm:$0xf]  ;;  %v3646_v56 = vld [vmem:[#allocation2 + $0x80] sm:$0x1] }
  0xbb   : > { %v1975_v18 = vrot.slane %v1973_v8, 5  ;;  %v3181_v9 = vsel %vm4850_vm11, %v3176_v23, %v3180_v54  ;;  %v5280_v20 = vsel %vm4830_vm6, %v3451_v25, %v3452_v6  ;;  %v366_v27 = vshrl.u32 %v240_v5, 16  ;;  %v248_v62 = vld [vmem:[%s4828_s17 + $0x50] sm:$0xf]  ;;  %v249_v6 = vld [vmem:[%s4828_s17 + $0x54] sm:$0xf] }
  0xbc   : > { %1818 = vrot.lane.b32.xlu1 %v4680_v17, %s4731_s21  ;;  %v3186_v14 = vrot.slane %v3185_v4, 4  ;;  %v1979_v21 = vrot.slane %v1977_v13, 4  ;;  %v4516_v49 = vcombine.low %v5274_v10, %v5280_v20  ;;  %v1971_v42 = vrot.slane %v1970_v15, 4  ;;  %v4684_v7 = vld [vmem:[#allocation2] sm:$0xff]   ;;  %v4685_v25 = vld [vmem:[#allocation2 + $0xc] sm:$0xff]   ;;  %v4687_v13 = vld [vmem:[#allocation2 + $0x18] sm:$0xff]  }
  0xbd   : > { %v1985_v43 = vrot.slane %v1983_v40, 5  ;;  %v368_v16 = vrot.slane %v366_v27, 7  ;;  %v369_v35 = vshll.u32 %v240_v5, 16  ;;  %v374_v54 = vshrl.u32 %v241_v26, 16  ;;  %v4698_v27 = vld [vmem:[#allocation2 + $0x30] sm:$0xff]   ;;  %775 = vst.msk [vmem:[#allocation3] sm:$0xff] %vm774_vm14, %v4684_v7 }
  0xbe   : > { %v3191_v38 = vsel %vm4850_vm11, %v3186_v14, %v3190_v58  ;;  %v1980_v29 = vor.u32 %v1979_v21, %v1975_v18  ;;  %v5290_v53 = vpop.permute.xlu1 %2085  ;;  %v1976_v37 = vsel %vm4850_vm11, %v1971_v42, %v1975_v18  ;;  %v377_v17 = vshll.u32 %v241_v26, 16  ;;  %v4690_v14 = vld [vmem:[#allocation2 + $0x24] sm:$0xff]   ;;  %776 = vst.msk [vmem:[#allocation3 + $0x8] sm:$0xff] %vm774_vm14, %v4685_v25  ;;  %777 = vst.msk [vmem:[#allocation3 + $0x10] sm:$0xff] %vm774_vm14, %v4687_v13 }
  0xbf   : > { %v4500_v47 = vcombine.low %v3181_v9, %v3191_v38  ;;  %v3669_v57 = vshrl.u32 %v3644_v32, 16  ;;  %v371_v48 = vor.u32 %v369_v35, %v368_v16  ;;  %v372_v59 = vrot.slane %v368_v16, 4  ;;  %v2128_v21 = vld [vmem:[#allocation2 + $0x48] sm:$0xe]  ;;  %778 = vst.msk [vmem:[#allocation3 + $0x18] sm:$0xff] %vm774_vm14, %v4690_v14  ;;  %779 = vst.msk [vmem:[#allocation3 + $0x20] sm:$0xff] %vm774_vm14, %v4698_v27 }
  0xc0   : > { %3612 = vrot.lane.b32.xlu1 %v4681_v44, %s4731_s21  ;;  %v1981_v58 = vrot.slane %v1980_v29, 4  ;;  %v3672_v22 = vshll.u32 %v3644_v32, 16  ;;  %v5296_v0 = vrot.slane %v374_v54, 7  ;;  %v3678_v3 = vshll.u32 %v3645_v31, 16  ;;  %v1029_v26 = vpop.permute.xlu0 %1028  ;;  %v4701_v32 = vld [vmem:[#allocation2 + $0x3c] sm:$0xff]   ;;  %1051 = vst.msk [vmem:[#allocation3] sm:$0xff] %vm1050_vm15, %v5177_v41 }
  0xc1   : > { %3362 = vrot.lane.b32.xlu0 %v4500_v47, %s4734_s24  ;;  %v3671_v2 = vrot.slane %v3669_v57, 4  ;;  %v3682_v4 = vshrl.u32 %v3645_v31, 16  ;;  %v632_v5 = vsel %vm4844_vm10, %v371_v48, %v631_v50  ;;  %v3688_v44 = vshll.u32 %v3646_v56, 16  ;;  %v2129_v29 = vld [vmem:[#allocation2 + $0x4c] sm:$0xf]  ;;  %780 = vst.msk [vmem:[#allocation3 + $0x28] sm:$0xff] %vm774_vm14, %v4701_v32 }
  0xc2   : > { %v1986_v8 = vsel %vm4850_vm11, %v1981_v58, %v1985_v43  ;;  %v3674_v23 = vrot.slane %v3672_v22, 5  ;;  %v379_v18 = vor.u32 %v377_v17, %v5296_v0  ;;  %v381_v40 = vrot.slane %v5296_v0, 4  ;;  %633 = vst [vmem:[#allocation2 + $0x54] sm:$0xf] %v632_v5  ;;  %v659_v54 = vld [vmem:[#allocation2 + $0x84] sm:$0xf] }
  0xc3   : > { %v4423_v15 = vcombine.low %v1976_v37, %v1986_v8  ;;  %v3680_v9 = vrot.slane %v3678_v3, 5  ;;  %v3684_v42 = vrot.slane %v3682_v4, 4  ;;  %v3690_v43 = vrot.slane %v3688_v44, 5  ;;  %v2130_v57 = vld [vmem:[#allocation2 + $0x50] sm:$0x1]  ;;  %1052 = vst.msk [vmem:[#allocation3 + $0x8] sm:$0xff] %vm1050_vm15, %v1029_v26 }
  0xc4   : > { %v3675_v38 = vor.u32 %v3674_v23, %v3671_v2  ;;  %v434_v47 = vshrl.u32 %v248_v62, 16  ;;  %v380_v35 = vsel %vm4862_vm12, %v372_v59, %v379_v18  ;;  %v437_v50 = vshll.u32 %v248_v62, 16  ;;  %v663_v2 = vld [vmem:[#allocation2 + $0x8c] sm:$0x1]  ;;  %1215 = vst.msk [vmem:[#allocation3] sm:$0xff] %vm1214_vm1, %v5157_v12  ;;  %1216 = vst.msk [vmem:[#allocation3 + $0x8] sm:$0xff] %vm1214_vm1, %v5234_v30 }
  0xc5   : > { %1727 = vrot.lane.b32.xlu0 %v4408_v61, %s4732_s22  ;;  %v1031_v16 = vpop.permute.xlu1 %1030  ;;  %2091 = vrot.lane.b32.xlu1 %v4423_v15, %s4735_s25  ;;  %v442_v31 = vshrl.u32 %v249_v6, 16  ;;  %v445_v37 = vshll.u32 %v249_v6, 16  ;;  %634 = vst.msk [vmem:[#allocation2 + $0x58] sm:$0xf] %vm172_vm0, %v380_v35  ;;  %v3685_v33 = vor.u32 %v3684_v42, %v3680_v9  ;;  %v635_v61 = vld [vmem:[#allocation2 + $0x5c] sm:$0x1] }
  0xc6   : > { %v3676_v17 = vrot.slane %v3675_v38, 4  ;;  %v436_v46 = vrot.slane %v434_v47, 7  ;;  %v4431_v58 = vrot.slane %v2128_v21, 9  ;;  %v2194_v48 = vrot.slane %v2129_v29, 5  ;;  %1053 = vst.msk [vmem:[#allocation3 + $0x10] sm:$0xff] %vm1050_vm15, %v1031_v16 }
  0xc7   : > { %v444_v56 = vrot.slane %v442_v31, 7  ;;  %v3686_v22 = vrot.slane %v3685_v33, 4  ;;  %v3917_v6 = vld [vmem:[#allocation2 + $0x7c] sm:$0xf]  ;;  %v2197_v5 = vrot.slane %v2130_v57, 5  ;;  %v636_v23 = vsel %vm4871_vm13, %v381_v40, %v635_v61  ;;  %1308 = vst.msk [vmem:[#allocation3] sm:$0xff] %vm1307_vm2, %v5198_v39 }
  0xc8   : > { %v3681_v59 = vsel %vm4850_vm11, %v3676_v17, %v3680_v9  ;;  %v439_v62 = vor.u32 %v437_v50, %v436_v46  ;;  %v440_v0 = vrot.slane %v436_v46, 4  ;;  %v2195_v10 = vsel %vm4830_vm6, %v4431_v58, %v2194_v48  ;;  %637 = vst [vmem:[#allocation2 + $0x5c] sm:$0x1] %v636_v23  ;;  %v3918_v9 = vld [vmem:[#allocation2 + $0x80] sm:$0x1]  ;;  %1309 = vst.msk [vmem:[#allocation3 + $0x8] sm:$0xff] %vm1307_vm2, %v5192_v52 }
  0xc9   : > { %3522 = vrot.lane.b32.xlu0 %v4516_v49, %s4732_s22  ;;  %v447_v3 = vor.u32 %v445_v37, %v444_v56  ;;  %v449_v4 = vrot.slane %v444_v56, 4  ;;  %v2196_v20 = vrot.slane %v2194_v48, 4  ;;  %v3916_v49 = vld [vmem:[#allocation2 + $0x78] sm:$0xe]  ;;  %v5331_v7 = vpop.permute.xlu0 %1556  ;;  %v3691_v8 = vsel %vm4850_vm11, %v3686_v22, %v3690_v43  ;;  %v1858_v44 = vld [vmem:[#allocation2 + $0x54] sm:$0xf] }
  0xca   : > { %v660_v41 = vsel %vm4844_vm10, %v439_v62, %v659_v54  ;;  %v4531_v13 = vcombine.low %v3681_v59, %v3691_v8  ;;  %v1988_v15 = vshrl.u32 %v1858_v44, 16  ;;  %v1991_v18 = vshll.u32 %v1858_v44, 16  ;;  %v5341_v21 = vld [vmem:[#allocation2 + $0x48] sm:$0xf]  ;;  %v2131_v27 = vld [vmem:[#allocation2 + $0x54] sm:$0xe] }
  0xcb   : > { %v448_v14 = vsel %vm4862_vm12, %v440_v0, %v447_v3  ;;  %661 = vst [vmem:[#allocation2 + $0x84] sm:$0xf] %v660_v41  ;;  %v2198_v40 = vsel %vm4830_vm6, %v2196_v20, %v2197_v5  ;;  %v4539_v26 = vrot.slane %v3916_v49, 9  ;;  %v664_v47 = vsel %vm4871_vm13, %v449_v4, %v663_v2  ;;  %v802_v44 = vld [vmem:[#allocation2 + $0x4c] sm:$0xf]  ;;  %1582 = vst.msk [vmem:[#allocation3 + $0x8] sm:$0xff] %vm1580_vm3, %v5267_v24 }
  0xcc   : > { %662 = vst.msk [vmem:[#allocation2 + $0x88] sm:$0xf] %vm172_vm0, %v448_v14  ;;  %v4682_v32 = vld [vmem:[#allocation2 + $0x54] sm:$0xff]   ;;  %3884 = vrot.lane.b32.xlu1 %v4531_v13, %s4735_s25  ;;  %v4439_v38 = vcombine.low %v2195_v10, %v2198_v40  ;;  %v1990_v43 = vrot.slane %v1988_v15, 4  ;;  %v1993_v29 = vrot.slane %v1991_v18, 5  ;;  %v3966_v50 = vrot.slane %v3917_v6, 5 }
  0xcd   : > { %v1033_v25 = vpop.permute.xlu1 %1032  ;;  %v1859_v42 = vld [vmem:[#allocation2 + $0x58] sm:$0xf]  ;;  %665 = vst [vmem:[#allocation2 + $0x8c] sm:$0x1] %v664_v47  ;;  %1820 = vrot.lane.b32.xlu0 %v4682_v32, %s4731_s21  ;;  %v3969_v12 = vrot.slane %v3918_v9, 5  ;;  %v4432_v54 = vrot.slane %v2131_v27, 9 }
  0xce   : > { %1054 = vst.msk [vmem:[#allocation3 + $0x18] sm:$0xff] %vm1050_vm15, %v1033_v25  ;;  %v1997_v16 = vshll.u32 %v1859_v42, 16  ;;  %v2001_v35 = vshrl.u32 %v1859_v42, 16  ;;  %v2132_v31 = vld [vmem:[#allocation2 + $0x58] sm:$0xf]  ;;  %v955_v30 = vshrl.u32 %v5341_v21, 16  ;;  %v1994_v46 = vor.u32 %v1993_v29, %v1990_v43 }
  0xcf   : > { %v2201_v17 = vrot.slane %v2132_v31, 5  ;;  %v3967_v52 = vsel %vm4830_vm6, %v4539_v26, %v3966_v50  ;;  %v3968_v56 = vrot.slane %v3966_v50, 4  ;;  %v1860_v48 = vld [vmem:[#allocation2 + $0x5c] sm:$0x1]  ;;  %v958_v62 = vshll.u32 %v5341_v21, 16  ;;  %1581 = vst.msk [vmem:[#allocation3] sm:$0xff] %vm1580_vm3, %v5331_v7 }
  0xd0   : > { %v1999_v39 = vrot.slane %v1997_v16, 5  ;;  %v2003_v61 = vrot.slane %v2001_v35, 4  ;;  %2252 = vrot.lane.b32.xlu1 %v4439_v38, %s4733_s23  ;;  %v957_v58 = vrot.slane %v955_v30, 4  ;;  %v1995_v59 = vrot.slane %v1994_v46, 4  ;;  %v2133_v23 = vld [vmem:[#allocation2 + $0x5c] sm:$0x1] }
  0xd1   : > { %v1197_v37 = vpop.permute.xlu1 %1196  ;;  %v5360_v33 = vpop.permute.xlu0 %2083  ;;  %v2203_v57 = vrot.slane %v2201_v17, 4  ;;  %v2007_v2 = vshll.u32 %v1860_v48, 16  ;;  %v3970_v3 = vsel %vm4830_vm6, %v3968_v56, %v3969_v12  ;;  %v2202_v10 = vsel %vm4830_vm6, %v4432_v54, %v2201_v17  ;;  %v803_v26 = vld [vmem:[#allocation2 + $0x50] sm:$0x1]  ;;  %1743 = vst.msk [vmem:[#allocation3 + $0x8] sm:$0xff] %vm1741_vm4, %v5247_v19  ;;  %1742 = vst.msk [vmem:[#allocation3] sm:$0xff] %vm1741_vm4, %v5242_v11 }
  0xd2   : > { %1218 = vst.msk [vmem:[#allocation3 + $0x18] sm:$0xff] %vm1214_vm1, %v1197_v37  ;;  %v2004_v22 = vor.u32 %v2003_v61, %v1999_v39  ;;  %v3647_v4 = vld [vmem:[#allocation2 + $0x84] sm:$0xf]  ;;  %v2000_v49 = vsel %vm4850_vm11, %v1995_v59, %v1999_v39  ;;  %v4547_v8 = vcombine.low %v3967_v52, %v3970_v3  ;;  %v2204_v40 = vrot.slane %v2133_v23, 5  ;;  %v2602_v39 = vld [vmem:[#allocation2 + $0x78] sm:$0xf] }
  0xd3   : > { %v4683_v0 = vld [vmem:[#allocation2 + $0x84] sm:$0xff]   ;;  %v3693_v5 = vshrl.u32 %v3647_v4, 16  ;;  %v2009_v25 = vrot.slane %v2007_v2, 5  ;;  %v3696_v14 = vshll.u32 %v3647_v4, 16  ;;  %v960_v27 = vrot.slane %v958_v62, 5 }
  0xd4   : > { %v2005_v6 = vrot.slane %v2004_v22, 4  ;;  %v3648_v41 = vld [vmem:[#allocation2 + $0x88] sm:$0xf]  ;;  %3614 = vrot.lane.b32.xlu0 %v4683_v0, %s4731_s21  ;;  %v3649_v13 = vld [vmem:[#allocation2 + $0x8c] sm:$0x1]  ;;  %4044 = vrot.lane.b32.xlu1 %v4547_v8, %s4733_s23  ;;  %v2205_v50 = vsel %vm4830_vm6, %v2203_v57, %v2204_v40  ;;  %v964_v30 = vshll.u32 %v802_v44, 16 }
  0xd5   : > { %v1195_v20 = vpop.permute.xlu0 %1194  ;;  %v3702_v15 = vshll.u32 %v3648_v41, 16  ;;  %v3706_v18 = vshrl.u32 %v3648_v41, 16  ;;  %v3695_v9 = vrot.slane %v3693_v5, 4  ;;  %v3712_v21 = vshll.u32 %v3649_v13, 16  ;;  %v3919_v47 = vld [vmem:[#allocation2 + $0x84] sm:$0xe] }
  0xd6   : > { %1217 = vst.msk [vmem:[#allocation3 + $0x10] sm:$0xff] %vm1214_vm1, %v1195_v20  ;;  %v2010_v32 = vsel %vm4850_vm11, %v2005_v6, %v2009_v25  ;;  %v3698_v38 = vrot.slane %v3696_v14, 5  ;;  %v961_v31 = vor.u32 %v960_v27, %v957_v58  ;;  %v3920_v37 = vld [vmem:[#allocation2 + $0x88] sm:$0xf]  ;;  %v4440_v17 = vcombine.low %v2202_v10, %v2205_v50  ;;  %v3921_v46 = vld [vmem:[#allocation2 + $0x8c] sm:$0x1] }
  0xd7   : > { %v3704_v42 = vrot.slane %v3702_v15, 5  ;;  %v3708_v43 = vrot.slane %v3706_v18, 4  ;;  %v4424_v16 = vcombine.low %v2000_v49, %v2010_v32  ;;  %v3714_v35 = vrot.slane %v3712_v21, 5  ;;  %v2603_v0 = vld [vmem:[#allocation2 + $0x7c] sm:$0xf] }
  0xd8   : > { %v3699_v12 = vor.u32 %v3698_v38, %v3695_v9  ;;  %v962_v52 = vrot.slane %v961_v31, 4  ;;  %v968_v56 = vshrl.u32 %v802_v44, 16  ;;  %v974_v48 = vshll.u32 %v803_v26, 16  ;;  %2254 = vrot.lane.b32.xlu1 %v4440_v17, %s4733_s23  ;;  %v2604_v20 = vld [vmem:[#allocation2 + $0x80] sm:$0x1] }
  0xd9   : > { %v1288_v29 = vpop.permute.xlu0 %1287  ;;  %v3709_v54 = vor.u32 %v3708_v43, %v3704_v42  ;;  %2093 = vrot.lane.b32.xlu0 %v4424_v16, %s4735_s25  ;;  %v4540_v59 = vrot.slane %v3919_v47, 9  ;;  %v966_v22 = vrot.slane %v964_v30, 5  ;;  %v3973_v62 = vrot.slane %v3920_v37, 5  ;;  %v804_v23 = vld [vmem:[#allocation2 + $0x54] sm:$0xf] }
  0xda   : > { %1310 = vst.msk [vmem:[#allocation3 + $0x10] sm:$0xff] %vm1307_vm2, %v1288_v29  ;;  %v3700_v57 = vrot.slane %v3699_v12, 4  ;;  %v970_v3 = vrot.slane %v968_v56, 4  ;;  %v976_v4 = vrot.slane %v974_v48, 5  ;;  %v3976_v10 = vrot.slane %v3921_v46, 5 }
  0xdb   : > { %v3710_v58 = vrot.slane %v3709_v54, 4  ;;  %v2669_v49 = vshrl.u32 %v2602_v39, 16  ;;  %v967_v41 = vsel %vm4850_vm11, %v962_v52, %v966_v22  ;;  %v3974_v5 = vsel %vm4830_vm6, %v4540_v59, %v3973_v62  ;;  %v1077_v40 = vld [vmem:[#allocation2 + $0x48] sm:$0xe]  ;;  %v805_v32 = vld [vmem:[#allocation2 + $0x58] sm:$0xf] }
  0xdc   : > { %v1290_v61 = vpop.permute.xlu1 %1289  ;;  %v3705_v6 = vsel %vm4850_vm11, %v3700_v57, %v3704_v42  ;;  %v971_v25 = vor.u32 %v970_v3, %v966_v22  ;;  %v3975_v13 = vrot.slane %v3973_v62, 4  ;;  %v2672_v15 = vshll.u32 %v2602_v39, 16  ;;  %v806_v50 = vld [vmem:[#allocation2 + $0x5c] sm:$0x1]  ;;  %v1078_v17 = vld [vmem:[#allocation2 + $0x4c] sm:$0xf] }
  0xdd   : > { %1311 = vst.msk [vmem:[#allocation3 + $0x18] sm:$0xff] %vm1307_vm2, %v1290_v61  ;;  %v5384_v2 = vpop.permute.xlu0 %1560  ;;  %v3715_v8 = vsel %vm4850_vm11, %v3710_v58, %v3714_v35  ;;  %v2671_v14 = vrot.slane %v2669_v49, 4  ;;  %v2678_v18 = vshll.u32 %v2603_v0, 16  ;;  %v2682_v9 = vshrl.u32 %v2603_v0, 16  ;;  %v1079_v52 = vld [vmem:[#allocation2 + $0x50] sm:$0x1] }
  0xde   : > { %v4532_v44 = vcombine.low %v3705_v6, %v3715_v8  ;;  %v2688_v21 = vshll.u32 %v2604_v20, 16  ;;  %v972_v26 = vrot.slane %v971_v25, 4  ;;  %v3977_v27 = vsel %vm4830_vm6, %v3975_v13, %v3976_v10  ;;  %v2606_v8 = vld [vmem:[#allocation2 + $0x88] sm:$0xf]  ;;  %v2607_v13 = vld [vmem:[#allocation2 + $0x8c] sm:$0x1] }
  0xdf   : > { %v979_v38 = vshrl.u32 %v804_v23, 16  ;;  %v982_v42 = vshll.u32 %v804_v23, 16  ;;  %v4548_v47 = vcombine.low %v3974_v5, %v3977_v27  ;;  %v2674_v29 = vrot.slane %v2672_v15, 5  ;;  %1583 = vst.msk [vmem:[#allocation3 + $0x10] sm:$0xff] %vm1580_vm3, %v5384_v2  ;;  %v1335_v24 = vld [vmem:[#allocation2 + $0x58] sm:$0xf] }
  0xe0   : > { %3886 = vrot.lane.b32.xlu0 %v4532_v44, %s4735_s25  ;;  %v2680_v16 = vrot.slane %v2678_v18, 5  ;;  %v2684_v35 = vrot.slane %v2682_v9, 4  ;;  %v977_v31 = vsel %vm4850_vm11, %v972_v26, %v976_v4  ;;  %v2690_v37 = vrot.slane %v2688_v21, 5  ;;  %v2605_v4 = vld [vmem:[#allocation2 + $0x84] sm:$0xf] }
  0xe1   : > { %v5397_v43 = vpop.permute.xlu0 %1721  ;;  %v981_v12 = vrot.slane %v979_v38, 4  ;;  %v984_v54 = vrot.slane %v982_v42, 5  ;;  %v4361_v30 = vcombine.low %v967_v41, %v977_v31  ;;  %4046 = vrot.lane.b32.xlu1 %v4548_v47, %s4733_s23  ;;  %v2675_v46 = vor.u32 %v2674_v29, %v2671_v14  ;;  %v2875_v26 = vld [vmem:[#allocation2 + $0x7c] sm:$0xf]  ;;  %v2876_v47 = vld [vmem:[#allocation2 + $0x80] sm:$0x1] }
  0xe2   : > { %v2685_v39 = vor.u32 %v2684_v35, %v2680_v16  ;;  %v988_v61 = vshll.u32 %v805_v32, 16  ;;  %v992_v59 = vshrl.u32 %v805_v32, 16  ;;  %v998_v57 = vshll.u32 %v806_v50, 16  ;;  %1744 = vst.msk [vmem:[#allocation3 + $0x10] sm:$0xff] %vm1741_vm4, %v5397_v43 }
  0xe3   : > { %v985_v48 = vor.u32 %v984_v54, %v981_v12  ;;  %v4369_v58 = vrot.slane %v1077_v40, 9  ;;  %v2676_v22 = vrot.slane %v2675_v46, 4  ;;  %v1154_v3 = vrot.slane %v1078_v17, 5  ;;  %v2874_v40 = vld [vmem:[#allocation2 + $0x78] sm:$0xe] }
  0xe4   : > { %1038 = vrot.lane.b32.xlu0 %v4361_v30, %s4729_s19  ;;  %v2686_v62 = vrot.slane %v2685_v39, 4  ;;  %v990_v0 = vrot.slane %v988_v61, 5  ;;  %v994_v20 = vrot.slane %v992_v59, 4  ;;  %v1000_v49 = vrot.slane %v998_v57, 5  ;;  %v1080_v17 = vld [vmem:[#allocation2 + $0x54] sm:$0xe] }
  0xe5   : > { %v986_v10 = vrot.slane %v985_v48, 4  ;;  %v1157_v6 = vrot.slane %v1079_v52, 5  ;;  %v5405_v41 = vpop.permute.xlu0 %1814  ;;  %v2681_v5 = vsel %vm4850_vm11, %v2676_v22, %v2680_v16  ;;  %v1155_v44 = vsel %vm4830_vm6, %v4369_v58, %v1154_v3  ;;  %v1081_v30 = vld [vmem:[#allocation2 + $0x58] sm:$0xf]  ;;  %v5421_v59 = vld [vmem:[#allocation2 + $0x5c] sm:$0x1] }
  0xe6   : > { %v5402_v56 = vpop.permute.xlu1 %1562  ;;  %v2691_v23 = vsel %vm4850_vm11, %v2686_v62, %v2690_v37  ;;  %v1156_v25 = vrot.slane %v1154_v3, 4  ;;  %v995_v9 = vor.u32 %v994_v20, %v990_v0  ;;  %v2693_v21 = vshrl.u32 %v2605_v4, 16  ;;  %v2878_v3 = vld [vmem:[#allocation2 + $0x88] sm:$0xf]  ;;  %v5429_v20 = vld [vmem:[#allocation2 + $0x8c] sm:$0x1] }
  0xe7   : > { %v4469_v15 = vcombine.low %v2681_v5, %v2691_v23  ;;  %v991_v18 = vsel %vm4850_vm11, %v986_v10, %v990_v0  ;;  %v2696_v32 = vshll.u32 %v2605_v4, 16  ;;  %v2702_v38 = vshll.u32 %v2606_v8, 16  ;;  %v2877_v0 = vld [vmem:[#allocation2 + $0x84] sm:$0xe]  ;;  %1584 = vst.msk [vmem:[#allocation3 + $0x18] sm:$0xff] %vm1580_vm3, %v5402_v56  ;;  %v4686_v23 = vld [vmem:[#allocation2 + $0x54] sm:$0xff]  }
  0xe8   : > { %v1158_v27 = vsel %vm4830_vm6, %v1156_v25, %v1157_v6  ;;  %v2706_v42 = vshrl.u32 %v2606_v8, 16  ;;  %v996_v29 = vrot.slane %v995_v9, 4  ;;  %v2695_v35 = vrot.slane %v2693_v21, 4  ;;  %v250_v25 = vld [vmem:[%s4828_s17 + $0x58] sm:$0xf] }
  0xe9   : > { %2840 = vrot.lane.b32.xlu0 %v4469_v15, %s4729_s19  ;;  %v4377_v16 = vcombine.low %v1155_v44, %v1158_v27  ;;  %v2712_v50 = vshll.u32 %v2607_v13, 16  ;;  %v2698_v31 = vrot.slane %v2696_v32, 5  ;;  %v2704_v37 = vrot.slane %v2702_v38, 5  ;;  %v251_v15 = vld [vmem:[%s4828_s17 + $0x5c] sm:$0xf] }
  0xea   : > { %v1724_v14 = vpop.permute.xlu1 %1723  ;;  %v2708_v12 = vrot.slane %v2706_v42, 4  ;;  %v4477_v54 = vrot.slane %v2874_v40, 9  ;;  %v1001_v39 = vsel %vm4850_vm11, %v996_v29, %v1000_v49  ;;  %v2932_v52 = vrot.slane %v2875_v26, 5  ;;  %v1334_v49 = vld [vmem:[#allocation2 + $0x54] sm:$0xf] }
  0xeb   : > { %1202 = vrot.lane.b32.xlu1 %v4377_v16, %s4728_s18  ;;  %v2714_v61 = vrot.slane %v2712_v50, 5  ;;  %v2935_v48 = vrot.slane %v2876_v47, 5  ;;  %v4362_v58 = vcombine.low %v991_v18, %v1001_v39  ;;  %v2699_v22 = vor.u32 %v2698_v31, %v2695_v35  ;;  %1745 = vst.msk [vmem:[#allocation3 + $0x18] sm:$0xff] %vm1741_vm4, %v1724_v14  ;;  %v5482_v38 = vld [vmem:[%s6012_s1 + $0x10] ss:$0 sps:$4 sm:$0x33]  }
  0xec   : > { %v2709_v62 = vor.u32 %v2708_v12, %v2704_v37  ;;  %v2933_v4 = vsel %vm4830_vm6, %v4477_v54, %v2932_v52  ;;  %v2934_v10 = vrot.slane %v2932_v52, 4  ;;  %vm1834_vm5 = vcmask 228544   ;;  %v4700_v35 = vld [vmem:[#allocation2 + $0x60] sm:$0xff]  }
  0xed   : > { %1040 = vrot.lane.b32.xlu0 %v4362_v58, %s4729_s19  ;;  %v2700_v6 = vrot.slane %v2699_v22, 4  ;;  %vm2107_vm7 = vcmask 261344   ;;  %vm2268_vm8 = vcmask 294144   ;;  %1836 = vst.msk [vmem:[#allocation3 + $0x8] sm:$0xff] %vm1834_vm5, %v5205_v28  ;;  %v4370_v56 = vrot.slane %v1080_v17, 9  ;;  %1835 = vst.msk [vmem:[#allocation3] sm:$0xff] %vm1834_vm5, %v5229_v55 }
  0xee   : > { %v1817_v46 = vpop.permute.xlu1 %1816  ;;  %v2088_v57 = vpop.permute.xlu0 %2087  ;;  %v2710_v8 = vrot.slane %v2709_v62, 4  ;;  %v2936_v2 = vsel %vm4830_vm6, %v2934_v10, %v2935_v48  ;;  %v1161_v5 = vrot.slane %v1081_v30, 5  ;;  %v1164_v19 = vrot.slane %v5421_v59, 5  ;;  %1837 = vst.msk [vmem:[#allocation3 + $0x10] sm:$0xff] %vm1834_vm5, %v5405_v41  ;;  %v1336_v55 = vld [vmem:[#allocation2 + $0x5c] sm:$0x1] }
  0xef   : > { %1838 = vst.msk [vmem:[#allocation3 + $0x18] sm:$0xff] %vm1834_vm5, %v1817_v46  ;;  %v2705_v11 = vsel %vm4850_vm11, %v2700_v6, %v2704_v37  ;;  %v4485_v28 = vcombine.low %v2933_v4, %v2936_v2  ;;  %v4478_v44 = vrot.slane %v2877_v0, 9  ;;  %v2942_v18 = vrot.slane %v5429_v20, 5  ;;  %v3126_v54 = vld [vmem:[#allocation2 + $0x84] sm:$0xf]  ;;  %v4702_v30 = vld [vmem:[#allocation2 + $0x6c] sm:$0xff]  }
  0xf0   : > { %v2715_v43 = vsel %vm4850_vm11, %v2710_v8, %v2714_v61  ;;  %2109 = vst.msk [vmem:[#allocation3 + $0x8] sm:$0xff] %vm2107_vm7, %v5290_v53  ;;  %2108 = vst.msk [vmem:[#allocation3] sm:$0xff] %vm2107_vm7, %v5360_v33  ;;  %v1162_v13 = vsel %vm4830_vm6, %v4370_v56, %v1161_v5  ;;  %v1163_v14 = vrot.slane %v1161_v5, 4  ;;  %v2939_v53 = vrot.slane %v2878_v3, 5  ;;  %v4689_v39 = vld [vmem:[#allocation2 + $0x84] sm:$0xff]  }
  0xf1   : > { %2110 = vst.msk [vmem:[#allocation3 + $0x10] sm:$0xff] %vm2107_vm7, %v2088_v57  ;;  %v4470_v41 = vcombine.low %v2705_v11, %v2715_v43  ;;  %3000 = vrot.lane.b32.xlu1 %v4485_v28, %s4728_s18  ;;  %v1485_v9 = vshrl.u32 %v1334_v49, 16  ;;  %v1488_v21 = vshll.u32 %v1334_v49, 16  ;;  %v1494_v40 = vshll.u32 %v1335_v24, 16  ;;  %v666_v59 = vld [vmem:[#allocation2 + $0x90] sm:$0xf] }
  0xf2   : > { %v2090_v7 = vpop.permute.xlu1 %2089  ;;  %2270 = vst.msk [vmem:[#allocation3 + $0x8] sm:$0xff] %vm2268_vm8, %v5287_v45  ;;  %2269 = vst.msk [vmem:[#allocation3] sm:$0xff] %vm2268_vm8, %v5263_v60  ;;  %v1165_v45 = vsel %vm4830_vm6, %v1163_v14, %v1164_v19  ;;  %v2940_v60 = vsel %vm4830_vm6, %v4478_v44, %v2939_v53  ;;  %v2941_v27 = vrot.slane %v2939_v53, 4  ;;  %v1498_v32 = vshrl.u32 %v1335_v24, 16  ;;  %v3127_v0 = vld [vmem:[#allocation2 + $0x88] sm:$0xf] }
  0xf3   : > { %2111 = vst.msk [vmem:[#allocation3 + $0x18] sm:$0xff] %vm2107_vm7, %v2090_v7  ;;  %2842 = vrot.lane.b32.xlu0 %v4470_v41, %s4729_s19  ;;  %v4378_v42 = vcombine.low %v1162_v13, %v1165_v45  ;;  %v1487_v47 = vrot.slane %v1485_v9, 4  ;;  %v1490_v29 = vrot.slane %v1488_v21, 5  ;;  %v1496_v16 = vrot.slane %v1494_v40, 5  ;;  %v3128_v7 = vld [vmem:[#allocation2 + $0x8c] sm:$0x1] }
  0xf4   : > { %v2249_v33 = vpop.permute.xlu0 %2248  ;;  %v2943_v50 = vsel %vm4830_vm6, %v2941_v27, %v2942_v18  ;;  %v1500_v31 = vrot.slane %v1498_v32, 4  ;;  %v1504_v37 = vshll.u32 %v1336_v55, 16  ;;  %v451_v12 = vshrl.u32 %v250_v25, 16  ;;  %v4691_v56 = vld [vmem:[#allocation2 + $0x60] sm:$0xff]   ;;  %v1339_v13 = vld [vmem:[#allocation2 + $0x68] sm:$0x1] }
  0xf5   : > { %2271 = vst.msk [vmem:[#allocation3 + $0x10] sm:$0xff] %vm2268_vm8, %v2249_v33  ;;  %1295 = vrot.lane.b32.xlu1 %v4686_v23, %s4730_s20  ;;  %v4486_v46 = vcombine.low %v2940_v60, %v2943_v50  ;;  %v1491_v61 = vor.u32 %v1490_v29, %v1487_v47  ;;  %v454_v52 = vshll.u32 %v250_v25, 16  ;;  %v459_v48 = vshrl.u32 %v251_v15, 16  ;;  %v1337_v28 = vld [vmem:[#allocation2 + $0x60] sm:$0xf]  ;;  %v4709_v9 = vld [vmem:[#allocation2 + $0x48] sm:$0xff]  }
  0xf6   : > { %v1035_v26 = vpop.permute.xlu1 %1034  ;;  %v1501_v57 = vor.u32 %v1500_v31, %v1496_v16  ;;  %v1506_v58 = vrot.slane %v1504_v37, 5  ;;  %v453_v22 = vrot.slane %v451_v12, 7  ;;  %v462_v62 = vshll.u32 %v251_v15, 16  ;;  %v1338_v41 = vld [vmem:[#allocation2 + $0x64] sm:$0xf]  ;;  %781 = vst.msk [vmem:[#allocation3 + $0x30] sm:$0xff] %vm774_vm14, %v4709_v9 }
  0xf7   : > { %1055 = vst.msk [vmem:[#allocation3 + $0x20] sm:$0xff] %vm1050_vm15, %v1035_v26  ;;  %1204 = vrot.lane.b32.xlu0 %v4378_v42, %s4728_s18  ;;  %v1492_v3 = vrot.slane %v1491_v61, 4  ;;  %v5490_v4 = vrot.slane %v459_v48, 7  ;;  %vm2325_vm9 = vcmask 1041408   ;;  %v3193_v10 = vshrl.u32 %v3126_v54, 16 }
  0xf8   : > { %v2251_v17 = vpop.permute.xlu0 %2250  ;;  %v1502_v6 = vrot.slane %v1501_v57, 4  ;;  %v456_v8 = vor.u32 %v454_v52, %v453_v22  ;;  %v457_v24 = vrot.slane %v453_v22, 4  ;;  %4649 = vmatprep.subr.msk.bf16.mxu0 %vm2325_vm9, %v5482_v38  ;;  %v3196_v2 = vshll.u32 %v3126_v54, 16  ;;  %4650 = vmatprep.subr.msk.bf16.mxu1 %vm2325_vm9, %v5482_v38  ;;  %v1607_v18 = vld [vmem:[#allocation2 + $0x54] sm:$0xe] }
  0xf9   : > { %2272 = vst.msk [vmem:[#allocation3 + $0x18] sm:$0xff] %vm2268_vm8, %v2251_v17  ;;  %v5492_v20 = vld [vmem:[#allocation3] sm:$0xff]  ;;  %v5494_v49 = vld [vmem:[#allocation3 + $0x8] sm:$0xff]  ;;  %3092 = vrot.lane.b32.xlu1 %v4689_v39, %s4730_s20  ;;  %v1497_v5 = vsel %vm4850_vm11, %v1492_v3, %v1496_v16  ;;  %v464_v19 = vor.u32 %v462_v62, %v5490_v4  ;;  %v466_v11 = vrot.slane %v5490_v4, 4  ;;  %v3195_v43 = vrot.slane %v3193_v10, 4 }
  0xfa   : > { %2588 = vst.msk [vmem:[#allocation3] sm:$0xff] %vm774_vm14, %v4700_v35  ;;  %2589 = vst.msk [vmem:[#allocation3 + $0x8] sm:$0xff] %vm774_vm14, %v4702_v30  ;;  %v1507_v23 = vsel %vm4850_vm11, %v1502_v6, %v1506_v58  ;;  %v667_v44 = vsel %vm4844_vm10, %v456_v8, %v666_v59  ;;  %v3198_v55 = vrot.slane %v3196_v2, 5  ;;  %v3202_v25 = vshll.u32 %v3127_v0, 16  ;;  %v1608_v60 = vld [vmem:[#allocation2 + $0x58] sm:$0xf] }
  0xfb   : > { %3002 = vrot.lane.b32.xlu0 %v4486_v46, %s4728_s18  ;;  %v4393_v14 = vcombine.low %v1497_v5, %v1507_v23  ;;  %v465_v53 = vsel %vm4862_vm12, %v457_v24, %v464_v19  ;;  %668 = vst [vmem:[#allocation2 + $0x90] sm:$0xf] %v667_v44  ;;  %v3206_v15 = vshrl.u32 %v3127_v0, 16  ;;  %v3212_v33 = vshll.u32 %v3128_v7, 16  ;;  %v1609_v27 = vld [vmem:[#allocation2 + $0x5c] sm:$0x1] }
  0xfc   : > { %669 = vst.msk [vmem:[#allocation2 + $0x94] sm:$0xf] %vm172_vm0, %v465_v53  ;;  %v3199_v21 = vor.u32 %v3198_v55, %v3195_v43  ;;  %v3204_v40 = vrot.slane %v3202_v25, 5  ;;  %v2327_v26 = vsel %vm2325_vm9, %v5482_v38, 0  ;;  %v1509_v45 = vshrl.u32 %v1337_v28, 16  ;;  %v2279_v46 = vld [vmem:[#allocation3 + $0x10] sm:$0xff] }
  0xfd   : > { %1568 = vrot.lane.b32.xlu1 %v4393_v14, %s4734_s24  ;;  %v3208_v32 = vrot.slane %v3206_v15, 4  ;;  %v3214_v42 = vrot.slane %v3212_v33, 5  ;;  %4610 = vmatpush3.bf16.msra.mxu0 %v2327_v26  ;;  %v1512_v47 = vshll.u32 %v1337_v28, 16  ;;  %v1518_v29 = vshll.u32 %v1338_v41, 16  ;;  %v670_v16 = vld [vmem:[#allocation2 + $0x98] sm:$0x1] }
  0xfe   : > { %v5518_v35 = vld [vmem:[#allocation2 + $0x84] sm:$0xe]  ;;  %v3200_v50 = vrot.slane %v3199_v21, 4  ;;  %v1511_v31 = vrot.slane %v1509_v45, 4  ;;  %v1522_v38 = vshrl.u32 %v1338_v41, 16  ;;  %v1528_v37 = vshll.u32 %v1339_v13, 16  ;;  %4632 = vmatpush3.bf16.msra.mxu1 %v2327_v26 }
  0xff   : > { %1297 = vrot.lane.b32.xlu0 %v4691_v56, %s4730_s20  ;;  %v5522_v12 = vld [vmem:[#allocation2 + $0x88] sm:$0xf]  ;;  %v3209_v54 = vor.u32 %v3208_v32, %v3204_v40  ;;  %v1514_v17 = vrot.slane %v1512_v47, 5  ;;  %v1520_v30 = vrot.slane %v1518_v29, 5  ;;  %vm2300_vm9 = vcmask 293888   ;;  %v4710_v39 = vld [vmem:[#allocation2 + $0x78] sm:$0xff]  }
 0x100   : > { %v3205_v61 = vsel %vm4850_vm11, %v3200_v50, %v3204_v40  ;;  %v1524_v52 = vrot.slane %v1522_v38, 4  ;;  %v1530_v48 = vrot.slane %v1528_v37, 5  ;;  %4611 = vmatprep.mubr.msk.bf16.mxu0 %vm2300_vm9, %v5492_v20  ;;  %v4401_v59 = vrot.slane %v1607_v18, 9  ;;  %2590 = vst.msk [vmem:[#allocation3 + $0x10] sm:$0xff] %vm774_vm14, %v4710_v39  ;;  %v3400_v56 = vld [vmem:[#allocation2 + $0x8c] sm:$0x1] }
 0x101   : > { %v3210_v58 = vrot.slane %v3209_v54, 4  ;;  %v1515_v22 = vor.u32 %v1514_v17, %v1511_v31  ;;  %v1681_v62 = vrot.slane %v1608_v60, 5  ;;  %v1684_v0 = vrot.slane %v1609_v27, 5  ;;  %4612 = vmatmul.mubr.msk.bf16.vlgmr.msra.gmra.mrb[0].mxu0 %vm2300_vm9, %v5494_v49  ;;  %v1610_v5 = vld [vmem:[#allocation2 + $0x60] sm:$0xe]  ;;  %v4713_v25 = vld [vmem:[#allocation2 + $0x54] sm:$0xff]  }
 0x102   : > { %v1525_v3 = vor.u32 %v1524_v52, %v1520_v30  ;;  %v671_v4 = vsel %vm4871_vm13, %v466_v11, %v670_v16  ;;  %v3129_v10 = vld [vmem:[#allocation2 + $0x90] sm:$0xf]  ;;  %v4509_v20 = vrot.slane %v5518_v35, 9  ;;  %v3456_v6 = vrot.slane %v5522_v12, 5  ;;  %4615 = vmatprep.mubr.msk.bf16.mxu0 %vm2300_vm9, %v2279_v46  ;;  %v1611_v44 = vld [vmem:[#allocation2 + $0x64] sm:$0xf] }
 0x103   : > { %v1037_v57 = vpop.permute.xlu0 %1036  ;;  %v4693_v8 = vld [vmem:[#allocation2 + $0x90] sm:$0xff]   ;;  %v3215_v24 = vsel %vm4850_vm11, %v3210_v58, %v3214_v42  ;;  %v1516_v49 = vrot.slane %v1515_v22, 4  ;;  %v1682_v7 = vsel %vm4830_vm6, %v4401_v59, %v1681_v62  ;;  %v1683_v2 = vrot.slane %v1681_v62, 4  ;;  %672 = vst [vmem:[#allocation2 + $0x98] sm:$0x1] %v671_v4  ;;  %782 = vst.msk [vmem:[#allocation3 + $0x38] sm:$0xff] %vm774_vm14, %v4713_v25 }
 0x104   : > { %1056 = vst.msk [vmem:[#allocation3 + $0x28] sm:$0xff] %vm1050_vm15, %v1037_v57  ;;  %v4501_v19 = vcombine.low %v3205_v61, %v3215_v24  ;;  %v1526_v11 = vrot.slane %v1525_v3, 4  ;;  %v3130_v43 = vld [vmem:[#allocation2 + $0x94] sm:$0xf]  ;;  %v3217_v28 = vshrl.u32 %v3129_v10, 16  ;;  %v3220_v23 = vshll.u32 %v3129_v10, 16  ;;  %3094 = vrot.lane.b32.xlu0 %v4693_v8, %s4730_s20 }
 0x105   : > { %v1612_v55 = vld [vmem:[#allocation2 + $0x68] sm:$0x1]  ;;  %v1521_v41 = vsel %vm4850_vm11, %v1516_v49, %v1520_v30  ;;  %v1685_v13 = vsel %vm4830_vm6, %v1683_v2, %v1684_v0  ;;  %v3226_v14 = vshll.u32 %v3130_v43, 16  ;;  %v3230_v53 = vshrl.u32 %v3130_v43, 16  ;;  %v3401_v15 = vld [vmem:[#allocation2 + $0x90] sm:$0xe] }
 0x106   : > { %v2280_v33 = vld [vmem:[#allocation3 + $0x18] sm:$0xff]  ;;  %3364 = vrot.lane.b32.xlu1 %v4501_v19, %s4734_s24  ;;  %v1531_v18 = vsel %vm4850_vm11, %v1526_v11, %v1530_v48  ;;  %v4409_v9 = vcombine.low %v1682_v7, %v1685_v13  ;;  %v3219_v21 = vrot.slane %v3217_v28, 4  ;;  %v3222_v40 = vrot.slane %v3220_v23, 5  ;;  %v4714_v50 = vld [vmem:[#allocation2 + $0x84] sm:$0xff]   ;;  %v1861_v54 = vld [vmem:[#allocation2 + $0x60] sm:$0xf] }
 0x107   : > { %v4394_v45 = vcombine.low %v1521_v41, %v1531_v18  ;;  %v3228_v60 = vrot.slane %v3226_v14, 5  ;;  %v3232_v27 = vrot.slane %v3230_v53, 4  ;;  %v3457_v32 = vsel %vm4830_vm6, %v4509_v20, %v3456_v6  ;;  %v3402_v42 = vld [vmem:[#allocation2 + $0x94] sm:$0xf]  ;;  %2591 = vst.msk [vmem:[#allocation3 + $0x18] sm:$0xff] %vm774_vm14, %v4714_v50  ;;  %v4695_v7 = vld [vmem:[#allocation2 + $0x60] sm:$0xff]  }
 0x108   : > { %v3223_v47 = vor.u32 %v3222_v40, %v3219_v21  ;;  %v3458_v29 = vrot.slane %v3456_v6, 4  ;;  %v3459_v16 = vrot.slane %v3400_v56, 5  ;;  %v4402_v35 = vrot.slane %v1610_v5, 9  ;;  %v1862_v22 = vld [vmem:[#allocation2 + $0x64] sm:$0xf]  ;;  %v4696_v40 = vld [vmem:[#allocation2 + $0x90] sm:$0xff]  }
 0x109   : > { %1570 = vrot.lane.b32.xlu0 %v4394_v45, %s4734_s24  ;;  %v3233_v31 = vor.u32 %v3232_v27, %v3228_v60  ;;  %v1688_v38 = vrot.slane %v1611_v44, 5  ;;  %v1691_v37 = vrot.slane %v1612_v55, 5  ;;  %v4510_v12 = vrot.slane %v3401_v15, 9  ;;  %4616 = vmatmul.mubr.msk.bf16.gmra.mrb[4].mxu0 %vm2300_vm9, %v2280_v33  ;;  %v1863_v62 = vld [vmem:[#allocation2 + $0x68] sm:$0x1] }
 0x10a   : > { %v2837_v26 = vpop.permute.xlu1 %2836  ;;  %1729 = vrot.lane.b32.xlu1 %v4409_v9, %s4732_s22  ;;  %v3131_v17 = vld [vmem:[#allocation2 + $0x98] sm:$0x1]  ;;  %v3224_v30 = vrot.slane %v3223_v47, 4  ;;  %v3460_v46 = vsel %vm4830_vm6, %v3458_v29, %v3459_v16  ;;  %v3463_v61 = vrot.slane %v3402_v42, 5  ;;  %v2012_v8 = vshrl.u32 %v1861_v54, 16 }
 0x10b   : > { %2860 = vst.msk [vmem:[#allocation3] sm:$0xff] %vm1050_vm15, %v2837_v26  ;;  %v3403_v39 = vld [vmem:[#allocation2 + $0x98] sm:$0x1]  ;;  %v3234_v48 = vrot.slane %v3233_v31, 4  ;;  %v3236_v59 = vshll.u32 %v3131_v17, 16  ;;  %v4517_v57 = vcombine.low %v3457_v32, %v3460_v46  ;;  %v1689_v58 = vsel %vm4830_vm6, %v4402_v35, %v1688_v38 }
 0x10c   : > { %v3229_v0 = vsel %vm4850_vm11, %v3224_v30, %v3228_v60  ;;  %v1690_v3 = vrot.slane %v1688_v38, 4  ;;  %v5566_v4 = vsel %vm4830_vm6, %v4510_v12, %v3463_v61  ;;  %v3465_v10 = vrot.slane %v3463_v61, 4  ;;  %v252_v19 = vld [vmem:[%s4828_s17 + $0x60] sm:$0xf]  ;;  %v253_v55 = vld [vmem:[%s4828_s17 + $0x64] sm:$0xf] }
 0x10d   : > { %v3238_v20 = vrot.slane %v3236_v59, 5  ;;  %v3466_v6 = vrot.slane %v3403_v39, 5  ;;  %v2015_v24 = vshll.u32 %v1861_v54, 16  ;;  %v2021_v2 = vshll.u32 %v1862_v22, 16  ;;  %v3650_v25 = vld [vmem:[#allocation2 + $0x90] sm:$0xf] }
 0x10e   : > { %v1199_v52 = vpop.permute.xlu1 %1198  ;;  %3524 = vrot.lane.b32.xlu1 %v4517_v57, %s4732_s22  ;;  %v1692_v49 = vsel %vm4830_vm6, %v1690_v3, %v1691_v37  ;;  %v2025_v56 = vshrl.u32 %v1862_v22, 16  ;;  %v2031_v5 = vshll.u32 %v1863_v62, 16  ;;  %v2014_v44 = vrot.slane %v2012_v8, 4  ;;  %v3651_v15 = vld [vmem:[#allocation2 + $0x94] sm:$0xf] }
 0x10f   : > { %1219 = vst.msk [vmem:[#allocation3 + $0x20] sm:$0xff] %vm1214_vm1, %v1199_v52  ;;  %v3239_v43 = vsel %vm4850_vm11, %v3234_v48, %v3238_v20  ;;  %v4410_v28 = vcombine.low %v1689_v58, %v1692_v49  ;;  %v5576_v23 = vsel %vm4830_vm6, %v3465_v10, %v3466_v6  ;;  %v2017_v14 = vrot.slane %v2015_v24, 5  ;;  %v673_v27 = vld [vmem:[#allocation2 + $0x9c] sm:$0xf]  ;;  %v1864_v54 = vld [vmem:[#allocation2 + $0x6c] sm:$0xf] }
 0x110   : > { %v4502_v41 = vcombine.low %v3229_v0, %v3239_v43  ;;  %v4518_v13 = vcombine.low %v5566_v4, %v5576_v23  ;;  %v2023_v53 = vrot.slane %v2021_v2, 5  ;;  %v2027_v33 = vrot.slane %v2025_v56, 4  ;;  %v3652_v39 = vld [vmem:[#allocation2 + $0x98] sm:$0x1]  ;;  %v1865_v58 = vld [vmem:[#allocation2 + $0x70] sm:$0xf] }
 0x111   : > { %v2033_v18 = vrot.slane %v2031_v5, 5  ;;  %v468_v9 = vshrl.u32 %v252_v19, 16  ;;  %v471_v21 = vshll.u32 %v252_v19, 16  ;;  %v2018_v26 = vor.u32 %v2017_v14, %v2014_v44  ;;  %v1866_v20 = vld [vmem:[#allocation2 + $0x74] sm:$0x1]  ;;  %v4697_v5 = vld [vmem:[#allocation2 + $0x6c] sm:$0xff]  }
 0x112   : > { %v2997_v11 = vpop.permute.xlu1 %2996  ;;  %3366 = vrot.lane.b32.xlu0 %v4502_v41, %s4734_s24  ;;  %1822 = vrot.lane.b32.xlu1 %v4695_v7, %s4731_s21  ;;  %v476_v45 = vshrl.u32 %v253_v55, 16  ;;  %v479_v60 = vshll.u32 %v253_v55, 16  ;;  %v3717_v32 = vshrl.u32 %v3650_v25, 16  ;;  %v2028_v47 = vor.u32 %v2027_v33, %v2023_v53  ;;  %v2134_v2 = vld [vmem:[#allocation2 + $0x60] sm:$0xe] }
 0x113   : > { %3020 = vst.msk [vmem:[#allocation3] sm:$0xff] %vm1214_vm1, %v2997_v11  ;;  %v470_v29 = vrot.slane %v468_v9, 7  ;;  %v3720_v16 = vshll.u32 %v3650_v25, 16  ;;  %v3726_v35 = vshll.u32 %v3651_v15, 16  ;;  %v2019_v31 = vrot.slane %v2018_v26, 4 }
 0x114   : > { %v5585_v38 = vrot.slane %v476_v45, 7  ;;  %v3719_v37 = vrot.slane %v3717_v32, 4  ;;  %v3730_v12 = vshrl.u32 %v3651_v15, 16  ;;  %v2029_v17 = vrot.slane %v2028_v47, 4  ;;  %v2135_v56 = vld [vmem:[#allocation2 + $0x64] sm:$0xf] }
 0x115   : > { %v473_v30 = vor.u32 %v471_v21, %v470_v29  ;;  %v474_v46 = vrot.slane %v470_v29, 4  ;;  %v3722_v61 = vrot.slane %v3720_v16, 5  ;;  %v2024_v52 = vsel %vm4850_vm11, %v2019_v31, %v2023_v53  ;;  %v2136_v44 = vld [vmem:[#allocation2 + $0x68] sm:$0x1]  ;;  %v677_v53 = vld [vmem:[#allocation2 + $0xa4] sm:$0x1] }
 0x116   : > { %v1292_v42 = vpop.permute.xlu1 %1291  ;;  %v2839_v50 = vpop.permute.xlu0 %2838  ;;  %1731 = vrot.lane.b32.xlu0 %v4410_v28, %s4732_s22  ;;  %3616 = vrot.lane.b32.xlu1 %v4696_v40, %s4731_s21  ;;  %v481_v48 = vor.u32 %v479_v60, %v5585_v38  ;;  %v483_v59 = vrot.slane %v5585_v38, 4  ;;  %v3728_v57 = vrot.slane %v3726_v35, 5  ;;  %v2034_v62 = vsel %vm4850_vm11, %v2029_v17, %v2033_v18  ;;  %v3922_v45 = vld [vmem:[#allocation2 + $0x90] sm:$0xe]  ;;  %v3924_v31 = vld [vmem:[#allocation2 + $0x98] sm:$0x1] }
 0x117   : > { %1312 = vst.msk [vmem:[#allocation3 + $0x20] sm:$0xff] %vm1307_vm2, %v1292_v42  ;;  %v674_v0 = vsel %vm4844_vm10, %v473_v30, %v673_v27  ;;  %v3723_v3 = vor.u32 %v3722_v61, %v3719_v37  ;;  %v3732_v10 = vrot.slane %v3730_v12, 4  ;;  %v4425_v8 = vcombine.low %v2024_v52, %v2034_v62 }
 0x118   : > { %2861 = vst.msk [vmem:[#allocation3 + $0x8] sm:$0xff] %vm1050_vm15, %v2839_v50  ;;  %v482_v24 = vsel %vm4862_vm12, %v474_v46, %v481_v48  ;;  %675 = vst [vmem:[#allocation2 + $0x9c] sm:$0xf] %v674_v0  ;;  %v3736_v49 = vshll.u32 %v3652_v39, 16  ;;  %v2036_v7 = vshrl.u32 %v1864_v54, 16  ;;  %v2039_v43 = vshll.u32 %v1864_v54, 16 }
 0x119   : > { %676 = vst.msk [vmem:[#allocation2 + $0xa0] sm:$0xf] %vm172_vm0, %v482_v24  ;;  %v3724_v19 = vrot.slane %v3723_v3, 4  ;;  %v3733_v11 = vor.u32 %v3732_v10, %v3728_v57  ;;  %v2045_v28 = vshll.u32 %v1865_v58, 16  ;;  %v2049_v41 = vshrl.u32 %v1865_v58, 16 }
 0x11a   : > { %v3089_v22 = vpop.permute.xlu1 %3088  ;;  %v1201_v6 = vpop.permute.xlu0 %1200  ;;  %3526 = vrot.lane.b32.xlu0 %v4518_v13, %s4732_s22  ;;  %2095 = vrot.lane.b32.xlu1 %v4425_v8, %s4735_s25  ;;  %v3738_v55 = vrot.slane %v3736_v49, 5  ;;  %v2038_v25 = vrot.slane %v2036_v7, 4  ;;  %v2055_v14 = vshll.u32 %v1866_v20, 16  ;;  %v2041_v9 = vrot.slane %v2039_v43, 5  ;;  %v3923_v50 = vld [vmem:[#allocation2 + $0x94] sm:$0xf] }
 0x11b   : > { %3112 = vst.msk [vmem:[#allocation3] sm:$0xff] %vm1307_vm2, %v3089_v22  ;;  %v3729_v33 = vsel %vm4850_vm11, %v3724_v19, %v3728_v57  ;;  %v3734_v18 = vrot.slane %v3733_v11, 4  ;;  %v2047_v21 = vrot.slane %v2045_v28, 5  ;;  %v2051_v26 = vrot.slane %v2049_v41, 4  ;;  %v2137_v58 = vld [vmem:[#allocation2 + $0x6c] sm:$0xe] }
 0x11c   : > { %1220 = vst.msk [vmem:[#allocation3 + $0x28] sm:$0xff] %vm1214_vm1, %v1201_v6  ;;  %v2057_v4 = vrot.slane %v2055_v14, 5  ;;  %v4433_v23 = vrot.slane %v2134_v2, 9  ;;  %v2208_v13 = vrot.slane %v2135_v56, 5  ;;  %v2042_v27 = vor.u32 %v2041_v9, %v2038_v25  ;;  %v2138_v22 = vld [vmem:[#allocation2 + $0x70] sm:$0xf] }
 0x11d   : > { %v3739_v60 = vsel %vm4850_vm11, %v3734_v18, %v3738_v55  ;;  %v2211_v32 = vrot.slane %v2136_v44, 5  ;;  %v678_v42 = vsel %vm4871_vm13, %v483_v59, %v677_v53  ;;  %v2052_v29 = vor.u32 %v2051_v26, %v2047_v21  ;;  %v2139_v20 = vld [vmem:[#allocation2 + $0x74] sm:$0x1]  ;;  %v2608_v2 = vld [vmem:[#allocation2 + $0x90] sm:$0xf] }
 0x11e   : > { %v1565_v15 = vpop.permute.xlu1 %1564  ;;  %v2999_v40 = vpop.permute.xlu0 %2998  ;;  %1824 = vrot.lane.b32.xlu0 %v4697_v5, %s4731_s21  ;;  %v4533_v47 = vcombine.low %v3729_v33, %v3739_v60  ;;  %v2209_v16 = vsel %vm4830_vm6, %v4433_v23, %v2208_v13  ;;  %v2210_v35 = vrot.slane %v2208_v13, 4  ;;  %679 = vst [vmem:[#allocation2 + $0xa4] sm:$0x1] %v678_v42  ;;  %v2043_v37 = vrot.slane %v2042_v27, 4  ;;  %v2609_v33 = vld [vmem:[#allocation2 + $0x94] sm:$0xf] }
 0x11f   : > { %1585 = vst.msk [vmem:[#allocation3 + $0x20] sm:$0xff] %vm1580_vm3, %v1565_v15  ;;  %v3653_v12 = vld [vmem:[#allocation2 + $0x9c] sm:$0xf]  ;;  %v4541_v54 = vrot.slane %v3922_v45, 9  ;;  %v2053_v46 = vrot.slane %v2052_v29, 4  ;;  %v3980_v10 = vrot.slane %v3923_v50, 5 }
 0x120   : > { %3021 = vst.msk [vmem:[#allocation3 + $0x8] sm:$0xff] %vm1214_vm1, %v2999_v40  ;;  %v4699_v30 = vld [vmem:[#allocation2 + $0x9c] sm:$0xff]   ;;  %3888 = vrot.lane.b32.xlu1 %v4533_v47, %s4735_s25  ;;  %v2212_v39 = vsel %vm4830_vm6, %v2210_v35, %v2211_v32  ;;  %v2048_v52 = vsel %vm4850_vm11, %v2043_v37, %v2047_v21  ;;  %v3741_v59 = vshrl.u32 %v3653_v12, 16  ;;  %v3744_v57 = vshll.u32 %v3653_v12, 16  ;;  %v2610_v18 = vld [vmem:[#allocation2 + $0x98] sm:$0x1] }
 0x121   : > { %v3654_v61 = vld [vmem:[#allocation2 + $0xa0] sm:$0xf]  ;;  %v4441_v48 = vcombine.low %v2209_v16, %v2212_v39  ;;  %v2058_v62 = vsel %vm4850_vm11, %v2053_v46, %v2057_v4  ;;  %v3983_v7 = vrot.slane %v3924_v31, 5  ;;  %v3981_v19 = vsel %vm4830_vm6, %v4541_v54, %v3980_v10  ;;  %v3925_v13 = vld [vmem:[#allocation2 + $0x9c] sm:$0xe] }
 0x122   : > { %v3361_v38 = vpop.permute.xlu1 %3360  ;;  %v1294_v17 = vpop.permute.xlu0 %1293  ;;  %3618 = vrot.lane.b32.xlu0 %v4699_v30, %s4731_s21  ;;  %v3750_v0 = vshll.u32 %v3654_v61, 16  ;;  %v3754_v3 = vshrl.u32 %v3654_v61, 16  ;;  %v4426_v8 = vcombine.low %v2048_v52, %v2058_v62  ;;  %v3743_v24 = vrot.slane %v3741_v59, 4  ;;  %v3926_v45 = vld [vmem:[#allocation2 + $0xa0] sm:$0xf] }
 0x123   : > { %3384 = vst.msk [vmem:[#allocation3] sm:$0xff] %vm1580_vm3, %v3361_v38  ;;  %v3746_v49 = vrot.slane %v3744_v57, 5  ;;  %v3982_v11 = vrot.slane %v3980_v10, 4  ;;  %v4434_v44 = vrot.slane %v2137_v58, 9  ;;  %v2215_v55 = vrot.slane %v2138_v22, 5 }
 0x124   : > { %1313 = vst.msk [vmem:[#allocation3 + $0x28] sm:$0xff] %vm1307_vm2, %v1294_v17  ;;  %2256 = vrot.lane.b32.xlu1 %v4441_v48, %s4733_s23  ;;  %v3752_v56 = vrot.slane %v3750_v0, 5  ;;  %v3756_v5 = vrot.slane %v3754_v3, 4  ;;  %v2218_v25 = vrot.slane %v2139_v20, 5  ;;  %v2717_v9 = vshrl.u32 %v2608_v2, 16 }
 0x125   : > { %v3655_v43 = vld [vmem:[#allocation2 + $0xa4] sm:$0x1]  ;;  %v3747_v28 = vor.u32 %v3746_v49, %v3743_v24  ;;  %v3984_v15 = vsel %vm4830_vm6, %v3982_v11, %v3983_v7  ;;  %v2216_v4 = vsel %vm4830_vm6, %v4434_v44, %v2215_v55  ;;  %v2217_v23 = vrot.slane %v2215_v55, 4  ;;  %v2611_v17 = vld [vmem:[#allocation2 + $0x9c] sm:$0xf] }
 0x126   : > { %v1726_v6 = vpop.permute.xlu1 %1725  ;;  %2097 = vrot.lane.b32.xlu0 %v4426_v8, %s4735_s25  ;;  %v3757_v14 = vor.u32 %v3756_v5, %v3752_v56  ;;  %v3760_v53 = vshll.u32 %v3655_v43, 16  ;;  %v4549_v26 = vcombine.low %v3981_v19, %v3984_v15  ;;  %v2719_v32 = vrot.slane %v2717_v9, 4  ;;  %v3927_v50 = vld [vmem:[#allocation2 + $0xa4] sm:$0x1]  ;;  %v2612_v30 = vld [vmem:[#allocation2 + $0xa0] sm:$0xf] }
 0x127   : > { %1746 = vst.msk [vmem:[#allocation3 + $0x20] sm:$0xff] %vm1741_vm4, %v1726_v6  ;;  %v3091_v41 = vpop.permute.xlu0 %3090  ;;  %v3748_v40 = vrot.slane %v3747_v28, 4  ;;  %v2720_v42 = vshll.u32 %v2608_v2, 16  ;;  %v2219_v29 = vsel %vm4830_vm6, %v2217_v23, %v2218_v25  ;;  %v2726_v16 = vshll.u32 %v2609_v33, 16  ;;  %v2880_v62 = vld [vmem:[#allocation2 + $0x90] sm:$0xe] }
 0x128   : > { %3113 = vst.msk [vmem:[#allocation3 + $0x8] sm:$0xff] %vm1307_vm2, %v3091_v41  ;;  %v3758_v60 = vrot.slane %v3757_v14, 4  ;;  %v3762_v27 = vrot.slane %v3760_v53, 5  ;;  %4048 = vrot.lane.b32.xlu1 %v4549_v26, %s4733_s23  ;;  %v2730_v35 = vshrl.u32 %v2609_v33, 16  ;;  %v4442_v37 = vcombine.low %v2216_v4, %v2219_v29  ;;  %v2613_v3 = vld [vmem:[#allocation2 + $0xa4] sm:$0x1] }
 0x129   : > { %v3753_v47 = vsel %vm4850_vm11, %v3748_v40, %v3752_v56  ;;  %v2722_v12 = vrot.slane %v2720_v42, 5  ;;  %v2736_v54 = vshll.u32 %v2610_v18, 16  ;;  %v2728_v61 = vrot.slane %v2726_v16, 5  ;;  %v2881_v8 = vld [vmem:[#allocation2 + $0x94] sm:$0xf] }
 0x12a   : > { %v3521_v21 = vpop.permute.xlu1 %3520  ;;  %v3763_v38 = vsel %vm4850_vm11, %v3758_v60, %v3762_v27  ;;  %v2732_v52 = vrot.slane %v2730_v35, 4  ;;  %v4542_v48 = vrot.slane %v3925_v13, 9  ;;  %v3987_v58 = vrot.slane %v3926_v45, 5  ;;  %v2882_v56 = vld [vmem:[#allocation2 + $0x98] sm:$0x1] }
 0x12b   : > { %3544 = vst.msk [vmem:[#allocation3] sm:$0xff] %vm1741_vm4, %v3521_v21  ;;  %v1567_v31 = vpop.permute.xlu0 %1566  ;;  %v4534_v39 = vcombine.low %v3753_v47, %v3763_v38  ;;  %v2723_v59 = vor.u32 %v2722_v12, %v2719_v32  ;;  %v2738_v57 = vrot.slane %v2736_v54, 5  ;;  %v3990_v22 = vrot.slane %v3927_v50, 5  ;;  %v2883_v14 = vld [vmem:[#allocation2 + $0x9c] sm:$0xe] }
 0x12c   : > { %1586 = vst.msk [vmem:[#allocation3 + $0x28] sm:$0xff] %vm1580_vm3, %v1567_v31  ;;  %v2733_v0 = vor.u32 %v2732_v52, %v2728_v61  ;;  %v2741_v10 = vshrl.u32 %v2611_v17, 16  ;;  %v2744_v20 = vshll.u32 %v2611_v17, 16  ;;  %v2750_v6 = vshll.u32 %v2612_v30, 16  ;;  %v2884_v53 = vld [vmem:[#allocation2 + $0xa0] sm:$0xf] }
 0x12d   : > { %3890 = vrot.lane.b32.xlu0 %v4534_v39, %s4735_s25  ;;  %v2724_v24 = vrot.slane %v2723_v59, 4  ;;  %v3988_v49 = vsel %vm4830_vm6, %v4542_v48, %v3987_v58  ;;  %v3989_v7 = vrot.slane %v3987_v58, 4  ;;  %v2754_v2 = vshrl.u32 %v2612_v30, 16  ;;  %v2885_v40 = vld [vmem:[#allocation2 + $0xa4] sm:$0x1] }
 0x12e   : > { %v1819_v46 = vpop.permute.xlu1 %1818  ;;  %v2734_v19 = vrot.slane %v2733_v0, 4  ;;  %v2743_v11 = vrot.slane %v2741_v10, 4  ;;  %v2746_v43 = vrot.slane %v2744_v20, 5  ;;  %v2752_v28 = vrot.slane %v2750_v6, 5  ;;  %v254_v45 = vld [vmem:[%s4828_s17 + $0x68] sm:$0xf] }
 0x12f   : > { %1839 = vst.msk [vmem:[#allocation3 + $0x20] sm:$0xff] %vm1834_vm5, %v1819_v46  ;;  %v2729_v44 = vsel %vm4850_vm11, %v2724_v24, %v2728_v61  ;;  %v3991_v55 = vsel %vm4830_vm6, %v3989_v7, %v3990_v22  ;;  %v2756_v25 = vrot.slane %v2754_v2, 4  ;;  %v2760_v41 = vshll.u32 %v2613_v3, 16  ;;  %v255_v47 = vld [vmem:[%s4828_s17 + $0x6c] sm:$0xf]  ;;  %v4703_v7 = vld [vmem:[#allocation2 + $0x9c] sm:$0xff]  }
 0x130   : > { %v2739_v33 = vsel %vm4850_vm11, %v2734_v19, %v2738_v57  ;;  %v4550_v18 = vcombine.low %v3988_v49, %v3991_v55  ;;  %v2747_v9 = vor.u32 %v2746_v43, %v2743_v11  ;;  %v4479_v21 = vrot.slane %v2880_v62, 9  ;;  %v3132_v17 = vld [vmem:[#allocation2 + $0x9c] sm:$0xf]  ;;  %v680_v48 = vld [vmem:[#allocation2 + $0xa8] sm:$0xf] }
 0x131   : > { %2258 = vrot.lane.b32.xlu0 %v4442_v37, %s4733_s23  ;;  %v4471_v26 = vcombine.low %v2729_v44, %v2739_v33  ;;  %v2757_v4 = vor.u32 %v2756_v25, %v2752_v28  ;;  %v2762_v23 = vrot.slane %v2760_v41, 5  ;;  %v2946_v13 = vrot.slane %v2881_v8, 5  ;;  %v3133_v59 = vld [vmem:[#allocation2 + $0xa0] sm:$0xf]  ;;  %v3134_v0 = vld [vmem:[#allocation2 + $0xa4] sm:$0x1] }
 0x132   : > { %v3613_v5 = vpop.permute.xlu1 %3612  ;;  %v2748_v60 = vrot.slane %v2747_v9, 4  ;;  %v2949_v27 = vrot.slane %v2882_v56, 5  ;;  %v4480_v32 = vrot.slane %v2883_v14, 9  ;;  %v2953_v42 = vrot.slane %v2884_v53, 5  ;;  %v684_v3 = vld [vmem:[#allocation2 + $0xb0] sm:$0x1] }
 0x133   : > { %3636 = vst.msk [vmem:[#allocation3] sm:$0xff] %vm1834_vm5, %v3613_v5  ;;  %v3363_v15 = vpop.permute.xlu0 %3362  ;;  %2844 = vrot.lane.b32.xlu1 %v4471_v26, %s4729_s19  ;;  %v2758_v29 = vrot.slane %v2757_v4, 4  ;;  %v2947_v16 = vsel %vm4830_vm6, %v4479_v21, %v2946_v13  ;;  %v2948_v35 = vrot.slane %v2946_v13, 4  ;;  %v2956_v50 = vrot.slane %v2885_v40, 5  ;;  %v3404_v24 = vld [vmem:[#allocation2 + $0x9c] sm:$0xe] }
 0x134   : > { %3385 = vst.msk [vmem:[#allocation3 + $0x8] sm:$0xff] %vm1580_vm3, %v3363_v15  ;;  %v2753_v38 = vsel %vm4850_vm11, %v2748_v60, %v2752_v28  ;;  %v2954_v37 = vsel %vm4830_vm6, %v4480_v32, %v2953_v42  ;;  %v2955_v12 = vrot.slane %v2953_v42, 4  ;;  %v485_v54 = vshrl.u32 %v254_v45, 16  ;;  %v3405_v11 = vld [vmem:[#allocation2 + $0xa0] sm:$0xf] }
 0x135   : > { %4050 = vrot.lane.b32.xlu0 %v4550_v18, %s4733_s23  ;;  %v2763_v46 = vsel %vm4850_vm11, %v2758_v29, %v2762_v23  ;;  %v2950_v39 = vsel %vm4830_vm6, %v2948_v35, %v2949_v27  ;;  %v488_v61 = vshll.u32 %v254_v45, 16  ;;  %v493_v52 = vshrl.u32 %v255_v47, 16  ;;  %v256_v43 = vld [vmem:[%s4828_s17 + $0x70] sm:$0xf]  ;;  %v3406_v41 = vld [vmem:[#allocation2 + $0xa4] sm:$0x1] }
 0x136   : > { %v4472_v57 = vcombine.low %v2753_v38, %v2763_v46  ;;  %v4487_v58 = vcombine.low %v2947_v16, %v2950_v39  ;;  %v2957_v22 = vsel %vm4830_vm6, %v2955_v12, %v2956_v50  ;;  %v487_v62 = vrot.slane %v485_v54, 7  ;;  %v257_v18 = vld [vmem:[%s4828_s17 + $0x74] sm:$0xf]  ;;  %v5695_v29 = vld [vmem:[%s4828_s17 + $0x78] sm:$0xf] }
 0x137   : > { %v1728_v31 = vpop.permute.xlu0 %1727  ;;  %v2092_v30 = vpop.permute.xlu1 %2091  ;;  %v4488_v10 = vcombine.low %v2954_v37, %v2957_v22  ;;  %v495_v20 = vrot.slane %v493_v52, 7  ;;  %v496_v6 = vshll.u32 %v255_v47, 16  ;;  %v3241_v8 = vshrl.u32 %v3132_v17, 16  ;;  %v5698_v38 = vld [vmem:[%s4828_s17 + $0x7c] sm:$0xf] }
 0x138   : > { %1747 = vst.msk [vmem:[#allocation3 + $0x28] sm:$0xff] %vm1741_vm4, %v1728_v31  ;;  %2846 = vrot.lane.b32.xlu1 %v4472_v57, %s4729_s19  ;;  %v490_v2 = vor.u32 %v488_v61, %v487_v62  ;;  %v491_v56 = vrot.slane %v487_v62, 4  ;;  %v3244_v5 = vshll.u32 %v3132_v17, 16  ;;  %v3250_v19 = vshll.u32 %v3133_v59, 16  ;;  %v687_v39 = vld [vmem:[#allocation2 + $0xb4] sm:$0xf] }
 0x139   : > { %2112 = vst.msk [vmem:[#allocation3 + $0x20] sm:$0xff] %vm2107_vm7, %v2092_v30  ;;  %3004 = vrot.lane.b32.xlu0 %v4487_v58, %s4728_s18  ;;  %v498_v28 = vor.u32 %v496_v6, %v495_v20  ;;  %v500_v44 = vrot.slane %v495_v20, 4  ;;  %v3243_v55 = vrot.slane %v3241_v8, 4  ;;  %v3254_v25 = vshrl.u32 %v3133_v59, 16 }
 0x13a   : > { %v681_v14 = vsel %vm4844_vm10, %v490_v2, %v680_v48  ;;  %v3246_v53 = vrot.slane %v3244_v5, 5  ;;  %v3252_v15 = vrot.slane %v3250_v19, 5  ;;  %v3260_v33 = vshll.u32 %v3134_v0, 16 }
 0x13b   : > { %v3523_v49 = vpop.permute.xlu0 %3522  ;;  %v499_v9 = vsel %vm4862_vm12, %v491_v56, %v498_v28  ;;  %682 = vst [vmem:[#allocation2 + $0xa8] sm:$0xf] %v681_v14  ;;  %v3256_v21 = vrot.slane %v3254_v25, 4  ;;  %v685_v40 = vsel %vm4871_vm13, %v500_v44, %v684_v3  ;;  %v4511_v26 = vrot.slane %v3404_v24, 9 }
 0x13c   : > { %3545 = vst.msk [vmem:[#allocation3 + $0x8] sm:$0xff] %vm1741_vm4, %v3523_v49  ;;  %3006 = vrot.lane.b32.xlu1 %v4488_v10, %s4728_s18  ;;  %v3247_v4 = vor.u32 %v3246_v53, %v3243_v55  ;;  %v3262_v23 = vrot.slane %v3260_v33, 5  ;;  %686 = vst [vmem:[#allocation2 + $0xb0] sm:$0x1] %v685_v40  ;;  %v3470_v13 = vrot.slane %v3405_v11, 5  ;;  %v3473_v45 = vrot.slane %v3406_v41, 5 }
 0x13d   : > { %3096 = vrot.lane.b32.xlu0 %v4703_v7, %s4730_s20  ;;  %683 = vst.msk [vmem:[#allocation2 + $0xac] sm:$0xf] %vm172_vm0, %v499_v9  ;;  %v3257_v27 = vor.u32 %v3256_v21, %v3252_v15  ;;  %v502_v32 = vshrl.u32 %v256_v43, 16  ;;  %v505_v42 = vshll.u32 %v256_v43, 16  ;;  %v510_v47 = vshrl.u32 %v257_v18, 16  ;;  %v4715_v7 = vld [vmem:[#allocation2 + $0x90] sm:$0xff]  }
 0x13e   : > { %v3885_v60 = vpop.permute.xlu1 %3884  ;;  %v3248_v16 = vrot.slane %v3247_v4, 4  ;;  %v3472_v35 = vrot.slane %v3470_v13, 4  ;;  %v513_v50 = vshll.u32 %v257_v18, 16  ;;  %v3471_v12 = vsel %vm4830_vm6, %v4511_v26, %v3470_v13 }
 0x13f   : > { %3908 = vst.msk [vmem:[#allocation3] sm:$0xff] %vm2107_vm7, %v3885_v60  ;;  %v1821_v31 = vpop.permute.xlu0 %1820  ;;  %v3258_v37 = vrot.slane %v3257_v27, 4  ;;  %v504_v54 = vrot.slane %v502_v32, 7  ;;  %v5702_v17 = vrot.slane %v510_v47, 7  ;;  %v519_v52 = vshrl.u32 %v5695_v29, 16 }
 0x140   : > { %1840 = vst.msk [vmem:[#allocation3 + $0x28] sm:$0xff] %vm1834_vm5, %v1821_v31  ;;  %v3253_v30 = vsel %vm4850_vm11, %v3248_v16, %v3252_v15  ;;  %v3474_v46 = vsel %vm4830_vm6, %v3472_v35, %v3473_v45  ;;  %v522_v48 = vshll.u32 %v5695_v29, 16  ;;  %v527_v22 = vshrl.u32 %v5698_v38, 16  ;;  %v691_v32 = vld [vmem:[#allocation2 + $0xbc] sm:$0x1] }
 0x141   : > { %v3263_v59 = vsel %vm4850_vm11, %v3258_v37, %v3262_v23  ;;  %v507_v57 = vor.u32 %v505_v42, %v504_v54  ;;  %v508_v58 = vrot.slane %v504_v54, 4  ;;  %v515_v10 = vor.u32 %v513_v50, %v5702_v17 }
 0x142   : > { %v2253_v61 = vpop.permute.xlu1 %2252  ;;  %v4503_v62 = vcombine.low %v3253_v30, %v3263_v59  ;;  %v3135_v0 = vld [vmem:[#allocation2 + $0xa8] sm:$0xf]  ;;  %v4519_v24 = vcombine.low %v3471_v12, %v3474_v46  ;;  %v517_v26 = vrot.slane %v5702_v17, 4 }
 0x143   : > { %2273 = vst.msk [vmem:[#allocation3 + $0x20] sm:$0xff] %vm2268_vm8, %v2253_v61  ;;  %v3407_v3 = vld [vmem:[#allocation2 + $0xa8] sm:$0xe]  ;;  %v3265_v8 = vshrl.u32 %v3135_v0, 16  ;;  %v688_v49 = vsel %vm4844_vm10, %v507_v57, %v687_v39  ;;  %v3137_v2 = vld [vmem:[#allocation2 + $0xb0] sm:$0x1]  ;;  %v516_v41 = vsel %vm4862_vm12, %v508_v58, %v515_v10 }
 0x144   : > { %v4704_v20 = vld [vmem:[#allocation2 + $0xa8] sm:$0xff]   ;;  %3368 = vrot.lane.b32.xlu0 %v4503_v62, %s4734_s24  ;;  %v3268_v56 = vshll.u32 %v3135_v0, 16  ;;  %v4512_v11 = vrot.slane %v3407_v3, 9  ;;  %689 = vst [vmem:[#allocation2 + $0xb4] sm:$0xf] %v688_v49  ;;  %v3284_v44 = vshll.u32 %v3137_v2, 16  ;;  %v692_v49 = vsel %vm4871_vm13, %v517_v26, %v691_v32 }
 0x145   : > { %v3136_v6 = vld [vmem:[#allocation2 + $0xac] sm:$0xf]  ;;  %3098 = vrot.lane.b32.xlu1 %v4704_v20, %s4730_s20  ;;  %v3267_v28 = vrot.slane %v3265_v8, 4  ;;  %v3409_v25 = vld [vmem:[#allocation2 + $0xb0] sm:$0x1] }
 0x146   : > { %v3274_v5 = vshll.u32 %v3136_v6, 16  ;;  %v3278_v19 = vshrl.u32 %v3136_v6, 16  ;;  %v3615_v43 = vpop.permute.xlu0 %3614  ;;  %v3408_v55 = vld [vmem:[#allocation2 + $0xac] sm:$0xf]  ;;  %v4045_v14 = vpop.permute.xlu1 %4044  ;;  %v3270_v53 = vrot.slane %v3268_v56, 5  ;;  %v3286_v9 = vrot.slane %v3284_v44, 5 }
 0x147   : > { %3637 = vst.msk [vmem:[#allocation3 + $0x8] sm:$0xff] %vm1834_vm5, %v3615_v43  ;;  %v3477_v18 = vrot.slane %v3408_v55, 5  ;;  %v3480_v21 = vrot.slane %v3409_v25, 5  ;;  %v4705_v40 = vld [vmem:[#allocation2 + $0xa8] sm:$0xff]   ;;  %v3658_v47 = vld [vmem:[#allocation2 + $0xb0] sm:$0x1] }
 0x148   : > { %v3276_v15 = vrot.slane %v3274_v5, 5  ;;  %v3280_v33 = vrot.slane %v3278_v19, 4  ;;  %690 = vst.msk [vmem:[#allocation2 + $0xb8] sm:$0xf] %vm172_vm0, %v516_v41  ;;  %v3271_v4 = vor.u32 %v3270_v53, %v3267_v28  ;;  %3528 = vrot.lane.b32.xlu0 %v4519_v24, %s4732_s22  ;;  %v3656_v60 = vld [vmem:[#allocation2 + $0xa8] sm:$0xf] }
 0x149   : > { %4068 = vst.msk [vmem:[#allocation3] sm:$0xff] %vm2268_vm8, %v4045_v14  ;;  %v5729_v13 = vsel %vm4830_vm6, %v4512_v11, %v3477_v18  ;;  %v3479_v45 = vrot.slane %v3477_v18, 4  ;;  %v3657_v27 = vld [vmem:[#allocation2 + $0xac] sm:$0xf]  ;;  %v3765_v16 = vshrl.u32 %v3656_v60, 16  ;;  %v3768_v35 = vshll.u32 %v3656_v60, 16 }
 0x14a   : > { %v3281_v23 = vor.u32 %v3280_v33, %v3276_v15  ;;  %v2281_v42 = vld [vmem:[#allocation3 + $0x20] sm:$0xff]  ;;  %v3774_v50 = vshll.u32 %v3657_v27, 16  ;;  %v3778_v31 = vshrl.u32 %v3657_v27, 16  ;;  %v3272_v12 = vrot.slane %v3271_v4, 4  ;;  %v3928_v46 = vld [vmem:[#allocation2 + $0xa8] sm:$0xe]  ;;  %v2255_v39 = vpop.permute.xlu1 %2254 }
 0x14b   : > { %v2094_v37 = vpop.permute.xlu0 %2093  ;;  %4619 = vmatprep.mubr.msk.bf16.mxu0 %vm2300_vm9, %v2281_v42  ;;  %2592 = vst.msk [vmem:[#allocation3 + $0x20] sm:$0xff] %vm774_vm14, %v4715_v7  ;;  %v3481_v17 = vsel %vm4830_vm6, %v3479_v45, %v3480_v21  ;;  %v3784_v30 = vshll.u32 %v3658_v47, 16  ;;  %v3767_v59 = vrot.slane %v3765_v16, 4  ;;  %v3770_v57 = vrot.slane %v3768_v35, 5  ;;  %v3659_v20 = vld [vmem:[#allocation2 + $0xb4] sm:$0xf] }
 0x14c   : > { %v3282_v54 = vrot.slane %v3281_v23, 4  ;;  %2113 = vst.msk [vmem:[#allocation3 + $0x28] sm:$0xff] %vm2107_vm7, %v2094_v37  ;;  %v4520_v61 = vcombine.low %v5729_v13, %v3481_v17  ;;  %v3776_v58 = vrot.slane %v3774_v50, 5  ;;  %v3277_v62 = vsel %vm4850_vm11, %v3272_v12, %v3276_v15  ;;  %3620 = vrot.lane.b32.xlu0 %v4705_v40, %s4731_s21  ;;  %v3929_v6 = vld [vmem:[#allocation2 + $0xac] sm:$0xf]  ;;  %v4716_v13 = vld [vmem:[#allocation2 + $0x9c] sm:$0xff]  }
 0x14d   : > { %2274 = vst.msk [vmem:[#allocation3 + $0x28] sm:$0xff] %vm2268_vm8, %v2255_v39  ;;  %v3780_v3 = vrot.slane %v3778_v31, 4  ;;  %v3786_v10 = vrot.slane %v3784_v30, 5  ;;  %v3771_v24 = vor.u32 %v3770_v57, %v3767_v59  ;;  %v3789_v2 = vshrl.u32 %v3659_v20, 16  ;;  %693 = vst [vmem:[#allocation2 + $0xbc] sm:$0x1] %v692_v49 }
 0x14e   : > { %v3287_v0 = vsel %vm4850_vm11, %v3282_v54, %v3286_v9  ;;  %v3792_v5 = vshll.u32 %v3659_v20, 16  ;;  %v3930_v43 = vld [vmem:[#allocation2 + $0xb0] sm:$0x1]  ;;  %v4543_v55 = vrot.slane %v3928_v46, 9  ;;  %v3994_v25 = vrot.slane %v3929_v6, 5 }
 0x14f   : > { %v4504_v8 = vcombine.low %v3277_v62, %v3287_v0  ;;  %v3660_v7 = vld [vmem:[#allocation2 + $0xb8] sm:$0xf]  ;;  %v3781_v56 = vor.u32 %v3780_v3, %v3776_v58  ;;  %v3772_v28 = vrot.slane %v3771_v24, 4  ;;  %v3791_v44 = vrot.slane %v3789_v2, 4  ;;  %v2614_v41 = vld [vmem:[#allocation2 + $0xa8] sm:$0xf] }
 0x150   : > { %v3798_v19 = vshll.u32 %v3660_v7, 16  ;;  %v3802_v11 = vshrl.u32 %v3660_v7, 16  ;;  %v3794_v15 = vrot.slane %v3792_v5, 5  ;;  %v2615_v9 = vld [vmem:[#allocation2 + $0xac] sm:$0xf]  ;;  %v4706_v21 = vld [vmem:[#allocation2 + $0xb4] sm:$0xff]   ;;  %v3995_v26 = vsel %vm4830_vm6, %v4543_v55, %v3994_v25 }
 0x151   : > { %3370 = vrot.lane.b32.xlu1 %v4504_v8, %s4734_s24  ;;  %v3782_v53 = vrot.slane %v3781_v56, 4  ;;  %v3777_v40 = vsel %vm4850_vm11, %v3772_v28, %v3776_v58  ;;  %v3996_v4 = vrot.slane %v3994_v25, 4  ;;  %v3997_v23 = vrot.slane %v3930_v43, 5  ;;  %v2616_v32 = vld [vmem:[#allocation2 + $0xb0] sm:$0x1]  ;;  %v4076_v35 = vld [vmem:[#allocation3] sm:$0xff] }
 0x152   : > { %v3887_v14 = vpop.permute.xlu0 %3886  ;;  %v5746_v33 = vrot.slane %v3798_v19, 5  ;;  %v3804_v18 = vrot.slane %v3802_v11, 4  ;;  %v3795_v60 = vor.u32 %v3794_v15, %v3791_v44  ;;  %v2765_v42 = vshrl.u32 %v2614_v41, 16  ;;  %v3931_v47 = vld [vmem:[#allocation2 + $0xb4] sm:$0xe]  ;;  %4633 = vmatprep.mubr.msk.bf16.mxu1 %vm2300_vm9, %v4076_v35 }
 0x153   : > { %3909 = vst.msk [vmem:[#allocation3 + $0x8] sm:$0xff] %vm2107_vm7, %v3887_v14  ;;  %v3787_v45 = vsel %vm4850_vm11, %v3782_v53, %v3786_v10  ;;  %v4047_v16 = vpop.permute.xlu1 %4046  ;;  %v3998_v31 = vsel %vm4830_vm6, %v3996_v4, %v3997_v23  ;;  %v2768_v37 = vshll.u32 %v2614_v41, 16  ;;  %v2774_v12 = vshll.u32 %v2615_v9, 16  ;;  %v3932_v54 = vld [vmem:[#allocation2 + $0xb8] sm:$0xf] }
 0x154   : > { %v3805_v27 = vor.u32 %v3804_v18, %v5746_v33  ;;  %v4535_v50 = vcombine.low %v3777_v40, %v3787_v45  ;;  %v2617_v17 = vld [vmem:[#allocation2 + $0xb4] sm:$0xf]  ;;  %4069 = vst.msk [vmem:[#allocation3 + $0x8] sm:$0xff] %vm2268_vm8, %v4047_v16  ;;  %v3796_v30 = vrot.slane %v3795_v60, 4  ;;  %v4551_v39 = vcombine.low %v3995_v26, %v3998_v31  ;;  %v2618_v57 = vld [vmem:[#allocation2 + $0xb8] sm:$0xf] }
 0x155   : > { %3530 = vrot.lane.b32.xlu1 %v4520_v61, %s4732_s22  ;;  %v2767_v59 = vrot.slane %v2765_v42, 4  ;;  %v2282_v62 = vld [vmem:[#allocation3 + $0x28] sm:$0xff]  ;;  %v3661_v61 = vld [vmem:[#allocation2 + $0xbc] sm:$0x1]  ;;  %v2770_v0 = vrot.slane %v2768_v37, 5  ;;  %v2776_v3 = vrot.slane %v2774_v12, 5 }
 0x156   : > { %v3806_v46 = vrot.slane %v3805_v27, 4  ;;  %v1039_v58 = vpop.permute.xlu0 %1038  ;;  %3892 = vrot.lane.b32.xlu0 %v4535_v50, %s4735_s25  ;;  %v2778_v10 = vshrl.u32 %v2615_v9, 16  ;;  %v2784_v20 = vshll.u32 %v2616_v32, 16  ;;  %4620 = vmatmul.mubr.msk.bf16.gmra.mrb[8].mxu0 %vm2300_vm9, %v2282_v62  ;;  %2593 = vst.msk [vmem:[#allocation3 + $0x28] sm:$0xff] %vm774_vm14, %v4716_v13  ;;  %v3801_v6 = vsel %vm4850_vm11, %v3796_v30, %v5746_v33  ;;  %v3933_v24 = vld [vmem:[#allocation2 + $0xbc] sm:$0x1] }
 0x157   : > { %1057 = vst.msk [vmem:[#allocation3 + $0x30] sm:$0xff] %vm1050_vm15, %v1039_v58  ;;  %v3808_v8 = vshll.u32 %v3661_v61, 16  ;;  %v4544_v49 = vrot.slane %v3931_v47, 9  ;;  %v4001_v7 = vrot.slane %v3932_v54, 5  ;;  %v2771_v2 = vor.u32 %v2770_v0, %v2767_v59  ;;  %v2886_v55 = vld [vmem:[#allocation2 + $0xa8] sm:$0xe] }
 0x158   : > { %v2780_v56 = vrot.slane %v2778_v10, 4  ;;  %v2786_v5 = vrot.slane %v2784_v20, 5  ;;  %v4004_v19 = vrot.slane %v3933_v24, 5  ;;  %v2789_v44 = vshrl.u32 %v2617_v17, 16  ;;  %v2887_v25 = vld [vmem:[#allocation2 + $0xac] sm:$0xf] }
 0x159   : > { %3622 = vrot.lane.b32.xlu1 %v4706_v21, %s4731_s21  ;;  %v3810_v11 = vrot.slane %v3808_v8, 5  ;;  %v4002_v43 = vsel %vm4830_vm6, %v4544_v49, %v4001_v7  ;;  %v4003_v28 = vrot.slane %v4001_v7, 4  ;;  %v2772_v41 = vrot.slane %v2771_v2, 4  ;;  %v2619_v53 = vld [vmem:[#allocation2 + $0xbc] sm:$0x1] }
 0x15a   : > { %4052 = vrot.lane.b32.xlu0 %v4551_v39, %s4733_s23  ;;  %v2781_v14 = vor.u32 %v2780_v56, %v2776_v3  ;;  %v2792_v15 = vshll.u32 %v2617_v17, 16  ;;  %v2798_v33 = vshll.u32 %v2618_v57, 16  ;;  %v2791_v40 = vrot.slane %v2789_v44, 4  ;;  %v2888_v4 = vld [vmem:[#allocation2 + $0xb0] sm:$0x1] }
 0x15b   : > { %v2841_v18 = vpop.permute.xlu0 %2840  ;;  %v3811_v9 = vsel %vm4850_vm11, %v3806_v46, %v3810_v11  ;;  %v4005_v21 = vsel %vm4830_vm6, %v4003_v28, %v4004_v19  ;;  %v2802_v26 = vshrl.u32 %v2618_v57, 16  ;;  %v2889_v23 = vld [vmem:[#allocation2 + $0xb4] sm:$0xe]  ;;  %v2777_v45 = vsel %vm4850_vm11, %v2772_v41, %v2776_v3  ;;  %v4077_v42 = vld [vmem:[#allocation3 + $0x8] sm:$0xff]  ;;  %v2890_v31 = vld [vmem:[#allocation2 + $0xb8] sm:$0xf] }
 0x15c   : > { %2862 = vst.msk [vmem:[#allocation3 + $0x10] sm:$0xff] %vm1050_vm15, %v2841_v18  ;;  %v4536_v13 = vcombine.low %v3801_v6, %v3811_v9  ;;  %v2782_v60 = vrot.slane %v2781_v14, 4  ;;  %v4552_v27 = vcombine.low %v4002_v43, %v4005_v21  ;;  %v2794_v47 = vrot.slane %v2792_v15, 5  ;;  %4634 = vmatmul.mubr.msk.bf16.vlgmr.msra.gmra.mrb[0].mxu1 %vm2300_vm9, %v4077_v42  ;;  %v2891_v30 = vld [vmem:[#allocation2 + $0xbc] sm:$0x1]  ;;  %v4707_v14 = vld [vmem:[#allocation2 + $0xb4] sm:$0xff]  }
 0x15d   : > { %v1203_v32 = vpop.permute.xlu1 %1202  ;;  %v2800_v16 = vrot.slane %v2798_v33, 5  ;;  %v2804_v35 = vrot.slane %v2802_v26, 4  ;;  %v2808_v50 = vshll.u32 %v2619_v53, 16  ;;  %v4481_v12 = vrot.slane %v2886_v55, 9  ;;  %v694_v10 = vld [vmem:[#allocation2 + $0xc0] sm:$0xf] }
 0x15e   : > { %1221 = vst.msk [vmem:[#allocation3 + $0x30] sm:$0xff] %vm1214_vm1, %v1203_v32  ;;  %3894 = vrot.lane.b32.xlu1 %v4536_v13, %s4735_s25  ;;  %v2787_v37 = vsel %vm4850_vm11, %v2782_v60, %v2786_v5  ;;  %4054 = vrot.lane.b32.xlu0 %v4552_v27, %s4733_s23  ;;  %v2960_v54 = vrot.slane %v2887_v25, 5  ;;  %v2963_v17 = vrot.slane %v2888_v4, 5  ;;  %v2795_v39 = vor.u32 %v2794_v47, %v2791_v40  ;;  %v3138_v49 = vld [vmem:[#allocation2 + $0xb4] sm:$0xf] }
 0x15f   : > { %v4473_v46 = vcombine.low %v2777_v45, %v2787_v37  ;;  %v2805_v59 = vor.u32 %v2804_v35, %v2800_v16  ;;  %v2810_v57 = vrot.slane %v2808_v50, 5  ;;  %v1041_v58 = vpop.permute.xlu0 %1040  ;;  %v4482_v0 = vrot.slane %v2889_v23, 9  ;;  %v698_v19 = vld [vmem:[#allocation2 + $0xc8] sm:$0x1]  ;;  %v3139_v44 = vld [vmem:[#allocation2 + $0xb8] sm:$0xf] }
 0x160   : > { %v2961_v62 = vsel %vm4830_vm6, %v4481_v12, %v2960_v54  ;;  %v2962_v61 = vrot.slane %v2960_v54, 4  ;;  %v2967_v3 = vrot.slane %v2890_v31, 5  ;;  %1058 = vst.msk [vmem:[#allocation3 + $0x38] sm:$0xff] %vm1050_vm15, %v1041_v58  ;;  %v2796_v20 = vrot.slane %v2795_v39, 4  ;;  %v3140_v15 = vld [vmem:[#allocation2 + $0xbc] sm:$0x1] }
 0x161   : > { %v2806_v6 = vrot.slane %v2805_v59, 4  ;;  %v2970_v8 = vrot.slane %v2891_v30, 5  ;;  %v521_v24 = vrot.slane %v519_v52, 7  ;;  %v529_v5 = vrot.slane %v527_v22, 7  ;;  %v5806_v33 = vld [vmem:[#allocation2 + $0xcc] sm:$0xf] }
 0x162   : > { %2848 = vrot.lane.b32.xlu1 %v4473_v46, %s4729_s19  ;;  %v2964_v7 = vsel %vm4830_vm6, %v2962_v61, %v2963_v17  ;;  %v2968_v2 = vsel %vm4830_vm6, %v4482_v0, %v2967_v3  ;;  %v2969_v56 = vrot.slane %v2967_v3, 4  ;;  %v2801_v11 = vsel %vm4850_vm11, %v2796_v20, %v2800_v16  ;;  %v3410_v40 = vld [vmem:[#allocation2 + $0xb4] sm:$0xe]  ;;  %v3411_v26 = vld [vmem:[#allocation2 + $0xb8] sm:$0xf] }
 0x163   : > { %v2811_v52 = vsel %vm4850_vm11, %v2806_v6, %v2810_v57  ;;  %v4489_v43 = vcombine.low %v2961_v62, %v2964_v7  ;;  %v524_v28 = vor.u32 %v522_v48, %v521_v24  ;;  %v3001_v55 = vpop.permute.xlu1 %3000  ;;  %v525_v53 = vrot.slane %v521_v24, 4  ;;  %v3412_v45 = vld [vmem:[#allocation2 + $0xbc] sm:$0x1] }
 0x164   : > { %v4474_v25 = vcombine.low %v2801_v11, %v2811_v52  ;;  %v2971_v41 = vsel %vm4830_vm6, %v2969_v56, %v2970_v8  ;;  %v530_v22 = vshll.u32 %v5698_v38, 16  ;;  %3022 = vst.msk [vmem:[#allocation3 + $0x10] sm:$0xff] %vm1214_vm1, %v3001_v55  ;;  %v534_v48 = vrot.slane %v529_v5, 4 }
 0x165   : > { %v2843_v18 = vpop.permute.xlu0 %2842  ;;  %3008 = vrot.lane.b32.xlu0 %v4489_v43, %s4728_s18  ;;  %v4490_v29 = vcombine.low %v2968_v2, %v2971_v41  ;;  %v695_v9 = vsel %vm4844_vm10, %v524_v28, %v694_v10  ;;  %v3289_v21 = vshrl.u32 %v3138_v49, 16  ;;  %v3292_v4 = vshll.u32 %v3138_v49, 16 }
 0x166   : > { %2863 = vst.msk [vmem:[#allocation3 + $0x18] sm:$0xff] %vm1050_vm15, %v2843_v18  ;;  %2850 = vrot.lane.b32.xlu1 %v4474_v25, %s4729_s19  ;;  %v532_v38 = vor.u32 %v530_v22, %v529_v5  ;;  %696 = vst [vmem:[#allocation2 + $0xc0] sm:$0xf] %v695_v9  ;;  %v3298_v23 = vshll.u32 %v3139_v44, 16  ;;  %v3302_v13 = vshrl.u32 %v3139_v44, 16  ;;  %v3308_v27 = vshll.u32 %v3140_v15, 16 }
 0x167   : > { %v3291_v60 = vrot.slane %v3289_v21, 4  ;;  %v699_v32 = vsel %vm4871_vm13, %v534_v48, %v698_v19  ;;  %v1296_v34 = vpop.permute.xlu1 %1295  ;;  %v3294_v47 = vrot.slane %v3292_v4, 5  ;;  %v4513_v31 = vrot.slane %v3410_v40, 9 }
 0x168   : > { %v533_v42 = vsel %vm4862_vm12, %v525_v53, %v532_v38  ;;  %v3300_v16 = vrot.slane %v3298_v23, 5  ;;  %v3304_v35 = vrot.slane %v3302_v13, 4  ;;  %700 = vst [vmem:[#allocation2 + $0xc8] sm:$0x1] %v699_v32  ;;  %1314 = vst.msk [vmem:[#allocation3 + $0x30] sm:$0xff] %vm1307_vm2, %v1296_v34  ;;  %v3484_v37 = vrot.slane %v3411_v26, 5 }
 0x169   : > { %v1205_v50 = vpop.permute.xlu0 %1204  ;;  %3100 = vrot.lane.b32.xlu0 %v4707_v14, %s4730_s20  ;;  %697 = vst.msk [vmem:[#allocation2 + $0xc4] sm:$0xf] %vm172_vm0, %v533_v42  ;;  %v3487_v12 = vrot.slane %v3412_v45, 5  ;;  %v3837_v54 = vshrl.u32 %v5806_v33, 16  ;;  %v3295_v51 = vor.u32 %v3294_v47, %v3291_v60  ;;  %v3310_v30 = vrot.slane %v3308_v27, 5 }
 0x16a   : > { %1222 = vst.msk [vmem:[#allocation3 + $0x38] sm:$0xff] %vm1214_vm1, %v1205_v50  ;;  %3010 = vrot.lane.b32.xlu1 %v4490_v29, %s4728_s18  ;;  %v3305_v17 = vor.u32 %v3304_v35, %v3300_v16  ;;  %v3486_v46 = vrot.slane %v3484_v37, 4  ;;  %v3840_v39 = vshll.u32 %v5806_v33, 16  ;;  %v3846_v61 = vshll.u32 %v5821_v63, 16  ;;  %v3667_v35 = vld [vmem:[#allocation2 + $0xd4] sm:$0x1] }
 0x16b   : > { %v3093_v59 = vpop.permute.xlu1 %3092  ;;  %v3296_v57 = vrot.slane %v3295_v51, 4  ;;  %v5827_v62 = vrot.slane %v3837_v54, 4  ;;  %v3485_v10 = vsel %vm4830_vm6, %v4513_v31, %v3484_v37  ;;  %v3850_v52 = vshrl.u32 %v5821_v63, 16 }
 0x16c   : > { %v3306_v58 = vrot.slane %v3305_v17, 4  ;;  %3114 = vst.msk [vmem:[#allocation3 + $0x10] sm:$0xff] %vm1307_vm2, %v3093_v59  ;;  %v3488_v20 = vsel %vm4830_vm6, %v3486_v46, %v3487_v12  ;;  %v3842_v9 = vrot.slane %v3840_v39, 5  ;;  %v3848_v12 = vrot.slane %v3846_v61, 5 }
 0x16d   : > { %v3003_v0 = vpop.permute.xlu0 %3002  ;;  %v3141_v3 = vld [vmem:[#allocation2 + $0xc0] sm:$0xf]  ;;  %v3301_v8 = vsel %vm4850_vm11, %v3296_v57, %v3300_v16  ;;  %v4521_v25 = vcombine.low %v3485_v10, %v3488_v20  ;;  %v3856_v20 = vshll.u32 %v3667_v35, 16  ;;  %vm2426_vm0 = vcmask 64512  }
 0x16e   : > { %v3413_v6 = vld [vmem:[#allocation2 + $0xc0] sm:$0xe]  ;;  %3023 = vst.msk [vmem:[#allocation3 + $0x18] sm:$0xff] %vm1214_vm1, %v3003_v0  ;;  %v3311_v24 = vsel %vm4850_vm11, %v3306_v58, %v3310_v30  ;;  %v3313_v49 = vshrl.u32 %v3141_v3, 16  ;;  %v3316_v7 = vshll.u32 %v3141_v3, 16  ;;  %v3843_v37 = vor.u32 %v3842_v9, %v5827_v62 }
 0x16f   : > { %v3662_v2 = vld [vmem:[#allocation2 + $0xc0] sm:$0xf]  ;;  %v4505_v56 = vcombine.low %v3301_v8, %v3311_v24  ;;  %v3143_v5 = vld [vmem:[#allocation2 + $0xc8] sm:$0x1]  ;;  %v1569_v43 = vpop.permute.xlu1 %1568  ;;  %v4514_v18 = vrot.slane %v3413_v6, 9  ;;  %v3852_v0 = vrot.slane %v3850_v52, 4 }
 0x170   : > { %v3415_v19 = vld [vmem:[#allocation2 + $0xc8] sm:$0x1]  ;;  %v3813_v11 = vshrl.u32 %v3662_v2, 16  ;;  %v4708_v28 = vld [vmem:[#allocation2 + $0xc0] sm:$0xff]   ;;  %v3315_v55 = vrot.slane %v3313_v49, 4  ;;  %1587 = vst.msk [vmem:[#allocation3 + $0x30] sm:$0xff] %vm1580_vm3, %v1569_v43 }
 0x171   : > { %v3142_v44 = vld [vmem:[#allocation2 + $0xc4] sm:$0xf]  ;;  %v1298_v41 = vpop.permute.xlu0 %1297  ;;  %3372 = vrot.lane.b32.xlu0 %v4505_v56, %s4734_s24  ;;  %v3318_v14 = vrot.slane %v3316_v7, 5  ;;  %v3332_v15 = vshll.u32 %v3143_v5, 16  ;;  %3102 = vrot.lane.b32.xlu1 %v4708_v28, %s4730_s20  ;;  %v3494_v48 = vrot.slane %v3415_v19, 5  ;;  %v3816_v60 = vshll.u32 %v3662_v2, 16 }
 0x172   : > { %v3322_v53 = vshll.u32 %v3142_v44, 16  ;;  %v3326_v22 = vshrl.u32 %v3142_v44, 16  ;;  %v3414_v33 = vld [vmem:[#allocation2 + $0xc4] sm:$0xf]  ;;  %1315 = vst.msk [vmem:[#allocation3 + $0x38] sm:$0xff] %vm1307_vm2, %v1298_v41  ;;  %v3815_v4 = vrot.slane %v3813_v11, 4  ;;  %v3853_v49 = vor.u32 %v3852_v0, %v3848_v12 }
 0x173   : > { %v3491_v29 = vrot.slane %v3414_v33, 5  ;;  %v3319_v21 = vor.u32 %v3318_v14, %v3315_v55  ;;  %v3663_v38 = vld [vmem:[#allocation2 + $0xc4] sm:$0xf]  ;;  %v3334_v23 = vrot.slane %v3332_v15, 5  ;;  %v3664_v45 = vld [vmem:[#allocation2 + $0xc8] sm:$0x1] }
 0x174   : > { %v3324_v40 = vrot.slane %v3322_v53, 5  ;;  %v3328_v26 = vrot.slane %v3326_v22, 4  ;;  %v3822_v27 = vshll.u32 %v3663_v38, 16  ;;  %v4711_v42 = vld [vmem:[#allocation2 + $0xc0] sm:$0xff]   ;;  %v3826_v47 = vshrl.u32 %v3663_v38, 16 }
 0x175   : > { %v3493_v13 = vrot.slane %v3491_v29, 4  ;;  %v3320_v32 = vrot.slane %v3319_v21, 4  ;;  %3532 = vrot.lane.b32.xlu0 %v4521_v25, %s4732_s22  ;;  %v3832_v16 = vshll.u32 %v3664_v45, 16  ;;  %v3818_v50 = vrot.slane %v3816_v60, 5  ;;  %v3934_v63 = vld [vmem:[#allocation2 + $0xc0] sm:$0xe] }
 0x176   : > { %v3329_v34 = vor.u32 %v3328_v26, %v3324_v40  ;;  %v3824_v31 = vrot.slane %v3822_v27, 5  ;;  %v3492_v17 = vsel %vm4830_vm6, %v4514_v18, %v3491_v29  ;;  %v3828_v30 = vrot.slane %v3826_v47, 4  ;;  %v3935_v46 = vld [vmem:[#allocation2 + $0xc4] sm:$0xf]  ;;  %v3095_v39 = vpop.permute.xlu0 %3094  ;;  %v3936_v3 = vld [vmem:[#allocation2 + $0xc8] sm:$0x1] }
 0x177   : > { %v3325_v54 = vsel %vm4850_vm11, %v3320_v32, %v3324_v40  ;;  %v3495_v59 = vsel %vm4830_vm6, %v3493_v13, %v3494_v48  ;;  %v3819_v57 = vor.u32 %v3818_v50, %v3815_v4  ;;  %v3834_v58 = vrot.slane %v3832_v16, 5  ;;  %3115 = vst.msk [vmem:[#allocation3 + $0x18] sm:$0xff] %vm1307_vm2, %v3095_v39  ;;  %v3938_v2 = vld [vmem:[#allocation2 + $0xd0] sm:$0xf]  ;;  %v3937_v33 = vld [vmem:[#allocation2 + $0xcc] sm:$0xe] }
 0x178   : > { %v3330_v51 = vrot.slane %v3329_v34, 4  ;;  %v3365_v62 = vpop.permute.xlu1 %3364  ;;  %v3829_v10 = vor.u32 %v3828_v30, %v3824_v31  ;;  %v4545_v6 = vrot.slane %v3934_v63, 9  ;;  %v4008_v7 = vrot.slane %v3935_v46, 5  ;;  %v3939_v18 = vld [vmem:[#allocation2 + $0xd4] sm:$0x1]  ;;  %v4712_v29 = vld [vmem:[#allocation2 + $0xcc] sm:$0xff]  }
 0x179   : > { %3624 = vrot.lane.b32.xlu0 %v4711_v42, %s4731_s21  ;;  %3386 = vst.msk [vmem:[#allocation3 + $0x10] sm:$0xff] %vm1580_vm3, %v3365_v62  ;;  %v3820_v24 = vrot.slane %v3819_v57, 4  ;;  %v3844_v5 = vrot.slane %v3843_v37, 4  ;;  %v4011_v19 = vrot.slane %v3936_v3, 5  ;;  %v4522_v52 = vcombine.low %v3492_v17, %v3495_v59  ;;  %v4718_v39 = vld [vmem:[#allocation2 + $0xb4] sm:$0xff]  }
 0x17a   : > { %v3335_v61 = vsel %vm4850_vm11, %v3330_v51, %v3334_v23  ;;  %v3830_v56 = vrot.slane %v3829_v10, 4  ;;  %v3858_v28 = vrot.slane %v3856_v20, 5  ;;  %v4010_v44 = vrot.slane %v4008_v7, 4 }
 0x17b   : > { %v4506_v8 = vcombine.low %v3325_v54, %v3335_v61  ;;  %v1571_v11 = vpop.permute.xlu0 %1570  ;;  %v3825_v43 = vsel %vm4850_vm11, %v3820_v24, %v3824_v31  ;;  %v3854_v41 = vrot.slane %v3853_v49, 4  ;;  %v4009_v14 = vsel %vm4830_vm6, %v4545_v6, %v4008_v7 }
 0x17c   : > { %1588 = vst.msk [vmem:[#allocation3 + $0x38] sm:$0xff] %vm1580_vm3, %v1571_v11  ;;  %v1730_v55 = vpop.permute.xlu1 %1729  ;;  %v3835_v25 = vsel %vm4850_vm11, %v3830_v56, %v3834_v58  ;;  %v4015_v53 = vrot.slane %v3938_v2, 5  ;;  %v4012_v15 = vsel %vm4830_vm6, %v4010_v44, %v4011_v19  ;;  %v3849_v48 = vsel %vm4850_vm11, %v3844_v5, %v3848_v12  ;;  %v4717_v12 = vld [vmem:[#allocation2 + $0xa8] sm:$0xff]  }
 0x17d   : > { %3374 = vrot.lane.b32.xlu1 %v4506_v8, %s4734_s24  ;;  %1748 = vst.msk [vmem:[#allocation3 + $0x30] sm:$0xff] %vm1741_vm4, %v1730_v55  ;;  %v4537_v22 = vcombine.low %v3825_v43, %v3835_v25  ;;  %v4553_v9 = vcombine.low %v4009_v14, %v4012_v15  ;;  %v3859_v40 = vsel %vm4850_vm11, %v3854_v41, %v3858_v28  ;;  %v4546_v26 = vrot.slane %v3937_v33, 9 }
 0x17e   : > { %v4017_v38 = vrot.slane %v4015_v53, 4  ;;  %v4018_v4 = vrot.slane %v3939_v18, 5  ;;  %v4538_v23 = vcombine.low %v3849_v48, %v3859_v40 }
 0x17f   : > { %3896 = vrot.lane.b32.xlu0 %v4537_v22, %s4735_s25  ;;  %v4016_v60 = vsel %vm4830_vm6, %v4546_v26, %v4015_v53 }
 0x180   : > { %v3525_v21 = vpop.permute.xlu1 %3524  ;;  %v4019_v27 = vsel %vm4830_vm6, %v4017_v38, %v4018_v4  ;;  %v5939_v38 = vld [vmem:[%s6013_s2] ss:$0 sm:$0xff]  ;;  %vm2516_vm6 = vcmask 60416  }
 0x181   : > { %3534 = vrot.lane.b32.xlu1 %v4522_v52, %s4732_s22  ;;  %3546 = vst.msk [vmem:[#allocation3 + $0x10] sm:$0xff] %vm1741_vm4, %v3525_v21  ;;  %v4554_v36 = vcombine.low %v4016_v60, %v4019_v27 }
 0x183   : > { %4056 = vrot.lane.b32.xlu0 %v4553_v9, %s4733_s23 }
 0x184   : > { %v3367_v13 = vpop.permute.xlu0 %3366  ;;  %v1823_v45 = vpop.permute.xlu1 %1822 }
 0x185   : > { %3626 = vrot.lane.b32.xlu1 %v4712_v29, %s4731_s21  ;;  %3387 = vst.msk [vmem:[#allocation3 + $0x18] sm:$0xff] %vm1580_vm3, %v3367_v13 }
 0x186   : > { %1841 = vst.msk [vmem:[#allocation3 + $0x30] sm:$0xff] %vm1834_vm5, %v1823_v45 }
 0x188   : > { %v1732_v32 = vpop.permute.xlu0 %1731  ;;  %v3617_v34 = vpop.permute.xlu1 %3616 }
 0x189   : > { %3898 = vrot.lane.b32.xlu1 %v4538_v23, %s4735_s25  ;;  %1749 = vst.msk [vmem:[#allocation3 + $0x38] sm:$0xff] %vm1741_vm4, %v1732_v32 }
 0x18a   : > { %3638 = vst.msk [vmem:[#allocation3 + $0x10] sm:$0xff] %vm1834_vm5, %v3617_v34 }
 0x18c   : > { %v3527_v42 = vpop.permute.xlu0 %3526  ;;  %v2096_v47 = vpop.permute.xlu1 %2095 }
 0x18d   : > { %4058 = vrot.lane.b32.xlu1 %v4554_v36, %s4733_s23  ;;  %3547 = vst.msk [vmem:[#allocation3 + $0x18] sm:$0xff] %vm1741_vm4, %v3527_v42 }
 0x18e   : > { %2114 = vst.msk [vmem:[#allocation3 + $0x30] sm:$0xff] %vm2107_vm7, %v2096_v47 }
 0x190   : > { %v1825_v1 = vpop.permute.xlu0 %1824 }
 0x191   : > { %1842 = vst.msk [vmem:[#allocation3 + $0x38] sm:$0xff] %vm1834_vm5, %v1825_v1 }
 0x192   : > { %v3889_v16 = vpop.permute.xlu1 %3888 }
 0x193   : > { %3910 = vst.msk [vmem:[#allocation3 + $0x10] sm:$0xff] %vm2107_vm7, %v3889_v16 }
 0x194   : > { %v3619_v35 = vpop.permute.xlu0 %3618 }
 0x195   : > { %3639 = vst.msk [vmem:[#allocation3 + $0x18] sm:$0xff] %vm1834_vm5, %v3619_v35 }
 0x196   : > { %v2257_v50 = vpop.permute.xlu1 %2256 }
 0x197   : > { %2275 = vst.msk [vmem:[#allocation3 + $0x30] sm:$0xff] %vm2268_vm8, %v2257_v50 }
 0x198   : > { %v2098_v31 = vpop.permute.xlu0 %2097 }
 0x199   : > { %2115 = vst.msk [vmem:[#allocation3 + $0x38] sm:$0xff] %vm2107_vm7, %v2098_v31 }
 0x19a   : > { %v4049_v37 = vpop.permute.xlu1 %4048 }
 0x19b   : > { %4070 = vst.msk [vmem:[#allocation3 + $0x10] sm:$0xff] %vm2268_vm8, %v4049_v37 }
 0x19e   : > { %v2283_v63 = vld [vmem:[#allocation3 + $0x30] sm:$0xff] }
 0x19f   : > { %v3891_v54 = vpop.permute.xlu0 %3890  ;;  %4623 = vmatprep.mubr.msk.bf16.mxu0 %vm2300_vm9, %v2283_v63  ;;  %2594 = vst.msk [vmem:[#allocation3 + $0x30] sm:$0xff] %vm774_vm14, %v4717_v12 }
 0x1a0   : > { %3911 = vst.msk [vmem:[#allocation3 + $0x18] sm:$0xff] %vm2107_vm7, %v3891_v54 }
 0x1a2   : > { %v4078_v17 = vld [vmem:[#allocation3 + $0x10] sm:$0xff] }
 0x1a3   : > { %v2259_v51 = vpop.permute.xlu0 %2258  ;;  %4637 = vmatprep.mubr.msk.bf16.mxu1 %vm2300_vm9, %v4078_v17 }
 0x1a4   : > { %2276 = vst.msk [vmem:[#allocation3 + $0x38] sm:$0xff] %vm2268_vm8, %v2259_v51 }
 0x1a5   : > { %v2845_v30 = vpop.permute.xlu1 %2844 }
 0x1a6   : > { %2864 = vst.msk [vmem:[#allocation3 + $0x20] sm:$0xff] %vm1050_vm15, %v2845_v30 }
 0x1a7   : > { %v4051_v46 = vpop.permute.xlu0 %4050 }
 0x1a8   : > { %4071 = vst.msk [vmem:[#allocation3 + $0x18] sm:$0xff] %vm2268_vm8, %v4051_v46 }
 0x1aa   : > { %v2847_v59 = vpop.permute.xlu1 %2846 }
 0x1ab   : > { %v3005_v57 = vpop.permute.xlu0 %3004  ;;  %v2284_v58 = vld [vmem:[#allocation3 + $0x38] sm:$0xff]  ;;  %2865 = vst.msk [vmem:[#allocation3 + $0x28] sm:$0xff] %vm1050_vm15, %v2847_v59 }
 0x1ac   : > { %3024 = vst.msk [vmem:[#allocation3 + $0x20] sm:$0xff] %vm1214_vm1, %v3005_v57  ;;  %4624 = vmatmul.mubr.msk.bf16.gmra.mrb[12].mxu0 %vm2300_vm9, %v2284_v58 }
 0x1ad   : > { %2595 = vst.msk [vmem:[#allocation3 + $0x38] sm:$0xff] %vm774_vm14, %v4718_v39 }
 0x1ae   : > { %v3007_v0 = vpop.permute.xlu1 %3006 }
 0x1af   : > { %v3097_v3 = vpop.permute.xlu0 %3096  ;;  %v4079_v62 = vld [vmem:[#allocation3 + $0x18] sm:$0xff]  ;;  %3025 = vst.msk [vmem:[#allocation3 + $0x28] sm:$0xff] %vm1214_vm1, %v3007_v0 }
 0x1b0   : > { %3116 = vst.msk [vmem:[#allocation3 + $0x20] sm:$0xff] %vm1307_vm2, %v3097_v3  ;;  %4638 = vmatmul.mubr.msk.bf16.gmra.mrb[4].mxu1 %vm2300_vm9, %v4079_v62 }
 0x1b6   : > { %v3369_v61 = vpop.permute.xlu0 %3368 }
 0x1b7   : > { %v3099_v10 = vpop.permute.xlu1 %3098  ;;  %3388 = vst.msk [vmem:[#allocation3 + $0x20] sm:$0xff] %vm1580_vm3, %v3369_v61 }
 0x1b8   : > { %3117 = vst.msk [vmem:[#allocation3 + $0x28] sm:$0xff] %vm1307_vm2, %v3099_v10 }
 0x1ba   : > { %v3529_v20 = vpop.permute.xlu0 %3528 }
 0x1bb   : > { %3548 = vst.msk [vmem:[#allocation3 + $0x20] sm:$0xff] %vm1741_vm4, %v3529_v20 }
 0x1be   : > { %v3621_v6 = vpop.permute.xlu0 %3620 }
 0x1bf   : > { %3640 = vst.msk [vmem:[#allocation3 + $0x20] sm:$0xff] %vm1834_vm5, %v3621_v6 }
 0x1c3   : > { %v3371_v8 = vpop.permute.xlu1 %3370 }
 0x1c4   : > { %3389 = vst.msk [vmem:[#allocation3 + $0x28] sm:$0xff] %vm1580_vm3, %v3371_v8 }
 0x1c7   : > { %v3531_v24 = vpop.permute.xlu1 %3530 }
 0x1c8   : > { %3549 = vst.msk [vmem:[#allocation3 + $0x28] sm:$0xff] %vm1741_vm4, %v3531_v24  ;;  %v3893_v49 = vpop.permute.xlu0 %3892 }
 0x1c9   : > { %3912 = vst.msk [vmem:[#allocation3 + $0x20] sm:$0xff] %vm2107_vm7, %v3893_v49 }
 0x1cb   : > { %v3623_v7 = vpop.permute.xlu1 %3622 }
 0x1cc   : > { %3641 = vst.msk [vmem:[#allocation3 + $0x28] sm:$0xff] %vm1834_vm5, %v3623_v7  ;;  %v4053_v2 = vpop.permute.xlu0 %4052 }
 0x1cd   : > { %4072 = vst.msk [vmem:[#allocation3 + $0x20] sm:$0xff] %vm2268_vm8, %v4053_v2 }
 0x1d0   : > { %v3895_v56 = vpop.permute.xlu1 %3894  ;;  %v4055_v5 = vpop.permute.xlu0 %4054 }
 0x1d1   : > { %3913 = vst.msk [vmem:[#allocation3 + $0x28] sm:$0xff] %vm2107_vm7, %v3895_v56 }
 0x1d2   : > { %4073 = vst.msk [vmem:[#allocation3 + $0x28] sm:$0xff] %vm2268_vm8, %v4055_v5 }
 0x1d4   : > { %v2849_v19 = vpop.permute.xlu1 %2848  ;;  %v4080_v11 = vld [vmem:[#allocation3 + $0x20] sm:$0xff]  ;;  %v4613_v52 = vpop.f32.mrb[0].mxu0 }
 0x1d5   : > { %2866 = vst.msk [vmem:[#allocation3 + $0x30] sm:$0xff] %vm1050_vm15, %v2849_v19  ;;  %4641 = vmatprep.mubr.msk.bf16.mxu1 %vm2300_vm9, %v4080_v11  ;;  %v2363_v43 = vpop.f32.mrb[1].mxu0 }
 0x1d6   : > { %2429 = vst.msk [vmem:[#allocation4 + $0x10] sm:$0xff] %vm2426_vm0, %v4613_v52  ;;  %2427 = vst.msk [vmem:[#allocation4] sm:$0xff] %vm2426_vm0, %v2363_v43  ;;  %v4614_v28 = vpop.f32.mrb[2].mxu0 }
 0x1d7   : > { %v3009_v44 = vpop.permute.xlu0 %3008  ;;  %2430 = vst.msk [vmem:[#allocation4 + $0x18] sm:$0xff] %vm2426_vm0, %v4614_v28  ;;  %v2366_v55 = vpop.f32.mrb[3].mxu0 }
 0x1d8   : > { %v2851_v25 = vpop.permute.xlu1 %2850  ;;  %3026 = vst.msk [vmem:[#allocation3 + $0x30] sm:$0xff] %vm1214_vm1, %v3009_v44 }
 0x1d9   : > { %2428 = vst.msk [vmem:[#allocation4 + $0x8] sm:$0xff] %vm2426_vm0, %v2366_v55  ;;  %v4081_v41 = vld [vmem:[#allocation3 + $0x28] sm:$0xff] }
 0x1da   : > { %2867 = vst.msk [vmem:[#allocation3 + $0x38] sm:$0xff] %vm1050_vm15, %v2851_v25  ;;  %4642 = vmatmul.mubr.msk.bf16.gmra.mrb[8].mxu1 %vm2300_vm9, %v4081_v41 }
 0x1db   : > { %v3101_v14 = vpop.permute.xlu0 %3100 }
 0x1dc   : > { %v3011_v53 = vpop.permute.xlu1 %3010  ;;  %3118 = vst.msk [vmem:[#allocation3 + $0x30] sm:$0xff] %vm1307_vm2, %v3101_v14  ;;  %v4617_v22 = vpop.f32.mrb[4].mxu0 }
 0x1dd   : > { %3027 = vst.msk [vmem:[#allocation3 + $0x38] sm:$0xff] %vm1214_vm1, %v3011_v53  ;;  %v2379_v15 = vpop.f32.mrb[5].mxu0 }
 0x1de   : > { %2433 = vst.msk [vmem:[#allocation4 + $0x30] sm:$0xff] %vm2426_vm0, %v4617_v22  ;;  %2431 = vst.msk [vmem:[#allocation4 + $0x20] sm:$0xff] %vm2426_vm0, %v2379_v15  ;;  %v4618_v33 = vpop.f32.mrb[6].mxu0  ;;  %v2445_v18 = vld [vmem:[#allocation4 + $0x10] ss:$2 sm:$0xff] }
 0x1df   : > { %v2461_v29 = vld [vmem:[#allocation4 + $0x11] ss:$2 sm:$0xff]  ;;  %2434 = vst.msk [vmem:[#allocation4 + $0x38] sm:$0xff] %vm2426_vm0, %v4618_v33  ;;  %v2382_v48 = vpop.f32.mrb[7].mxu0 }
 0x1e0   : > { %v2475_v9 = vmax.f32 %v2445_v18, %v2461_v29  ;;  %v2443_v21 = vld [vmem:[#allocation4] ss:$2 sm:$0xff]  ;;  %v2459_v40 = vld [vmem:[#allocation4 + $0x1] ss:$2 sm:$0xff]  ;;  %2432 = vst.msk [vmem:[#allocation4 + $0x28] sm:$0xff] %vm2426_vm0, %v2382_v48 }
 0x1e1   : > { %v2474_v26 = vmax.f32 %v2443_v21, %v2459_v40 }
 0x1e3   : > { %v2482_v4 = vmax.f32 %v2474_v26, %v2475_v9  ;;  %v3373_v23 = vpop.permute.xlu0 %3372  ;;  %v3103_v13 = vpop.permute.xlu1 %3102 }
 0x1e4   : > { %3390 = vst.msk [vmem:[#allocation3 + $0x30] sm:$0xff] %vm1580_vm3, %v3373_v23 }
 0x1e5   : > { %v2492_v45 = vadd.f32 %v5939_v38, %v2482_v4  ;;  %3119 = vst.msk [vmem:[#allocation3 + $0x38] sm:$0xff] %vm1307_vm2, %v3103_v13 }
 0x1e6   : > { %v2449_v27 = vld [vmem:[#allocation4 + $0x30] ss:$2 sm:$0xff]  ;;  %v2465_v36 = vld [vmem:[#allocation4 + $0x31] ss:$2 sm:$0xff] }
 0x1e7   : > { %v2496_v60 = vmax.f32 %v2492_v45, 0.0  ;;  %v3533_v32 = vpop.permute.xlu0 %3532  ;;  %v2477_v34 = vmax.f32 %v2449_v27, %v2465_v36  ;;  %v2447_v42 = vld [vmem:[#allocation4 + $0x20] ss:$2 sm:$0xff]  ;;  %v2463_v47 = vld [vmem:[#allocation4 + $0x21] ss:$2 sm:$0xff] }
 0x1e8   : > { %3550 = vst.msk [vmem:[#allocation3 + $0x30] sm:$0xff] %vm1741_vm4, %v3533_v32  ;;  %v2476_v16 = vmax.f32 %v2447_v42, %v2463_v47 }
 0x1e9   : > { %v4575_v1 = vpack.c.bf16 %v2496_v60, %v2496_v60 }
 0x1ea   : > { %v2483_v35 = vmax.f32 %v2476_v16, %v2477_v34 }
 0x1eb   : > { %2517 = vst.msk [vmem:[%s5948_s10] sm:$0xf] %vm2516_vm6, %v4575_v1  ;;  %v3625_v50 = vpop.permute.xlu0 %3624 }
 0x1ec   : > { %3642 = vst.msk [vmem:[#allocation3 + $0x30] sm:$0xff] %vm1834_vm5, %v3625_v50  ;;  %v2493_v31 = vadd.f32 %v5939_v38, %v2483_v35 }
 0x1ee   : > { %v2497_v12 = vmax.f32 %v2493_v31, 0.0 }
 0x1ef   : > { %v3375_v37 = vpop.permute.xlu1 %3374 }
 0x1f0   : > { %3391 = vst.msk [vmem:[#allocation3 + $0x38] sm:$0xff] %vm1580_vm3, %v3375_v37  ;;  %v4576_v63 = vpack.c.bf16 %v2497_v12, %v2497_v12 }
 0x1f1   : > { %v3897_v51 = vpop.permute.xlu0 %3896 }
 0x1f2   : > { %2518 = vst.msk [vmem:[%s5948_s10 + $0x4] sm:$0xf] %vm2516_vm6, %v4576_v63 }
 0x1f3   : > { %v3535_v54 = vpop.permute.xlu1 %3534  ;;  %3914 = vst.msk [vmem:[#allocation3 + $0x30] sm:$0xff] %vm2107_vm7, %v3897_v51 }
 0x1f4   : > { %3551 = vst.msk [vmem:[#allocation3 + $0x38] sm:$0xff] %vm1741_vm4, %v3535_v54 }
 0x1f5   : > { %v4057_v30 = vpop.permute.xlu0 %4056 }
 0x1f6   : > { %4074 = vst.msk [vmem:[#allocation3 + $0x30] sm:$0xff] %vm2268_vm8, %v4057_v30 }
 0x1f7   : > { %v3627_v17 = vpop.permute.xlu1 %3626 }
 0x1f8   : > { %3643 = vst.msk [vmem:[#allocation3 + $0x38] sm:$0xff] %vm1834_vm5, %v3627_v17 }
 0x1fb   : > { %v3899_v46 = vpop.permute.xlu1 %3898 }
 0x1fc   : > { %3915 = vst.msk [vmem:[#allocation3 + $0x38] sm:$0xff] %vm2107_vm7, %v3899_v46 }
 0x1fd   : > { %v4082_v59 = vld [vmem:[#allocation3 + $0x30] sm:$0xff] }
 0x1fe   : > { %4645 = vmatprep.mubr.msk.bf16.mxu1 %vm2300_vm9, %v4082_v59 }
 0x1ff   : > { %v4059_v39 = vpop.permute.xlu1 %4058 }
 0x200   : > { %4075 = vst.msk [vmem:[#allocation3 + $0x38] sm:$0xff] %vm2268_vm8, %v4059_v39 }
 0x207   : > { %v4083_v57 = vld [vmem:[#allocation3 + $0x38] sm:$0xff] }
 0x208   : > { %4646 = vmatmul.mubr.msk.bf16.gmra.mrb[12].mxu1 %vm2300_vm9, %v4083_v57 }
 0x229   : > { %v4621_v58 = vpop.f32.mrb[8].mxu0 }
 0x22a   : > { %2437 = vst.msk [vmem:[#allocation4 + $0x50] sm:$0xff] %vm2426_vm0, %v4621_v58  ;;  %v2395_v0 = vpop.f32.mrb[9].mxu0 }
 0x22b   : > { %2435 = vst.msk [vmem:[#allocation4 + $0x40] sm:$0xff] %vm2426_vm0, %v2395_v0  ;;  %v4622_v3 = vpop.f32.mrb[10].mxu0 }
 0x22c   : > { %2438 = vst.msk [vmem:[#allocation4 + $0x58] sm:$0xff] %vm2426_vm0, %v4622_v3  ;;  %v2398_v62 = vpop.f32.mrb[11].mxu0 }
 0x22d   : > { %2436 = vst.msk [vmem:[#allocation4 + $0x48] sm:$0xff] %vm2426_vm0, %v2398_v62 }
 0x22f   : > { %v4635_v61 = vpop.f32.mrb[0].mxu1 }
 0x230   : > { %4207 = vst.msk [vmem:[#allocation4 + $0x10] sm:$0xff] %vm2426_vm0, %v4635_v61  ;;  %v4142_v10 = vpop.f32.mrb[1].mxu1 }
 0x231   : > { %4205 = vst.msk [vmem:[#allocation4] sm:$0xff] %vm2426_vm0, %v4142_v10  ;;  %v4636_v20 = vpop.f32.mrb[2].mxu1 }
 0x232   : > { %4208 = vst.msk [vmem:[#allocation4 + $0x18] sm:$0xff] %vm2426_vm0, %v4636_v20  ;;  %v4145_v6 = vpop.f32.mrb[3].mxu1 }
 0x233   : > { %v2453_v8 = vld [vmem:[#allocation4 + $0x50] ss:$2 sm:$0xff]  ;;  %v2469_v24 = vld [vmem:[#allocation4 + $0x51] ss:$2 sm:$0xff]  ;;  %4206 = vst.msk [vmem:[#allocation4 + $0x8] sm:$0xff] %vm2426_vm0, %v4145_v6 }
 0x234   : > { %v2479_v49 = vmax.f32 %v2453_v8, %v2469_v24  ;;  %v2451_v7 = vld [vmem:[#allocation4 + $0x40] ss:$2 sm:$0xff]  ;;  %v2467_v2 = vld [vmem:[#allocation4 + $0x41] ss:$2 sm:$0xff] }
 0x235   : > { %v2478_v56 = vmax.f32 %v2451_v7, %v2467_v2 }
 0x237   : > { %v2484_v5 = vmax.f32 %v2478_v56, %v2479_v49 }
 0x239   : > { %v2494_v19 = vadd.f32 %v5939_v38, %v2484_v5  ;;  %v4222_v11 = vld [vmem:[#allocation4 + $0x10] ss:$2 sm:$0xff]  ;;  %v4230_v52 = vld [vmem:[#allocation4 + $0x11] ss:$2 sm:$0xff] }
 0x23a   : > { %v4238_v43 = vmax.f32 %v4222_v11, %v4230_v52  ;;  %v4221_v28 = vld [vmem:[#allocation4] ss:$2 sm:$0xff]  ;;  %v4229_v44 = vld [vmem:[#allocation4 + $0x1] ss:$2 sm:$0xff] }
 0x23b   : > { %v2498_v55 = vmax.f32 %v2494_v19, 0.0  ;;  %v4237_v25 = vmax.f32 %v4221_v28, %v4229_v44 }
 0x23d   : > { %v4577_v41 = vpack.c.bf16 %v2498_v55, %v2498_v55  ;;  %v4245_v14 = vmax.f32 %v4237_v25, %v4238_v43 }
 0x23f   : > { %2519 = vst.msk [vmem:[%s5948_s10 + $0x8] sm:$0xf] %vm2516_vm6, %v4577_v41  ;;  %v4249_v53 = vadd.f32 %v5939_v38, %v4245_v14 }
 0x241   : > { %v4253_v22 = vmax.f32 %v4249_v53, 0.0 }
 0x243   : > { %v4579_v15 = vpack.c.bf16 %v4253_v22, %v4253_v22 }
 0x245   : > { %4567 = vst.msk [vmem:[%s5948_s10 + $0x10] sm:$0xf] %vm2516_vm6, %v4579_v15 }
 0x27f   : > { %v4625_v33 = vpop.f32.mrb[12].mxu0 }
 0x280   : > { %2441 = vst.msk [vmem:[#allocation4 + $0x70] sm:$0xff] %vm2426_vm0, %v4625_v33  ;;  %v2411_v18 = vpop.f32.mrb[13].mxu0 }
 0x281   : > { %2439 = vst.msk [vmem:[#allocation4 + $0x60] sm:$0xff] %vm2426_vm0, %v2411_v18  ;;  %v4626_v29 = vpop.f32.mrb[14].mxu0 }
 0x282   : > { %2442 = vst.msk [vmem:[#allocation4 + $0x78] sm:$0xff] %vm2426_vm0, %v4626_v29  ;;  %v2414_v48 = vpop.f32.mrb[15].mxu0 }
 0x283   : > { %2440 = vst.msk [vmem:[#allocation4 + $0x68] sm:$0xff] %vm2426_vm0, %v2414_v48  ;;  %v4639_v9 = vpop.f32.mrb[4].mxu1 }
 0x284   : > { %4211 = vst.msk [vmem:[#allocation4 + $0x30] sm:$0xff] %vm2426_vm0, %v4639_v9  ;;  %v4158_v21 = vpop.f32.mrb[5].mxu1 }
 0x285   : > { %4209 = vst.msk [vmem:[#allocation4 + $0x20] sm:$0xff] %vm2426_vm0, %v4158_v21  ;;  %v4640_v40 = vpop.f32.mrb[6].mxu1 }
 0x286   : > { %4212 = vst.msk [vmem:[#allocation4 + $0x38] sm:$0xff] %vm2426_vm0, %v4640_v40  ;;  %v4161_v26 = vpop.f32.mrb[7].mxu1 }
 0x287   : > { %4210 = vst.msk [vmem:[#allocation4 + $0x28] sm:$0xff] %vm2426_vm0, %v4161_v26 }
 0x289   : > { %v2457_v4 = vld [vmem:[#allocation4 + $0x70] ss:$2 sm:$0xff]  ;;  %v2473_v23 = vld [vmem:[#allocation4 + $0x71] ss:$2 sm:$0xff] }
 0x28a   : > { %v2481_v13 = vmax.f32 %v2457_v4, %v2473_v23  ;;  %v2455_v45 = vld [vmem:[#allocation4 + $0x60] ss:$2 sm:$0xff]  ;;  %v2471_v60 = vld [vmem:[#allocation4 + $0x61] ss:$2 sm:$0xff] }
 0x28b   : > { %v2480_v27 = vmax.f32 %v2455_v45, %v2471_v60 }
 0x28d   : > { %v4224_v36 = vld [vmem:[#allocation4 + $0x30] ss:$2 sm:$0xff]  ;;  %v4232_v32 = vld [vmem:[#allocation4 + $0x31] ss:$2 sm:$0xff]  ;;  %v2485_v34 = vmax.f32 %v2480_v27, %v2481_v13 }
 0x28e   : > { %v4240_v42 = vmax.f32 %v4224_v36, %v4232_v32  ;;  %v4223_v47 = vld [vmem:[#allocation4 + $0x20] ss:$2 sm:$0xff]  ;;  %v4231_v1 = vld [vmem:[#allocation4 + $0x21] ss:$2 sm:$0xff] }
 0x28f   : > { %v4239_v16 = vmax.f32 %v4223_v47, %v4231_v1  ;;  %v2495_v35 = vadd.f32 %v5939_v38, %v2485_v34 }
 0x291   : > { %v4246_v50 = vmax.f32 %v4239_v16, %v4240_v42  ;;  %v2499_v31 = vmax.f32 %v2495_v35, 0.0 }
 0x293   : > { %v4250_v37 = vadd.f32 %v5939_v38, %v4246_v50  ;;  %v4578_v12 = vpack.c.bf16 %v2499_v31, %v2499_v31 }
 0x295   : > { %v4254_v63 = vmax.f32 %v4250_v37, 0.0  ;;  %2520 = vst.msk [vmem:[%s5948_s10 + $0xc] sm:$0xf] %vm2516_vm6, %v4578_v12 }
 0x297   : > { %v4580_v54 = vpack.c.bf16 %v4254_v63, %v4254_v63 }
 0x299   : > { %4568 = vst.msk [vmem:[%s5948_s10 + $0x14] sm:$0xf] %vm2516_vm6, %v4580_v54 }
 0x2ad   : > { %v4643_v51 = vpop.f32.mrb[8].mxu1 }
 0x2ae   : > { %4215 = vst.msk [vmem:[#allocation4 + $0x50] sm:$0xff] %vm2426_vm0, %v4643_v51  ;;  %v4174_v17 = vpop.f32.mrb[9].mxu1 }
 0x2af   : > { %4213 = vst.msk [vmem:[#allocation4 + $0x40] sm:$0xff] %vm2426_vm0, %v4174_v17  ;;  %v4644_v30 = vpop.f32.mrb[10].mxu1 }
 0x2b0   : > { %4216 = vst.msk [vmem:[#allocation4 + $0x58] sm:$0xff] %vm2426_vm0, %v4644_v30  ;;  %v4177_v46 = vpop.f32.mrb[11].mxu1 }
 0x2b1   : > { %4214 = vst.msk [vmem:[#allocation4 + $0x48] sm:$0xff] %vm2426_vm0, %v4177_v46 }
 0x2b7   : > { %v4226_v39 = vld [vmem:[#allocation4 + $0x50] ss:$2 sm:$0xff]  ;;  %v4234_v59 = vld [vmem:[#allocation4 + $0x51] ss:$2 sm:$0xff] }
 0x2b8   : > { %v4242_v57 = vmax.f32 %v4226_v39, %v4234_v59  ;;  %v4225_v58 = vld [vmem:[#allocation4 + $0x40] ss:$2 sm:$0xff]  ;;  %v4233_v0 = vld [vmem:[#allocation4 + $0x41] ss:$2 sm:$0xff] }
 0x2b9   : > { %v4241_v3 = vmax.f32 %v4225_v58, %v4233_v0 }
 0x2bb   : > { %v4247_v62 = vmax.f32 %v4241_v3, %v4242_v57 }
 0x2bd   : > { %v4251_v61 = vadd.f32 %v5939_v38, %v4247_v62 }
 0x2bf   : > { %v4255_v10 = vmax.f32 %v4251_v61, 0.0 }
 0x2c1   : > { %v4581_v20 = vpack.c.bf16 %v4255_v10, %v4255_v10 }
 0x2c3   : > { %4569 = vst.msk [vmem:[%s5948_s10 + $0x18] sm:$0xf] %vm2516_vm6, %v4581_v20 }
 0x2db   : > { %v4647_v6 = vpop.f32.mrb[12].mxu1 }
 0x2dc   : > { %4219 = vst.msk [vmem:[#allocation4 + $0x70] sm:$0xff] %vm2426_vm0, %v4647_v6  ;;  %v4190_v8 = vpop.f32.mrb[13].mxu1 }
 0x2dd   : > { %4217 = vst.msk [vmem:[#allocation4 + $0x60] sm:$0xff] %vm2426_vm0, %v4190_v8  ;;  %v4648_v24 = vpop.f32.mrb[14].mxu1 }
 0x2de   : > { %4220 = vst.msk [vmem:[#allocation4 + $0x78] sm:$0xff] %vm2426_vm0, %v4648_v24  ;;  %v4193_v49 = vpop.f32.mrb[15].mxu1 }
 0x2df   : > { %4218 = vst.msk [vmem:[#allocation4 + $0x68] sm:$0xff] %vm2426_vm0, %v4193_v49 }
 0x2e5   : > { %v4228_v7 = vld [vmem:[#allocation4 + $0x70] ss:$2 sm:$0xff]  ;;  %v4236_v2 = vld [vmem:[#allocation4 + $0x71] ss:$2 sm:$0xff] }
 0x2e6   : > { %v4244_v56 = vmax.f32 %v4228_v7, %v4236_v2  ;;  %v4227_v5 = vld [vmem:[#allocation4 + $0x60] ss:$2 sm:$0xff]  ;;  %v4235_v19 = vld [vmem:[#allocation4 + $0x61] ss:$2 sm:$0xff] }
 0x2e7   : > { %v4243_v11 = vmax.f32 %v4227_v5, %v4235_v19 }
 0x2e9   : > { %v4248_v52 = vmax.f32 %v4243_v11, %v4244_v56 }
 0x2eb   : > { %v4252_v43 = vadd.f32 %v5939_v38, %v4248_v52 }
 0x2ed   : > { %v4256_v28 = vmax.f32 %v4252_v43, 0.0 }
 0x2ef   : > { %v4582_v44 = vpack.c.bf16 %v4256_v28, %v4256_v28 }
 0x2f1   : > { %4570 = vst.msk [vmem:[%s5948_s10 + $0x1c] sm:$0xf] %vm2516_vm6, %v4582_v44 }
 0x2f2 PF: > { %s13_s12 = sadd.s32 1, %s4725_s12  }
 0x2f3   : > { %p10_p4 = scmp.ge.s32.totalorder %s13_s12, 4  }
 0x2f5   :  { %12 = sbr.rel (!%p10_p4) target bundleno = 1 (0x1), region = 85 }

</bundles_post_ra>
